<compile_context>
chip_gen: v6e
topology: v6e:2x2x1
jax: 0.10.0
libtpu: 0.0.40
codegen_flags: <defaults>
</compile_context>

<pallas_src>
import functools

import jax
import jax.numpy as jnp
from jax import lax
from jax.experimental import pallas as pl
from jax.experimental.pallas import tpu as pltpu


# ----------------------------- fused Pallas kernel -----------------------------

def _fused_block_kernel(x_ref, w1_ref, b1_ref, dw_ref, b2_ref, w3_ref, b3_ref,
                        *rest, H, W, Cin, stride, exp_chunk, dw_chunk, proj_chunk):
    # rest = (wsc_ref, o_ref, h1_ref, h2_ref) when stride == 1 (a shortcut always
    # exists for stride 1: conv or identity), else (o_ref, h1_ref, h2_ref).
    if stride == 1:
        wsc_ref, o_ref, h1_ref, h2_ref = rest
    else:
        o_ref, h1_ref, h2_ref = rest

    Mp = h1_ref.shape[-1]                 # expanded (lane-padded) channel count
    Op = o_ref.shape[-1]                  # output (lane-padded) channel count
    Ho = (H - 1) // stride + 1            # conv2: k=3, pad=1
    Wo = (W - 1) // stride + 1

    # stage 0: refresh only the halo border of the h1 scratch.  The interior is fully
    # overwritten by stage 1 every grid step, so per-step halo zeroing keeps the
    # kernel correct even when the batch axis is sharded across cores, and is ~5x
    # cheaper than zeroing the whole scratch.
    zrow = jnp.zeros((1, W + 2, Mp), jnp.float32)
    h1_ref[0:1, :, :] = zrow
    h1_ref[H + 1:H + 2, :, :] = zrow
    zcol = jnp.zeros((H, 1, Mp), jnp.float32)
    h1_ref[1:H + 1, 0:1, :] = zcol
    h1_ref[1:H + 1, W + 1:W + 2, :] = zcol

    # stage 1: 1x1 expand (+ folded BN1, ReLU6) into the scratch interior.  x is read
    # with its true (unpadded) channel count; bf16 operands, f32 accumulation.
    w1 = w1_ref[...]                      # (Cin, Mp) bf16
    b1 = b1_ref[...]                      # (1, Mp)  f32
    for r0 in range(0, H, exp_chunk):
        rc = min(exp_chunk, H - r0)
        xc = x_ref[r0:r0 + rc].reshape(rc * W, Cin).astype(jnp.bfloat16)
        h = jnp.dot(xc, w1, preferred_element_type=jnp.float32) + b1
        h = jnp.clip(h, 0.0, 6.0)
        h1_ref[1 + r0:1 + r0 + rc, 1:1 + W, :] = h.reshape(rc, W, Mp)

    # stage 2: 3x3 depthwise (+ folded BN2, ReLU6) for the Ho needed output rows only,
    # at full column resolution, written to the bf16 h2 scratch so the projection can
    # run once with a large M.  Small row chunks bound the f32 accumulator size.
    dwv = dw_ref[...]                     # (9, Mp) f32 (BN folded)
    b2 = b2_ref[...]                      # (1, Mp) f32
    for o0 in range(0, Ho, dw_chunk):
        oc = min(dw_chunk, Ho - o0)
        acc = jnp.zeros((oc, W, Mp), jnp.float32)
        for ki in range(3):
            if stride == 1:
                slab = h1_ref[o0 + ki:o0 + ki + oc, :, :]          # (oc, W+2, Mp)
            else:
                r = stride * o0 + ki                               # oc == 1 here
                slab = h1_ref[r:r + 1, :, :]                       # (1, W+2, Mp)
            for kj in range(3):
                # TODO(synk): replace the kj-offset sublane slices with pltpu.roll on
                # a sublane-padded scratch once shapes grow.
                acc = acc + slab[:, kj:kj + W, :] * dwv[ki * 3 + kj]
        h2 = jnp.clip(acc + b2, 0.0, 6.0).astype(jnp.bfloat16)
        h2_ref[o0 * W:(o0 + oc) * W, :] = h2.reshape(oc * W, Mp)

    w3 = w3_ref[...]                      # (Mp, Op) bf16 (BN folded)
    b3 = b3_ref[...]                      # (1, Op)  f32 (shortcut BN bias pre-folded)

    if stride == 1:
        # stage 3: 1x1 project + fused shortcut, large-M matmuls straight to output.
        wsc = wsc_ref[...]                # (Cin, Op) bf16 (conv shortcut or identity)
        for r0 in range(0, H, proj_chunk):
            rc = min(proj_chunk, H - r0)
            h2c = h2_ref[r0 * W:(r0 + rc) * W, :]
            out = jnp.dot(h2c, w3, preferred_element_type=jnp.float32)
            xc = x_ref[r0:r0 + rc].reshape(rc * W, Cin).astype(jnp.bfloat16)
            out = out + jnp.dot(xc, wsc, preferred_element_type=jnp.float32) + b3
            o_ref[r0:r0 + rc] = out.reshape(rc, W, Op).astype(o_ref.dtype)
    else:
        # stage 3 (strided): decimate columns of h2 for ALL output rows with one
        # one-hot matmul, then one projection matmul (M = Ho*Wo).
        HoWo = Ho * Wo
        HoW = Ho * W
        a = lax.broadcasted_iota(jnp.int32, (HoWo, HoW), 0)
        b = lax.broadcasted_iota(jnp.int32, (HoWo, HoW), 1)
        src = (a // Wo) * W + (a % Wo) * stride
        sel = (b == src).astype(jnp.bfloat16)                       # (Ho*Wo, Ho*W)
        dec = jnp.dot(sel, h2_ref[...], preferred_element_type=jnp.float32)
        out = jnp.dot(dec.astype(jnp.bfloat16), w3,
                      preferred_element_type=jnp.float32) + b3
        o_ref[...] = out.reshape(Ho, Wo, Op).astype(o_ref.dtype)


# ----------------------------- wrapper -----------------------------

def _round_up(x, m):
    return (x + m - 1) // m * m


def block_forward(x_nchw, params, in_planes, out_planes, expansion, stride):
    N, Cin, H, W = x_nchw.shape
    assert Cin == in_planes
    planes = int(expansion * in_planes)

    Mp = _round_up(planes, 128)           # lane-dense padded widths (MXU N dims)
    Op = _round_up(out_planes, 128)
    Ho = (H - 1) // stride + 1
    Wo = (W - 1) // stride + 1

    # NCHW -> NHWC only at the block boundary.  Channels are NOT padded in HBM.
    # TODO(synk): when blocks are chained, keep activations in padded NHWC between
    # blocks and convert only at network boundaries.
    x = jnp.transpose(x_nchw, (0, 2, 3, 1))

    # Fold BN scales into the conv weights (inference-mode BN), zero-pad channel axes
    # to 128 lanes, cast MXU operands to bf16 (accumulation stays f32 in-kernel).
    w1 = jnp.pad(params["w1"] * params["s1"][None, :],
                 ((0, 0), (0, Mp - planes))).astype(jnp.bfloat16)
    b1 = jnp.pad(params["b1"], (0, Mp - planes)).reshape(1, Mp)
    dw = jnp.pad(params["dw"] * params["s2"][None, :], ((0, 0), (0, Mp - planes)))
    b2 = jnp.pad(params["b2"], (0, Mp - planes)).reshape(1, Mp)
    w3 = jnp.pad(params["w3"] * params["s3"][None, :],
                 ((0, Mp - planes), (0, Op - out_planes))).astype(jnp.bfloat16)
    b3 = jnp.pad(params["b3"], (0, Op - out_planes))

    extra_inputs, extra_specs = [], []
    if stride == 1:
        if in_planes != out_planes:                      # conv shortcut
            wsc_f = params["wsc"] * params["ssc"][None, :]
            bsc_f = params["bsc"]
        else:                                            # identity shortcut as 1x1 conv
            wsc_f = jnp.eye(in_planes, dtype=jnp.float32)
            bsc_f = jnp.zeros((out_planes,), jnp.float32)
        wsc = jnp.pad(wsc_f, ((0, 0), (0, Op - out_planes))).astype(jnp.bfloat16)
        b3 = b3 + jnp.pad(bsc_f, (0, Op - out_planes))   # single fused epilogue bias
        extra_inputs = [wsc]
        extra_specs = [pl.BlockSpec((Cin, Op), lambda n: (0, 0))]
    b3 = b3.reshape(1, Op)

    # Chunking: keep the matmul M dimension >= 256 (fills the 2x256 MXU on v6e/v7x,
    # still fine on v5e's 4x128); keep the depthwise f32 accumulator small.
    exp_chunk = max(1, min(H, -(-256 // W)))
    proj_chunk = exp_chunk
    dw_chunk = 4 if stride == 1 else 1

    kernel = functools.partial(_fused_block_kernel, H=H, W=W, Cin=Cin, stride=stride,
                               exp_chunk=exp_chunk, dw_chunk=dw_chunk,
                               proj_chunk=proj_chunk)

    # Note: the weight operands are grid-constant; single-buffering them
    # (pipeline_mode=pl.Buffered(1)) only pays off at real MobileNet widths.
    out = pl.pallas_call(
        kernel,
        out_shape=jax.ShapeDtypeStruct((N, Ho, Wo, Op), x.dtype),
        grid=(N,),
        in_specs=[
            pl.BlockSpec((None, H, W, Cin), lambda n: (n, 0, 0, 0)),  # x (unpadded C)
            pl.BlockSpec((Cin, Mp), lambda n: (0, 0)),                # w1 (BN folded)
            pl.BlockSpec((1, Mp), lambda n: (0, 0)),                  # b1
            pl.BlockSpec((9, Mp), lambda n: (0, 0)),                  # dw (BN folded)
            pl.BlockSpec((1, Mp), lambda n: (0, 0)),                  # b2
            pl.BlockSpec((Mp, Op), lambda n: (0, 0)),                 # w3 (BN folded)
            pl.BlockSpec((1, Op), lambda n: (0, 0)),                  # b3 (+ sc bias)
        ] + extra_specs,
        out_specs=pl.BlockSpec((None, Ho, Wo, Op), lambda n: (n, 0, 0, 0)),
        scratch_shapes=[
            pltpu.VMEM((H + 2, W + 2, Mp), jnp.float32),   # h1: expanded act + halo
            pltpu.VMEM((Ho * W, Mp), jnp.bfloat16),        # h2: post-depthwise act
        ],
        compiler_params=pltpu.CompilerParams(
            dimension_semantics=("parallel",),
            vmem_limit_bytes=32 * 1024 * 1024),
    )(x, w1, b1, dw, b2, w3, b3, *extra_inputs)

    out = out[..., :out_planes]                      # drop lane padding
    return jnp.transpose(out, (0, 3, 1, 2))          # back to NCHW (PyTorch layout)


# ----------------------------- parameters -----------------------------

def _init_bn(key, c):
    k1, k2, k3, k4 = jax.random.split(key, 4)
    gamma = jax.random.uniform(k1, (c,), jnp.float32, 0.5, 1.5)
    beta = 0.1 * jax.random.normal(k2, (c,), jnp.float32)
    mean = 0.1 * jax.random.normal(k3, (c,), jnp.float32)
    var = jax.random.uniform(k4, (c,), jnp.float32, 0.5, 1.5)
    scale = gamma / jnp.sqrt(var + 1e-5)
    bias = beta - mean * scale
    return scale, bias


def init_block_params(key, in_planes, out_planes, expansion, stride):
    planes = int(expansion * in_planes)
    keys = jax.random.split(key, 8)
    p = {}
    p["w1"] = 0.2 * jax.random.normal(keys[0], (in_planes, planes), jnp.float32)
    p["s1"], p["b1"] = _init_bn(keys[1], planes)
    p["dw"] = 0.2 * jax.random.normal(keys[2], (9, planes), jnp.float32)   # (kh*kw, C)
    p["s2"], p["b2"] = _init_bn(keys[3], planes)
    p["w3"] = 0.2 * jax.random.normal(keys[4], (planes, out_planes), jnp.float32)
    p["s3"], p["b3"] = _init_bn(keys[5], out_planes)
    if stride == 1 and in_planes != out_planes:
        p["wsc"] = 0.2 * jax.random.normal(keys[6], (in_planes, out_planes), jnp.float32)
        p["ssc"], p["bsc"] = _init_bn(keys[7], out_planes)
    return p


# ----------------------------- pure-JAX reference -----------------------------

def reference_block(x, params, in_planes, out_planes, expansion, stride):
    dn = ("NCHW", "OIHW", "NCHW")
    planes = int(expansion * in_planes)

    def conv1x1(inp, w):  # w: (Cin, Cout)
        return lax.conv_general_dilated(inp, jnp.transpose(w)[:, :, None, None],
                                        (1, 1), ((0, 0), (0, 0)), dimension_numbers=dn)

    def bn(inp, scale, bias):
        return inp * scale[None, :, None, None] + bias[None, :, None, None]

    out = jnp.clip(bn(conv1x1(x, params["w1"]), params["s1"], params["b1"]), 0.0, 6.0)
    wdw = jnp.transpose(params["dw"]).reshape(planes, 1, 3, 3)
    out = lax.conv_general_dilated(out, wdw, (stride, stride), ((1, 1), (1, 1)),
                                   dimension_numbers=dn, feature_group_count=planes)
    out = jnp.clip(bn(out, params["s2"], params["b2"]), 0.0, 6.0)
    out = bn(conv1x1(out, params["w3"]), params["s3"], params["b3"])
    if stride == 1:
        if in_planes != out_planes:
            sc = bn(conv1x1(x, params["wsc"]), params["ssc"], params["bsc"])
        else:
            sc = x
        out = out + sc
    return out


# ----------------------------- main -----------------------------

if __name__ == "__main__":
    key = jax.random.PRNGKey(0)
    kx, kp = jax.random.split(key)
    x = jax.random.normal(kx, (2, 4, 16, 16), jnp.float32)  # NCHW

    configs = [
        dict(in_planes=4, out_planes=8, expansion=2, stride=1),  # conv shortcut
        dict(in_planes=4, out_planes=4, expansion=2, stride=1),  # identity shortcut
        dict(in_planes=4, out_planes=8, expansion=2, stride=2),  # no shortcut
    ]
    for i, cfg in enumerate(configs):
        params = init_block_params(jax.random.fold_in(kp, i), **cfg)
        out = block_forward(x, params, **cfg)
        out = jax.block_until_ready(out)
        ref = reference_block(x, params, **cfg)
        assert out.shape == ref.shape, (out.shape, ref.shape)
        # tolerance accounts for bf16 storage of the MXU operands (f32 accumulation).
        if not jnp.allclose(out, ref, atol=8e-2, rtol=8e-2):
            raise SystemExit(
                f"mismatch for config {cfg}: max abs err "
                f"{float(jnp.max(jnp.abs(out - ref)))}")
    print("KERNEL_OK")
</pallas_src>

<mosaic_0001>
module attributes {stable_mosaic.version = 11 : i64} {
  func.func @_fused_block_kernel(%arg0: i32, %arg1: memref<1x16x16x4xf32, #tpu.memory_space<vmem>>, %arg2: memref<4x128xbf16, #tpu.memory_space<vmem>>, %arg3: memref<1x128xf32, #tpu.memory_space<vmem>>, %arg4: memref<9x128xf32, #tpu.memory_space<vmem>>, %arg5: memref<1x128xf32, #tpu.memory_space<vmem>>, %arg6: memref<128x128xbf16, #tpu.memory_space<vmem>>, %arg7: memref<1x128xf32, #tpu.memory_space<vmem>>, %arg8: memref<4x128xbf16, #tpu.memory_space<vmem>>, %arg9: memref<1x16x16x128xf32, #tpu.memory_space<vmem>>, %arg10: memref<18x18x128xf32, #tpu.memory_space<vmem>>, %arg11: memref<256x128xbf16, #tpu.memory_space<vmem>>) attributes {dimension_semantics = [#tpu.dimension_semantics<parallel>], iteration_bounds = array<i64: 2>, scalar_prefetch = 0 : i64, scratch_operands = 2 : i64, tpu.core_type = #tpu.core_type<tc>, window_params = [{transform_indices = @transform_0, window_bounds = array<i64: 1, 16, 16, 4>}, {pipeline_mode = #tpu.pipeline_mode<synchronous>, transform_indices = @transform_1, window_bounds = array<i64: 4, 128>}, {pipeline_mode = #tpu.pipeline_mode<synchronous>, transform_indices = @transform_2, window_bounds = array<i64: 1, 128>}, {pipeline_mode = #tpu.pipeline_mode<synchronous>, transform_indices = @transform_3, window_bounds = array<i64: 9, 128>}, {pipeline_mode = #tpu.pipeline_mode<synchronous>, transform_indices = @transform_4, window_bounds = array<i64: 1, 128>}, {pipeline_mode = #tpu.pipeline_mode<synchronous>, transform_indices = @transform_5, window_bounds = array<i64: 128, 128>}, {pipeline_mode = #tpu.pipeline_mode<synchronous>, transform_indices = @transform_6, window_bounds = array<i64: 1, 128>}, {pipeline_mode = #tpu.pipeline_mode<synchronous>, transform_indices = @transform_7, window_bounds = array<i64: 4, 128>}, {transform_indices = @transform_8, window_bounds = array<i64: 1, 16, 16, 128>}]} {
    %cst = arith.constant 0.000000e+00 : f32
    %0 = vector.broadcast %cst : f32 to vector<1x18x128xf32>
    %c0 = arith.constant 0 : index
    %c0_0 = arith.constant 0 : index
    %c0_1 = arith.constant 0 : index
    %1 = vector.load %arg10[%c0, %c0_0, %c0_1] : memref<18x18x128xf32, #tpu.memory_space<vmem>>, vector<1x18x128xf32>
    tpu.vector_store %arg10[%c0, %c0_0, %c0_1], %0 {strides = array<i32>} : memref<18x18x128xf32, #tpu.memory_space<vmem>>, vector<1x18x128xf32>,
    %c17 = arith.constant 17 : index
    %c0_2 = arith.constant 0 : index
    %c0_3 = arith.constant 0 : index
    %2 = vector.load %arg10[%c17, %c0_2, %c0_3] : memref<18x18x128xf32, #tpu.memory_space<vmem>>, vector<1x18x128xf32>
    tpu.vector_store %arg10[%c17, %c0_2, %c0_3], %0 {strides = array<i32>} : memref<18x18x128xf32, #tpu.memory_space<vmem>>, vector<1x18x128xf32>,
    %cst_4 = arith.constant 0.000000e+00 : f32
    %3 = vector.broadcast %cst_4 : f32 to vector<16x1x128xf32>
    %c1 = arith.constant 1 : index
    %c0_5 = arith.constant 0 : index
    %c0_6 = arith.constant 0 : index
    %4 = vector.load %arg10[%c1, %c0_5, %c0_6] : memref<18x18x128xf32, #tpu.memory_space<vmem>>, vector<16x1x128xf32>
    tpu.vector_store %arg10[%c1, %c0_5, %c0_6], %3 {strides = array<i32>} : memref<18x18x128xf32, #tpu.memory_space<vmem>>, vector<16x1x128xf32>,
    %c1_7 = arith.constant 1 : index
    %c17_8 = arith.constant 17 : index
    %c0_9 = arith.constant 0 : index
    %5 = vector.load %arg10[%c1_7, %c17_8, %c0_9] : memref<18x18x128xf32, #tpu.memory_space<vmem>>, vector<16x1x128xf32>
    tpu.vector_store %arg10[%c1_7, %c17_8, %c0_9], %3 {strides = array<i32>} : memref<18x18x128xf32, #tpu.memory_space<vmem>>, vector<16x1x128xf32>,
    %c0_10 = arith.constant 0 : index
    %c0_11 = arith.constant 0 : index
    %6 = vector.load %arg2[%c0_10, %c0_11] : memref<4x128xbf16, #tpu.memory_space<vmem>>, vector<4x128xbf16>
    %c0_12 = arith.constant 0 : index
    %c0_13 = arith.constant 0 : index
    %7 = vector.load %arg3[%c0_12, %c0_13] : memref<1x128xf32, #tpu.memory_space<vmem>>, vector<1x128xf32>
    %c0_14 = arith.constant 0 : index
    %c0_15 = arith.constant 0 : index
    %c0_16 = arith.constant 0 : index
    %c0_17 = arith.constant 0 : index
    %8 = vector.load %arg1[%c0_14, %c0_15, %c0_16, %c0_17] : memref<1x16x16x4xf32, #tpu.memory_space<vmem>>, vector<1x16x16x4xf32>
    %9 = vector.shape_cast %8 : vector<1x16x16x4xf32> to vector<16x16x4xf32>
    %10 = vector.shape_cast %9 : vector<16x16x4xf32> to vector<256x4xf32>
    %11 = arith.truncf %10 : vector<256x4xf32> to vector<256x4xbf16>
    %cst_18 = arith.constant dense<0.000000e+00> : vector<256x128xf32>
    %12 = tpu.matmul %11, %6, %cst_18 {dimension_numbers = #tpu.dot_dimension_numbers<[1], [0], [0], [1], [0, 0, 1, 1], [], []>} : vector<256x4xbf16>, vector<4x128xbf16>, vector<256x128xf32> -> vector<256x128xf32>
    %13 = vector.broadcast %7 : vector<1x128xf32> to vector<256x128xf32>
    %14 = arith.addf %12, %13 : vector<256x128xf32>
    %cst_19 = arith.constant 0.000000e+00 : f32
    %cst_20 = arith.constant 6.000000e+00 : f32
    %15 = vector.broadcast %cst_19 : f32 to vector<256x128xf32>
    %16 = arith.maximumf %15, %14 : vector<256x128xf32>
    %17 = vector.broadcast %cst_20 : f32 to vector<256x128xf32>
    %18 = arith.minimumf %17, %16 : vector<256x128xf32>
    %19 = vector.shape_cast %18 : vector<256x128xf32> to vector<16x16x128xf32>
    %c1_21 = arith.constant 1 : index
    %c1_22 = arith.constant 1 : index
    %c0_23 = arith.constant 0 : index
    %20 = vector.load %arg10[%c1_21, %c1_22, %c0_23] : memref<18x18x128xf32, #tpu.memory_space<vmem>>, vector<16x16x128xf32>
    tpu.vector_store %arg10[%c1_21, %c1_22, %c0_23], %19 {strides = array<i32>} : memref<18x18x128xf32, #tpu.memory_space<vmem>>, vector<16x16x128xf32>,
    %c0_24 = arith.constant 0 : index
    %c0_25 = arith.constant 0 : index
    %21 = vector.load %arg4[%c0_24, %c0_25] : memref<9x128xf32, #tpu.memory_space<vmem>>, vector<9x128xf32>
    %c0_26 = arith.constant 0 : index
    %c0_27 = arith.constant 0 : index
    %22 = vector.load %arg5[%c0_26, %c0_27] : memref<1x128xf32, #tpu.memory_space<vmem>>, vector<1x128xf32>
    %cst_28 = arith.constant 0.000000e+00 : f32
    %23 = vector.broadcast %cst_28 : f32 to vector<4x16x128xf32>
    %c0_29 = arith.constant 0 : index
    %c0_30 = arith.constant 0 : index
    %c0_31 = arith.constant 0 : index
    %24 = vector.load %arg10[%c0_29, %c0_30, %c0_31] : memref<18x18x128xf32, #tpu.memory_space<vmem>>, vector<4x18x128xf32>
    %25 = vector.extract_strided_slice %24 {offsets = [0, 0, 0], sizes = [4, 16, 128], strides = [1, 1, 1]} : vector<4x18x128xf32> to vector<4x16x128xf32>
    %26 = vector.extract_strided_slice %21 {offsets = [0, 0], sizes = [1, 128], strides = [1, 1]} : vector<9x128xf32> to vector<1x128xf32>
    %27 = vector.shape_cast %26 : vector<1x128xf32> to vector<128xf32>
    %28 = vector.shape_cast %27 : vector<128xf32> to vector<1x1x128xf32>
    %29 = vector.broadcast %28 : vector<1x1x128xf32> to vector<4x16x128xf32>
    %30 = arith.mulf %25, %29 : vector<4x16x128xf32>
    %31 = arith.addf %23, %30 : vector<4x16x128xf32>
    %32 = vector.extract_strided_slice %24 {offsets = [0, 1, 0], sizes = [4, 16, 128], strides = [1, 1, 1]} : vector<4x18x128xf32> to vector<4x16x128xf32>
    %33 = vector.extract_strided_slice %21 {offsets = [1, 0], sizes = [1, 128], strides = [1, 1]} : vector<9x128xf32> to vector<1x128xf32>
    %34 = vector.shape_cast %33 : vector<1x128xf32> to vector<128xf32>
    %35 = vector.shape_cast %34 : vector<128xf32> to vector<1x1x128xf32>
    %36 = vector.broadcast %35 : vector<1x1x128xf32> to vector<4x16x128xf32>
    %37 = arith.mulf %32, %36 : vector<4x16x128xf32>
    %38 = arith.addf %31, %37 : vector<4x16x128xf32>
    %39 = vector.extract_strided_slice %24 {offsets = [0, 2, 0], sizes = [4, 16, 128], strides = [1, 1, 1]} : vector<4x18x128xf32> to vector<4x16x128xf32>
    %40 = vector.extract_strided_slice %21 {offsets = [2, 0], sizes = [1, 128], strides = [1, 1]} : vector<9x128xf32> to vector<1x128xf32>
    %41 = vector.shape_cast %40 : vector<1x128xf32> to vector<128xf32>
    %42 = vector.shape_cast %41 : vector<128xf32> to vector<1x1x128xf32>
    %43 = vector.broadcast %42 : vector<1x1x128xf32> to vector<4x16x128xf32>
    %44 = arith.mulf %39, %43 : vector<4x16x128xf32>
    %45 = arith.addf %38, %44 : vector<4x16x128xf32>
    %c1_32 = arith.constant 1 : index
    %c0_33 = arith.constant 0 : index
    %c0_34 = arith.constant 0 : index
    %46 = vector.load %arg10[%c1_32, %c0_33, %c0_34] : memref<18x18x128xf32, #tpu.memory_space<vmem>>, vector<4x18x128xf32>
    %47 = vector.extract_strided_slice %46 {offsets = [0, 0, 0], sizes = [4, 16, 128], strides = [1, 1, 1]} : vector<4x18x128xf32> to vector<4x16x128xf32>
    %48 = vector.extract_strided_slice %21 {offsets = [3, 0], sizes = [1, 128], strides = [1, 1]} : vector<9x128xf32> to vector<1x128xf32>
    %49 = vector.shape_cast %48 : vector<1x128xf32> to vector<128xf32>
    %50 = vector.shape_cast %49 : vector<128xf32> to vector<1x1x128xf32>
    %51 = vector.broadcast %50 : vector<1x1x128xf32> to vector<4x16x128xf32>
    %52 = arith.mulf %47, %51 : vector<4x16x128xf32>
    %53 = arith.addf %45, %52 : vector<4x16x128xf32>
    %54 = vector.extract_strided_slice %46 {offsets = [0, 1, 0], sizes = [4, 16, 128], strides = [1, 1, 1]} : vector<4x18x128xf32> to vector<4x16x128xf32>
    %55 = vector.extract_strided_slice %21 {offsets = [4, 0], sizes = [1, 128], strides = [1, 1]} : vector<9x128xf32> to vector<1x128xf32>
    %56 = vector.shape_cast %55 : vector<1x128xf32> to vector<128xf32>
    %57 = vector.shape_cast %56 : vector<128xf32> to vector<1x1x128xf32>
    %58 = vector.broadcast %57 : vector<1x1x128xf32> to vector<4x16x128xf32>
    %59 = arith.mulf %54, %58 : vector<4x16x128xf32>
    %60 = arith.addf %53, %59 : vector<4x16x128xf32>
    %61 = vector.extract_strided_slice %46 {offsets = [0, 2, 0], sizes = [4, 16, 128], strides = [1, 1, 1]} : vector<4x18x128xf32> to vector<4x16x128xf32>
    %62 = vector.extract_strided_slice %21 {offsets = [5, 0], sizes = [1, 128], strides = [1, 1]} : vector<9x128xf32> to vector<1x128xf32>
    %63 = vector.shape_cast %62 : vector<1x128xf32> to vector<128xf32>
    %64 = vector.shape_cast %63 : vector<128xf32> to vector<1x1x128xf32>
    %65 = vector.broadcast %64 : vector<1x1x128xf32> to vector<4x16x128xf32>
    %66 = arith.mulf %61, %65 : vector<4x16x128xf32>
    %67 = arith.addf %60, %66 : vector<4x16x128xf32>
    %c2 = arith.constant 2 : index
    %c0_35 = arith.constant 0 : index
    %c0_36 = arith.constant 0 : index
    %68 = vector.load %arg10[%c2, %c0_35, %c0_36] : memref<18x18x128xf32, #tpu.memory_space<vmem>>, vector<4x18x128xf32>
    %69 = vector.extract_strided_slice %68 {offsets = [0, 0, 0], sizes = [4, 16, 128], strides = [1, 1, 1]} : vector<4x18x128xf32> to vector<4x16x128xf32>
    %70 = vector.extract_strided_slice %21 {offsets = [6, 0], sizes = [1, 128], strides = [1, 1]} : vector<9x128xf32> to vector<1x128xf32>
    %71 = vector.shape_cast %70 : vector<1x128xf32> to vector<128xf32>
    %72 = vector.shape_cast %71 : vector<128xf32> to vector<1x1x128xf32>
    %73 = vector.broadcast %72 : vector<1x1x128xf32> to vector<4x16x128xf32>
    %74 = arith.mulf %69, %73 : vector<4x16x128xf32>
    %75 = arith.addf %67, %74 : vector<4x16x128xf32>
    %76 = vector.extract_strided_slice %68 {offsets = [0, 1, 0], sizes = [4, 16, 128], strides = [1, 1, 1]} : vector<4x18x128xf32> to vector<4x16x128xf32>
    %77 = vector.extract_strided_slice %21 {offsets = [7, 0], sizes = [1, 128], strides = [1, 1]} : vector<9x128xf32> to vector<1x128xf32>
    %78 = vector.shape_cast %77 : vector<1x128xf32> to vector<128xf32>
    %79 = vector.shape_cast %78 : vector<128xf32> to vector<1x1x128xf32>
    %80 = vector.broadcast %79 : vector<1x1x128xf32> to vector<4x16x128xf32>
    %81 = arith.mulf %76, %80 : vector<4x16x128xf32>
    %82 = arith.addf %75, %81 : vector<4x16x128xf32>
    %83 = vector.extract_strided_slice %68 {offsets = [0, 2, 0], sizes = [4, 16, 128], strides = [1, 1, 1]} : vector<4x18x128xf32> to vector<4x16x128xf32>
    %84 = vector.extract_strided_slice %21 {offsets = [8, 0], sizes = [1, 128], strides = [1, 1]} : vector<9x128xf32> to vector<1x128xf32>
    %85 = vector.shape_cast %84 : vector<1x128xf32> to vector<128xf32>
    %86 = vector.shape_cast %85 : vector<128xf32> to vector<1x1x128xf32>
    %87 = vector.broadcast %86 : vector<1x1x128xf32> to vector<4x16x128xf32>
    %88 = arith.mulf %83, %87 : vector<4x16x128xf32>
    %89 = arith.addf %82, %88 : vector<4x16x128xf32>
    %90 = vector.shape_cast %22 : vector<1x128xf32> to vector<1x1x128xf32>
    %91 = vector.broadcast %90 : vector<1x1x128xf32> to vector<4x16x128xf32>
    %92 = arith.addf %89, %91 : vector<4x16x128xf32>
    %cst_37 = arith.constant 0.000000e+00 : f32
    %cst_38 = arith.constant 6.000000e+00 : f32
    %93 = vector.broadcast %cst_37 : f32 to vector<4x16x128xf32>
    %94 = arith.maximumf %93, %92 : vector<4x16x128xf32>
    %95 = vector.broadcast %cst_38 : f32 to vector<4x16x128xf32>
    %96 = arith.minimumf %95, %94 : vector<4x16x128xf32>
    %97 = arith.truncf %96 : vector<4x16x128xf32> to vector<4x16x128xbf16>
    %98 = vector.shape_cast %97 : vector<4x16x128xbf16> to vector<64x128xbf16>
    %c0_39 = arith.constant 0 : index
    %c0_40 = arith.constant 0 : index
    %99 = vector.load %arg11[%c0_39, %c0_40] : memref<256x128xbf16, #tpu.memory_space<vmem>>, vector<64x128xbf16>
    tpu.vector_store %arg11[%c0_39, %c0_40], %98 {strides = array<i32>} : memref<256x128xbf16, #tpu.memory_space<vmem>>, vector<64x128xbf16>,
    %cst_41 = arith.constant 0.000000e+00 : f32
    %100 = vector.broadcast %cst_41 : f32 to vector<4x16x128xf32>
    %c4 = arith.constant 4 : index
    %c0_42 = arith.constant 0 : index
    %c0_43 = arith.constant 0 : index
    %101 = vector.load %arg10[%c4, %c0_42, %c0_43] : memref<18x18x128xf32, #tpu.memory_space<vmem>>, vector<4x18x128xf32>
    %102 = vector.extract_strided_slice %101 {offsets = [0, 0, 0], sizes = [4, 16, 128], strides = [1, 1, 1]} : vector<4x18x128xf32> to vector<4x16x128xf32>
    %103 = vector.extract_strided_slice %21 {offsets = [0, 0], sizes = [1, 128], strides = [1, 1]} : vector<9x128xf32> to vector<1x128xf32>
    %104 = vector.shape_cast %103 : vector<1x128xf32> to vector<128xf32>
    %105 = vector.shape_cast %104 : vector<128xf32> to vector<1x1x128xf32>
    %106 = vector.broadcast %105 : vector<1x1x128xf32> to vector<4x16x128xf32>
    %107 = arith.mulf %102, %106 : vector<4x16x128xf32>
    %108 = arith.addf %100, %107 : vector<4x16x128xf32>
    %109 = vector.extract_strided_slice %101 {offsets = [0, 1, 0], sizes = [4, 16, 128], strides = [1, 1, 1]} : vector<4x18x128xf32> to vector<4x16x128xf32>
    %110 = vector.extract_strided_slice %21 {offsets = [1, 0], sizes = [1, 128], strides = [1, 1]} : vector<9x128xf32> to vector<1x128xf32>
    %111 = vector.shape_cast %110 : vector<1x128xf32> to vector<128xf32>
    %112 = vector.shape_cast %111 : vector<128xf32> to vector<1x1x128xf32>
    %113 = vector.broadcast %112 : vector<1x1x128xf32> to vector<4x16x128xf32>
    %114 = arith.mulf %109, %113 : vector<4x16x128xf32>
    %115 = arith.addf %108, %114 : vector<4x16x128xf32>
    %116 = vector.extract_strided_slice %101 {offsets = [0, 2, 0], sizes = [4, 16, 128], strides = [1, 1, 1]} : vector<4x18x128xf32> to vector<4x16x128xf32>
    %117 = vector.extract_strided_slice %21 {offsets = [2, 0], sizes = [1, 128], strides = [1, 1]} : vector<9x128xf32> to vector<1x128xf32>
    %118 = vector.shape_cast %117 : vector<1x128xf32> to vector<128xf32>
    %119 = vector.shape_cast %118 : vector<128xf32> to vector<1x1x128xf32>
    %120 = vector.broadcast %119 : vector<1x1x128xf32> to vector<4x16x128xf32>
    %121 = arith.mulf %116, %120 : vector<4x16x128xf32>
    %122 = arith.addf %115, %121 : vector<4x16x128xf32>
    %c5 = arith.constant 5 : index
    %c0_44 = arith.constant 0 : index
    %c0_45 = arith.constant 0 : index
    %123 = vector.load %arg10[%c5, %c0_44, %c0_45] : memref<18x18x128xf32, #tpu.memory_space<vmem>>, vector<4x18x128xf32>
    %124 = vector.extract_strided_slice %123 {offsets = [0, 0, 0], sizes = [4, 16, 128], strides = [1, 1, 1]} : vector<4x18x128xf32> to vector<4x16x128xf32>
    %125 = vector.extract_strided_slice %21 {offsets = [3, 0], sizes = [1, 128], strides = [1, 1]} : vector<9x128xf32> to vector<1x128xf32>
    %126 = vector.shape_cast %125 : vector<1x128xf32> to vector<128xf32>
    %127 = vector.shape_cast %126 : vector<128xf32> to vector<1x1x128xf32>
    %128 = vector.broadcast %127 : vector<1x1x128xf32> to vector<4x16x128xf32>
    %129 = arith.mulf %124, %128 : vector<4x16x128xf32>
    %130 = arith.addf %122, %129 : vector<4x16x128xf32>
    %131 = vector.extract_strided_slice %123 {offsets = [0, 1, 0], sizes = [4, 16, 128], strides = [1, 1, 1]} : vector<4x18x128xf32> to vector<4x16x128xf32>
    %132 = vector.extract_strided_slice %21 {offsets = [4, 0], sizes = [1, 128], strides = [1, 1]} : vector<9x128xf32> to vector<1x128xf32>
    %133 = vector.shape_cast %132 : vector<1x128xf32> to vector<128xf32>
    %134 = vector.shape_cast %133 : vector<128xf32> to vector<1x1x128xf32>
    %135 = vector.broadcast %134 : vector<1x1x128xf32> to vector<4x16x128xf32>
    %136 = arith.mulf %131, %135 : vector<4x16x128xf32>
    %137 = arith.addf %130, %136 : vector<4x16x128xf32>
    %138 = vector.extract_strided_slice %123 {offsets = [0, 2, 0], sizes = [4, 16, 128], strides = [1, 1, 1]} : vector<4x18x128xf32> to vector<4x16x128xf32>
    %139 = vector.extract_strided_slice %21 {offsets = [5, 0], sizes = [1, 128], strides = [1, 1]} : vector<9x128xf32> to vector<1x128xf32>
    %140 = vector.shape_cast %139 : vector<1x128xf32> to vector<128xf32>
    %141 = vector.shape_cast %140 : vector<128xf32> to vector<1x1x128xf32>
    %142 = vector.broadcast %141 : vector<1x1x128xf32> to vector<4x16x128xf32>
    %143 = arith.mulf %138, %142 : vector<4x16x128xf32>
    %144 = arith.addf %137, %143 : vector<4x16x128xf32>
    %c6 = arith.constant 6 : index
    %c0_46 = arith.constant 0 : index
    %c0_47 = arith.constant 0 : index
    %145 = vector.load %arg10[%c6, %c0_46, %c0_47] : memref<18x18x128xf32, #tpu.memory_space<vmem>>, vector<4x18x128xf32>
    %146 = vector.extract_strided_slice %145 {offsets = [0, 0, 0], sizes = [4, 16, 128], strides = [1, 1, 1]} : vector<4x18x128xf32> to vector<4x16x128xf32>
    %147 = vector.extract_strided_slice %21 {offsets = [6, 0], sizes = [1, 128], strides = [1, 1]} : vector<9x128xf32> to vector<1x128xf32>
    %148 = vector.shape_cast %147 : vector<1x128xf32> to vector<128xf32>
    %149 = vector.shape_cast %148 : vector<128xf32> to vector<1x1x128xf32>
    %150 = vector.broadcast %149 : vector<1x1x128xf32> to vector<4x16x128xf32>
    %151 = arith.mulf %146, %150 : vector<4x16x128xf32>
    %152 = arith.addf %144, %151 : vector<4x16x128xf32>
    %153 = vector.extract_strided_slice %145 {offsets = [0, 1, 0], sizes = [4, 16, 128], strides = [1, 1, 1]} : vector<4x18x128xf32> to vector<4x16x128xf32>
    %154 = vector.extract_strided_slice %21 {offsets = [7, 0], sizes = [1, 128], strides = [1, 1]} : vector<9x128xf32> to vector<1x128xf32>
    %155 = vector.shape_cast %154 : vector<1x128xf32> to vector<128xf32>
    %156 = vector.shape_cast %155 : vector<128xf32> to vector<1x1x128xf32>
    %157 = vector.broadcast %156 : vector<1x1x128xf32> to vector<4x16x128xf32>
    %158 = arith.mulf %153, %157 : vector<4x16x128xf32>
    %159 = arith.addf %152, %158 : vector<4x16x128xf32>
    %160 = vector.extract_strided_slice %145 {offsets = [0, 2, 0], sizes = [4, 16, 128], strides = [1, 1, 1]} : vector<4x18x128xf32> to vector<4x16x128xf32>
    %161 = vector.extract_strided_slice %21 {offsets = [8, 0], sizes = [1, 128], strides = [1, 1]} : vector<9x128xf32> to vector<1x128xf32>
    %162 = vector.shape_cast %161 : vector<1x128xf32> to vector<128xf32>
    %163 = vector.shape_cast %162 : vector<128xf32> to vector<1x1x128xf32>
    %164 = vector.broadcast %163 : vector<1x1x128xf32> to vector<4x16x128xf32>
    %165 = arith.mulf %160, %164 : vector<4x16x128xf32>
    %166 = arith.addf %159, %165 : vector<4x16x128xf32>
    %167 = vector.shape_cast %22 : vector<1x128xf32> to vector<1x1x128xf32>
    %168 = vector.broadcast %167 : vector<1x1x128xf32> to vector<4x16x128xf32>
    %169 = arith.addf %166, %168 : vector<4x16x128xf32>
    %cst_48 = arith.constant 0.000000e+00 : f32
    %cst_49 = arith.constant 6.000000e+00 : f32
    %170 = vector.broadcast %cst_48 : f32 to vector<4x16x128xf32>
    %171 = arith.maximumf %170, %169 : vector<4x16x128xf32>
    %172 = vector.broadcast %cst_49 : f32 to vector<4x16x128xf32>
    %173 = arith.minimumf %172, %171 : vector<4x16x128xf32>
    %174 = arith.truncf %173 : vector<4x16x128xf32> to vector<4x16x128xbf16>
    %175 = vector.shape_cast %174 : vector<4x16x128xbf16> to vector<64x128xbf16>
    %c64 = arith.constant 64 : index
    %c0_50 = arith.constant 0 : index
    %176 = vector.load %arg11[%c64, %c0_50] : memref<256x128xbf16, #tpu.memory_space<vmem>>, vector<64x128xbf16>
    tpu.vector_store %arg11[%c64, %c0_50], %175 {strides = array<i32>} : memref<256x128xbf16, #tpu.memory_space<vmem>>, vector<64x128xbf16>,
    %cst_51 = arith.constant 0.000000e+00 : f32
    %177 = vector.broadcast %cst_51 : f32 to vector<4x16x128xf32>
    %c8 = arith.constant 8 : index
    %c0_52 = arith.constant 0 : index
    %c0_53 = arith.constant 0 : index
    %178 = vector.load %arg10[%c8, %c0_52, %c0_53] : memref<18x18x128xf32, #tpu.memory_space<vmem>>, vector<4x18x128xf32>
    %179 = vector.extract_strided_slice %178 {offsets = [0, 0, 0], sizes = [4, 16, 128], strides = [1, 1, 1]} : vector<4x18x128xf32> to vector<4x16x128xf32>
    %180 = vector.extract_strided_slice %21 {offsets = [0, 0], sizes = [1, 128], strides = [1, 1]} : vector<9x128xf32> to vector<1x128xf32>
    %181 = vector.shape_cast %180 : vector<1x128xf32> to vector<128xf32>
    %182 = vector.shape_cast %181 : vector<128xf32> to vector<1x1x128xf32>
    %183 = vector.broadcast %182 : vector<1x1x128xf32> to vector<4x16x128xf32>
    %184 = arith.mulf %179, %183 : vector<4x16x128xf32>
    %185 = arith.addf %177, %184 : vector<4x16x128xf32>
    %186 = vector.extract_strided_slice %178 {offsets = [0, 1, 0], sizes = [4, 16, 128], strides = [1, 1, 1]} : vector<4x18x128xf32> to vector<4x16x128xf32>
    %187 = vector.extract_strided_slice %21 {offsets = [1, 0], sizes = [1, 128], strides = [1, 1]} : vector<9x128xf32> to vector<1x128xf32>
    %188 = vector.shape_cast %187 : vector<1x128xf32> to vector<128xf32>
    %189 = vector.shape_cast %188 : vector<128xf32> to vector<1x1x128xf32>
    %190 = vector.broadcast %189 : vector<1x1x128xf32> to vector<4x16x128xf32>
    %191 = arith.mulf %186, %190 : vector<4x16x128xf32>
    %192 = arith.addf %185, %191 : vector<4x16x128xf32>
    %193 = vector.extract_strided_slice %178 {offsets = [0, 2, 0], sizes = [4, 16, 128], strides = [1, 1, 1]} : vector<4x18x128xf32> to vector<4x16x128xf32>
    %194 = vector.extract_strided_slice %21 {offsets = [2, 0], sizes = [1, 128], strides = [1, 1]} : vector<9x128xf32> to vector<1x128xf32>
    %195 = vector.shape_cast %194 : vector<1x128xf32> to vector<128xf32>
    %196 = vector.shape_cast %195 : vector<128xf32> to vector<1x1x128xf32>
    %197 = vector.broadcast %196 : vector<1x1x128xf32> to vector<4x16x128xf32>
    %198 = arith.mulf %193, %197 : vector<4x16x128xf32>
    %199 = arith.addf %192, %198 : vector<4x16x128xf32>
    %c9 = arith.constant 9 : index
    %c0_54 = arith.constant 0 : index
    %c0_55 = arith.constant 0 : index
    %200 = vector.load %arg10[%c9, %c0_54, %c0_55] : memref<18x18x128xf32, #tpu.memory_space<vmem>>, vector<4x18x128xf32>
    %201 = vector.extract_strided_slice %200 {offsets = [0, 0, 0], sizes = [4, 16, 128], strides = [1, 1, 1]} : vector<4x18x128xf32> to vector<4x16x128xf32>
    %202 = vector.extract_strided_slice %21 {offsets = [3, 0], sizes = [1, 128], strides = [1, 1]} : vector<9x128xf32> to vector<1x128xf32>
    %203 = vector.shape_cast %202 : vector<1x128xf32> to vector<128xf32>
    %204 = vector.shape_cast %203 : vector<128xf32> to vector<1x1x128xf32>
    %205 = vector.broadcast %204 : vector<1x1x128xf32> to vector<4x16x128xf32>
    %206 = arith.mulf %201, %205 : vector<4x16x128xf32>
    %207 = arith.addf %199, %206 : vector<4x16x128xf32>
    %208 = vector.extract_strided_slice %200 {offsets = [0, 1, 0], sizes = [4, 16, 128], strides = [1, 1, 1]} : vector<4x18x128xf32> to vector<4x16x128xf32>
    %209 = vector.extract_strided_slice %21 {offsets = [4, 0], sizes = [1, 128], strides = [1, 1]} : vector<9x128xf32> to vector<1x128xf32>
    %210 = vector.shape_cast %209 : vector<1x128xf32> to vector<128xf32>
    %211 = vector.shape_cast %210 : vector<128xf32> to vector<1x1x128xf32>
    %212 = vector.broadcast %211 : vector<1x1x128xf32> to vector<4x16x128xf32>
    %213 = arith.mulf %208, %212 : vector<4x16x128xf32>
    %214 = arith.addf %207, %213 : vector<4x16x128xf32>
    %215 = vector.extract_strided_slice %200 {offsets = [0, 2, 0], sizes = [4, 16, 128], strides = [1, 1, 1]} : vector<4x18x128xf32> to vector<4x16x128xf32>
    %216 = vector.extract_strided_slice %21 {offsets = [5, 0], sizes = [1, 128], strides = [1, 1]} : vector<9x128xf32> to vector<1x128xf32>
    %217 = vector.shape_cast %216 : vector<1x128xf32> to vector<128xf32>
    %218 = vector.shape_cast %217 : vector<128xf32> to vector<1x1x128xf32>
    %219 = vector.broadcast %218 : vector<1x1x128xf32> to vector<4x16x128xf32>
    %220 = arith.mulf %215, %219 : vector<4x16x128xf32>
    %221 = arith.addf %214, %220 : vector<4x16x128xf32>
    %c10 = arith.constant 10 : index
    %c0_56 = arith.constant 0 : index
    %c0_57 = arith.constant 0 : index
    %222 = vector.load %arg10[%c10, %c0_56, %c0_57] : memref<18x18x128xf32, #tpu.memory_space<vmem>>, vector<4x18x128xf32>
    %223 = vector.extract_strided_slice %222 {offsets = [0, 0, 0], sizes = [4, 16, 128], strides = [1, 1, 1]} : vector<4x18x128xf32> to vector<4x16x128xf32>
    %224 = vector.extract_strided_slice %21 {offsets = [6, 0], sizes = [1, 128], strides = [1, 1]} : vector<9x128xf32> to vector<1x128xf32>
    %225 = vector.shape_cast %224 : vector<1x128xf32> to vector<128xf32>
    %226 = vector.shape_cast %225 : vector<128xf32> to vector<1x1x128xf32>
    %227 = vector.broadcast %226 : vector<1x1x128xf32> to vector<4x16x128xf32>
    %228 = arith.mulf %223, %227 : vector<4x16x128xf32>
    %229 = arith.addf %221, %228 : vector<4x16x128xf32>
    %230 = vector.extract_strided_slice %222 {offsets = [0, 1, 0], sizes = [4, 16, 128], strides = [1, 1, 1]} : vector<4x18x128xf32> to vector<4x16x128xf32>
    %231 = vector.extract_strided_slice %21 {offsets = [7, 0], sizes = [1, 128], strides = [1, 1]} : vector<9x128xf32> to vector<1x128xf32>
    %232 = vector.shape_cast %231 : vector<1x128xf32> to vector<128xf32>
    %233 = vector.shape_cast %232 : vector<128xf32> to vector<1x1x128xf32>
    %234 = vector.broadcast %233 : vector<1x1x128xf32> to vector<4x16x128xf32>
    %235 = arith.mulf %230, %234 : vector<4x16x128xf32>
    %236 = arith.addf %229, %235 : vector<4x16x128xf32>
    %237 = vector.extract_strided_slice %222 {offsets = [0, 2, 0], sizes = [4, 16, 128], strides = [1, 1, 1]} : vector<4x18x128xf32> to vector<4x16x128xf32>
    %238 = vector.extract_strided_slice %21 {offsets = [8, 0], sizes = [1, 128], strides = [1, 1]} : vector<9x128xf32> to vector<1x128xf32>
    %239 = vector.shape_cast %238 : vector<1x128xf32> to vector<128xf32>
    %240 = vector.shape_cast %239 : vector<128xf32> to vector<1x1x128xf32>
    %241 = vector.broadcast %240 : vector<1x1x128xf32> to vector<4x16x128xf32>
    %242 = arith.mulf %237, %241 : vector<4x16x128xf32>
    %243 = arith.addf %236, %242 : vector<4x16x128xf32>
    %244 = vector.shape_cast %22 : vector<1x128xf32> to vector<1x1x128xf32>
    %245 = vector.broadcast %244 : vector<1x1x128xf32> to vector<4x16x128xf32>
    %246 = arith.addf %243, %245 : vector<4x16x128xf32>
    %cst_58 = arith.constant 0.000000e+00 : f32
    %cst_59 = arith.constant 6.000000e+00 : f32
    %247 = vector.broadcast %cst_58 : f32 to vector<4x16x128xf32>
    %248 = arith.maximumf %247, %246 : vector<4x16x128xf32>
    %249 = vector.broadcast %cst_59 : f32 to vector<4x16x128xf32>
    %250 = arith.minimumf %249, %248 : vector<4x16x128xf32>
    %251 = arith.truncf %250 : vector<4x16x128xf32> to vector<4x16x128xbf16>
    %252 = vector.shape_cast %251 : vector<4x16x128xbf16> to vector<64x128xbf16>
    %c128 = arith.constant 128 : index
    %c0_60 = arith.constant 0 : index
    %253 = vector.load %arg11[%c128, %c0_60] : memref<256x128xbf16, #tpu.memory_space<vmem>>, vector<64x128xbf16>
    tpu.vector_store %arg11[%c128, %c0_60], %252 {strides = array<i32>} : memref<256x128xbf16, #tpu.memory_space<vmem>>, vector<64x128xbf16>,
    %cst_61 = arith.constant 0.000000e+00 : f32
    %254 = vector.broadcast %cst_61 : f32 to vector<4x16x128xf32>
    %c12 = arith.constant 12 : index
    %c0_62 = arith.constant 0 : index
    %c0_63 = arith.constant 0 : index
    %255 = vector.load %arg10[%c12, %c0_62, %c0_63] : memref<18x18x128xf32, #tpu.memory_space<vmem>>, vector<4x18x128xf32>
    %256 = vector.extract_strided_slice %255 {offsets = [0, 0, 0], sizes = [4, 16, 128], strides = [1, 1, 1]} : vector<4x18x128xf32> to vector<4x16x128xf32>
    %257 = vector.extract_strided_slice %21 {offsets = [0, 0], sizes = [1, 128], strides = [1, 1]} : vector<9x128xf32> to vector<1x128xf32>
    %258 = vector.shape_cast %257 : vector<1x128xf32> to vector<128xf32>
    %259 = vector.shape_cast %258 : vector<128xf32> to vector<1x1x128xf32>
    %260 = vector.broadcast %259 : vector<1x1x128xf32> to vector<4x16x128xf32>
    %261 = arith.mulf %256, %260 : vector<4x16x128xf32>
    %262 = arith.addf %254, %261 : vector<4x16x128xf32>
    %263 = vector.extract_strided_slice %255 {offsets = [0, 1, 0], sizes = [4, 16, 128], strides = [1, 1, 1]} : vector<4x18x128xf32> to vector<4x16x128xf32>
    %264 = vector.extract_strided_slice %21 {offsets = [1, 0], sizes = [1, 128], strides = [1, 1]} : vector<9x128xf32> to vector<1x128xf32>
    %265 = vector.shape_cast %264 : vector<1x128xf32> to vector<128xf32>
    %266 = vector.shape_cast %265 : vector<128xf32> to vector<1x1x128xf32>
    %267 = vector.broadcast %266 : vector<1x1x128xf32> to vector<4x16x128xf32>
    %268 = arith.mulf %263, %267 : vector<4x16x128xf32>
    %269 = arith.addf %262, %268 : vector<4x16x128xf32>
    %270 = vector.extract_strided_slice %255 {offsets = [0, 2, 0], sizes = [4, 16, 128], strides = [1, 1, 1]} : vector<4x18x128xf32> to vector<4x16x128xf32>
    %271 = vector.extract_strided_slice %21 {offsets = [2, 0], sizes = [1, 128], strides = [1, 1]} : vector<9x128xf32> to vector<1x128xf32>
    %272 = vector.shape_cast %271 : vector<1x128xf32> to vector<128xf32>
    %273 = vector.shape_cast %272 : vector<128xf32> to vector<1x1x128xf32>
    %274 = vector.broadcast %273 : vector<1x1x128xf32> to vector<4x16x128xf32>
    %275 = arith.mulf %270, %274 : vector<4x16x128xf32>
    %276 = arith.addf %269, %275 : vector<4x16x128xf32>
    %c13 = arith.constant 13 : index
    %c0_64 = arith.constant 0 : index
    %c0_65 = arith.constant 0 : index
    %277 = vector.load %arg10[%c13, %c0_64, %c0_65] : memref<18x18x128xf32, #tpu.memory_space<vmem>>, vector<4x18x128xf32>
    %278 = vector.extract_strided_slice %277 {offsets = [0, 0, 0], sizes = [4, 16, 128], strides = [1, 1, 1]} : vector<4x18x128xf32> to vector<4x16x128xf32>
    %279 = vector.extract_strided_slice %21 {offsets = [3, 0], sizes = [1, 128], strides = [1, 1]} : vector<9x128xf32> to vector<1x128xf32>
    %280 = vector.shape_cast %279 : vector<1x128xf32> to vector<128xf32>
    %281 = vector.shape_cast %280 : vector<128xf32> to vector<1x1x128xf32>
    %282 = vector.broadcast %281 : vector<1x1x128xf32> to vector<4x16x128xf32>
    %283 = arith.mulf %278, %282 : vector<4x16x128xf32>
    %284 = arith.addf %276, %283 : vector<4x16x128xf32>
    %285 = vector.extract_strided_slice %277 {offsets = [0, 1, 0], sizes = [4, 16, 128], strides = [1, 1, 1]} : vector<4x18x128xf32> to vector<4x16x128xf32>
    %286 = vector.extract_strided_slice %21 {offsets = [4, 0], sizes = [1, 128], strides = [1, 1]} : vector<9x128xf32> to vector<1x128xf32>
    %287 = vector.shape_cast %286 : vector<1x128xf32> to vector<128xf32>
    %288 = vector.shape_cast %287 : vector<128xf32> to vector<1x1x128xf32>
    %289 = vector.broadcast %288 : vector<1x1x128xf32> to vector<4x16x128xf32>
    %290 = arith.mulf %285, %289 : vector<4x16x128xf32>
    %291 = arith.addf %284, %290 : vector<4x16x128xf32>
    %292 = vector.extract_strided_slice %277 {offsets = [0, 2, 0], sizes = [4, 16, 128], strides = [1, 1, 1]} : vector<4x18x128xf32> to vector<4x16x128xf32>
    %293 = vector.extract_strided_slice %21 {offsets = [5, 0], sizes = [1, 128], strides = [1, 1]} : vector<9x128xf32> to vector<1x128xf32>
    %294 = vector.shape_cast %293 : vector<1x128xf32> to vector<128xf32>
    %295 = vector.shape_cast %294 : vector<128xf32> to vector<1x1x128xf32>
    %296 = vector.broadcast %295 : vector<1x1x128xf32> to vector<4x16x128xf32>
    %297 = arith.mulf %292, %296 : vector<4x16x128xf32>
    %298 = arith.addf %291, %297 : vector<4x16x128xf32>
    %c14 = arith.constant 14 : index
    %c0_66 = arith.constant 0 : index
    %c0_67 = arith.constant 0 : index
    %299 = vector.load %arg10[%c14, %c0_66, %c0_67] : memref<18x18x128xf32, #tpu.memory_space<vmem>>, vector<4x18x128xf32>
    %300 = vector.extract_strided_slice %299 {offsets = [0, 0, 0], sizes = [4, 16, 128], strides = [1, 1, 1]} : vector<4x18x128xf32> to vector<4x16x128xf32>
    %301 = vector.extract_strided_slice %21 {offsets = [6, 0], sizes = [1, 128], strides = [1, 1]} : vector<9x128xf32> to vector<1x128xf32>
    %302 = vector.shape_cast %301 : vector<1x128xf32> to vector<128xf32>
    %303 = vector.shape_cast %302 : vector<128xf32> to vector<1x1x128xf32>
    %304 = vector.broadcast %303 : vector<1x1x128xf32> to vector<4x16x128xf32>
    %305 = arith.mulf %300, %304 : vector<4x16x128xf32>
    %306 = arith.addf %298, %305 : vector<4x16x128xf32>
    %307 = vector.extract_strided_slice %299 {offsets = [0, 1, 0], sizes = [4, 16, 128], strides = [1, 1, 1]} : vector<4x18x128xf32> to vector<4x16x128xf32>
    %308 = vector.extract_strided_slice %21 {offsets = [7, 0], sizes = [1, 128], strides = [1, 1]} : vector<9x128xf32> to vector<1x128xf32>
    %309 = vector.shape_cast %308 : vector<1x128xf32> to vector<128xf32>
    %310 = vector.shape_cast %309 : vector<128xf32> to vector<1x1x128xf32>
    %311 = vector.broadcast %310 : vector<1x1x128xf32> to vector<4x16x128xf32>
    %312 = arith.mulf %307, %311 : vector<4x16x128xf32>
    %313 = arith.addf %306, %312 : vector<4x16x128xf32>
    %314 = vector.extract_strided_slice %299 {offsets = [0, 2, 0], sizes = [4, 16, 128], strides = [1, 1, 1]} : vector<4x18x128xf32> to vector<4x16x128xf32>
    %315 = vector.extract_strided_slice %21 {offsets = [8, 0], sizes = [1, 128], strides = [1, 1]} : vector<9x128xf32> to vector<1x128xf32>
    %316 = vector.shape_cast %315 : vector<1x128xf32> to vector<128xf32>
    %317 = vector.shape_cast %316 : vector<128xf32> to vector<1x1x128xf32>
    %318 = vector.broadcast %317 : vector<1x1x128xf32> to vector<4x16x128xf32>
    %319 = arith.mulf %314, %318 : vector<4x16x128xf32>
    %320 = arith.addf %313, %319 : vector<4x16x128xf32>
    %321 = vector.shape_cast %22 : vector<1x128xf32> to vector<1x1x128xf32>
    %322 = vector.broadcast %321 : vector<1x1x128xf32> to vector<4x16x128xf32>
    %323 = arith.addf %320, %322 : vector<4x16x128xf32>
    %cst_68 = arith.constant 0.000000e+00 : f32
    %cst_69 = arith.constant 6.000000e+00 : f32
    %324 = vector.broadcast %cst_68 : f32 to vector<4x16x128xf32>
    %325 = arith.maximumf %324, %323 : vector<4x16x128xf32>
    %326 = vector.broadcast %cst_69 : f32 to vector<4x16x128xf32>
    %327 = arith.minimumf %326, %325 : vector<4x16x128xf32>
    %328 = arith.truncf %327 : vector<4x16x128xf32> to vector<4x16x128xbf16>
    %329 = vector.shape_cast %328 : vector<4x16x128xbf16> to vector<64x128xbf16>
    %c192 = arith.constant 192 : index
    %c0_70 = arith.constant 0 : index
    %330 = vector.load %arg11[%c192, %c0_70] : memref<256x128xbf16, #tpu.memory_space<vmem>>, vector<64x128xbf16>
    tpu.vector_store %arg11[%c192, %c0_70], %329 {strides = array<i32>} : memref<256x128xbf16, #tpu.memory_space<vmem>>, vector<64x128xbf16>,
    %c0_71 = arith.constant 0 : index
    %c0_72 = arith.constant 0 : index
    %331 = vector.load %arg6[%c0_71, %c0_72] : memref<128x128xbf16, #tpu.memory_space<vmem>>, vector<128x128xbf16>
    %c0_73 = arith.constant 0 : index
    %c0_74 = arith.constant 0 : index
    %332 = vector.load %arg7[%c0_73, %c0_74] : memref<1x128xf32, #tpu.memory_space<vmem>>, vector<1x128xf32>
    %c0_75 = arith.constant 0 : index
    %c0_76 = arith.constant 0 : index
    %333 = vector.load %arg8[%c0_75, %c0_76] : memref<4x128xbf16, #tpu.memory_space<vmem>>, vector<4x128xbf16>
    %c0_77 = arith.constant 0 : index
    %c0_78 = arith.constant 0 : index
    %334 = vector.load %arg11[%c0_77, %c0_78] : memref<256x128xbf16, #tpu.memory_space<vmem>>, vector<256x128xbf16>
    %cst_79 = arith.constant dense<0.000000e+00> : vector<256x128xf32>
    %335 = tpu.matmul %334, %331, %cst_79 {dimension_numbers = #tpu.dot_dimension_numbers<[1], [0], [0], [1], [0, 0, 1, 1], [], []>} : vector<256x128xbf16>, vector<128x128xbf16>, vector<256x128xf32> -> vector<256x128xf32>
    %c0_80 = arith.constant 0 : index
    %c0_81 = arith.constant 0 : index
    %c0_82 = arith.constant 0 : index
    %c0_83 = arith.constant 0 : index
    %336 = vector.load %arg1[%c0_80, %c0_81, %c0_82, %c0_83] : memref<1x16x16x4xf32, #tpu.memory_space<vmem>>, vector<1x16x16x4xf32>
    %337 = vector.shape_cast %336 : vector<1x16x16x4xf32> to vector<16x16x4xf32>
    %338 = vector.shape_cast %337 : vector<16x16x4xf32> to vector<256x4xf32>
    %339 = arith.truncf %338 : vector<256x4xf32> to vector<256x4xbf16>
    %cst_84 = arith.constant dense<0.000000e+00> : vector<256x128xf32>
    %340 = tpu.matmul %339, %333, %cst_84 {dimension_numbers = #tpu.dot_dimension_numbers<[1], [0], [0], [1], [0, 0, 1, 1], [], []>} : vector<256x4xbf16>, vector<4x128xbf16>, vector<256x128xf32> -> vector<256x128xf32>
    %341 = arith.addf %335, %340 : vector<256x128xf32>
    %342 = vector.broadcast %332 : vector<1x128xf32> to vector<256x128xf32>
    %343 = arith.addf %341, %342 : vector<256x128xf32>
    %344 = vector.shape_cast %343 : vector<256x128xf32> to vector<16x16x128xf32>
    %c0_85 = arith.constant 0 : index
    %c0_86 = arith.constant 0 : index
    %c0_87 = arith.constant 0 : index
    %c0_88 = arith.constant 0 : index
    %345 = vector.load %arg9[%c0_85, %c0_86, %c0_87, %c0_88] : memref<1x16x16x128xf32, #tpu.memory_space<vmem>>, vector<1x16x16x128xf32>
    %346 = vector.shape_cast %345 : vector<1x16x16x128xf32> to vector<16x16x128xf32>
    %347 = vector.shape_cast %344 : vector<16x16x128xf32> to vector<1x16x16x128xf32>
    tpu.vector_store %arg9[%c0_85, %c0_86, %c0_87, %c0_88], %347 {strides = array<i32>} : memref<1x16x16x128xf32, #tpu.memory_space<vmem>>, vector<1x16x16x128xf32>,
    return
  }
  func.func @transform_0(%arg0: i32) -> (i32, i32, i32, i32) {
    %c0_i32 = arith.constant 0 : i32
    %c0_i32_0 = arith.constant 0 : i32
    %c0_i32_1 = arith.constant 0 : i32
    %c0_i32_2 = arith.constant 0 : i32
    return %arg0, %c0_i32, %c0_i32_0, %c0_i32_1 : i32, i32, i32, i32
  }
  func.func @transform_1(%arg0: i32) -> (i32, i32) {
    %c0_i32 = arith.constant 0 : i32
    %c0_i32_0 = arith.constant 0 : i32
    %c0_i32_1 = arith.constant 0 : i32
    return %c0_i32, %c0_i32_0 : i32, i32
  }
  func.func @transform_2(%arg0: i32) -> (i32, i32) {
    %c0_i32 = arith.constant 0 : i32
    %c0_i32_0 = arith.constant 0 : i32
    %c0_i32_1 = arith.constant 0 : i32
    return %c0_i32, %c0_i32_0 : i32, i32
  }
  func.func @transform_3(%arg0: i32) -> (i32, i32) {
    %c0_i32 = arith.constant 0 : i32
    %c0_i32_0 = arith.constant 0 : i32
    %c0_i32_1 = arith.constant 0 : i32
    return %c0_i32, %c0_i32_0 : i32, i32
  }
  func.func @transform_4(%arg0: i32) -> (i32, i32) {
    %c0_i32 = arith.constant 0 : i32
    %c0_i32_0 = arith.constant 0 : i32
    %c0_i32_1 = arith.constant 0 : i32
    return %c0_i32, %c0_i32_0 : i32, i32
  }
  func.func @transform_5(%arg0: i32) -> (i32, i32) {
    %c0_i32 = arith.constant 0 : i32
    %c0_i32_0 = arith.constant 0 : i32
    %c0_i32_1 = arith.constant 0 : i32
    return %c0_i32, %c0_i32_0 : i32, i32
  }
  func.func @transform_6(%arg0: i32) -> (i32, i32) {
    %c0_i32 = arith.constant 0 : i32
    %c0_i32_0 = arith.constant 0 : i32
    %c0_i32_1 = arith.constant 0 : i32
    return %c0_i32, %c0_i32_0 : i32, i32
  }
  func.func @transform_7(%arg0: i32) -> (i32, i32) {
    %c0_i32 = arith.constant 0 : i32
    %c0_i32_0 = arith.constant 0 : i32
    %c0_i32_1 = arith.constant 0 : i32
    return %c0_i32, %c0_i32_0 : i32, i32
  }
  func.func @transform_8(%arg0: i32) -> (i32, i32, i32, i32) {
    %c0_i32 = arith.constant 0 : i32
    %c0_i32_0 = arith.constant 0 : i32
    %c0_i32_1 = arith.constant 0 : i32
    %c0_i32_2 = arith.constant 0 : i32
    return %arg0, %c0_i32, %c0_i32_0, %c0_i32_1 : i32, i32, i32, i32
  }
}

</mosaic_0001>

<bundles_post_ra>
// kernel: tpu_custom_call.1
= control target key start
LH: loop header
LB: loop body
LE: loop exit
PB: predicated region body
PF: predicated region fallthrough
CT: control target
= control target key end

     0   :  { %13 = vsyncpa [#allocation5], 0  ;;  %s6426_s0 = inlined_call_operand.vmem [shape: f32[2,16,16,4], index: 0, kind: input, shape index: {}]   ;;  %s6427_s1 = inlined_call_operand.vmem [shape: bf16[4,128], index: 1, kind: input, shape index: {}]   ;;  %s6428_s2 = inlined_call_operand.vmem [shape: f32[1,128], index: 2, kind: input, shape index: {}]   ;;  %s6429_s3 = inlined_call_operand.vmem [shape: f32[9,128], index: 3, kind: input, shape index: {}]   ;;  %s6430_s4 = inlined_call_operand.vmem [shape: f32[1,128], index: 4, kind: input, shape index: {}]   ;;  %s6431_s5 = inlined_call_operand.vmem [shape: bf16[128,128], index: 5, kind: input, shape index: {}]   ;;  %s6432_s6 = inlined_call_operand.vmem [shape: f32[1,128], index: 6, kind: input, shape index: {}]   ;;  %s6433_s7 = inlined_call_operand.vmem [shape: bf16[4,128], index: 7, kind: input, shape index: {}]   ;;  %s6434_s8 = inlined_call_operand.hbm [shape: f32[2,16,16,128], index: 8, kind: output, shape index: {}]  }
   0x1   :  { %15 = vsyncpa [#allocation5 + $0x1], 0  ;;  %s4155_s27 = smov 0   ;;  %s4157_s28 = smov 0  }
   0x2   :  { %s4159_s29 = smov 0   ;;  %s4161_s30 = smov 0  }
   0x3 LB: > { %s4176_s9 = sadd.s32 4294967295, %s4104_s30   ;;  %s3561_s10 = sadd.s32 4294967294, %s4104_s30   ;;  %s4104_s30 = sphi %s4161_s30, %s6736_s30   ;;  %s4100_s29 = sphi %s4159_s29, %s6735_s29   ;;  %s4096_s28 = sphi %s4157_s28, %s6734_s28   ;;  %s4092_s27 = sphi %s4155_s27, %s6733_s27  }
   0x4   : > { %s4180_s11 = sadd.s32 1, %s4104_s30   ;;  %s201_s12 = sadd.s32 1, %s4100_s29 }
   0x5   : > { %s198_s13 = ssub.s32 %s4104_s30, %s4180_s11  ;;  %p211_p0 = scmp.ne.s32.totalorder %s4100_s29, %s4096_s28 }
   0x6   : > { %p199_p1 = scmp.eq.s32.totalorder %s198_s13, 0  ;;  %p212_p2 = scmp.eq.s32.totalorder %s4176_s9, 1 }
   0x7   : > { %p217_p3 = scmp.ne.s32.totalorder %s4096_s28, %s4092_s27  ;;  %p218_p4 = scmp.eq.s32.totalorder %s3561_s10, 1 }
   0x8   : > { %s4191_s14 = scalar_select %p199_p1, %s4100_s29, %s201_s12  }
   0x9   : > { %p4193_p5 = por %p212_p2, %p211_p0  ;;  %p4197_p6 = por %p218_p4, %p217_p3 }
   0xa   : > { %p3564_p7 = scmp.ge.s32.totalorder %s4104_s30, 1  ;;  %p265_p8 = scmp.lt.s32.totalorder %s4104_s30, 3 }
   0xc   : > { %p266_p9 = pnand %p3564_p7, %p265_p8 }
   0xe   : > { %269 = sbr.rel (%p266_p9) target bundleno = 816 (0x330), region = 52 }
  0x13   : > { %v345_v0 = vld [vmem:[%s6427_s1] sm:$0x3]  ;;  %vm450_vm0 = vcmask 1041408   ;;  %p299_p10 = scmp.lt.s32.totalorder %s4176_s9, 1  ;;  %v4106_v2 = vmov 0.0   ;;  %vm401_vm1 = vcmask 31744   ;;  %v726_v51 = vlaneseq }
  0x14   : > { %3970 = vmatprep.subr.msk.bf16.mxu0 %vm450_vm0, %v345_v0  ;;  %v452_v1 = vsel %vm450_vm0, %v345_v0, 0  ;;  %3971 = vmatprep.subr.msk.bf16.mxu1 %vm450_vm0, %v345_v0  ;;  %314 = vst [vmem:[#allocation2 + $0x30] sm:$0x1] %v4106_v2  ;;  %305 = vst [vmem:[#allocation2] sm:$0xff] %v4106_v2  ;;  %v4272_v54 = vld [vmem:[%s6429_s3] sm:$0xff]  ;;  %vm774_vm2 = vcmask 1046528  }
  0x15   : > { %307 = vst [vmem:[#allocation2 + $0x10] sm:$0x3] %v4106_v2  ;;  %311 = vst [vmem:[#allocation2 + $0x1a8] sm:$0x3] %v4106_v2  ;;  %3853 = vmatpush3.bf16.msra.mxu0 %v452_v1  ;;  %s300_s19 = scalar_select %p299_p10, %s4176_s9, 1  ;;  %3969 = vmatpush3.bf16.msra.mxu1 %v452_v1  ;;  %v4266_v52 = vshrl.u32 %v726_v51, 7 }
  0x16   : > { %313 = vst [vmem:[#allocation2 + $0x18] sm:$0x1] %v4106_v2  ;;  %315 = vst [vmem:[#allocation2 + $0x48] sm:$0x1] %v4106_v2  ;;  %v4286_v61 = vld [vmem:[%s6428_s2] ss:$0 sm:$0xff] }
  0x17   : > { %316 = vst [vmem:[#allocation2 + $0x60] sm:$0x1] %v4106_v2  ;;  %317 = vst [vmem:[#allocation2 + $0x78] sm:$0x1] %v4106_v2  ;;  %s3665_s20 = sshll.u32 %s300_s19, 8  ;;  %v748_v53 = vsub.s32 1, %v4266_v52 }
  0x18   : > { %318 = vst [vmem:[#allocation2 + $0x90] sm:$0x1] %v4106_v2  ;;  %319 = vst [vmem:[#allocation2 + $0xa8] sm:$0x1] %v4106_v2  ;;  %s4216_s23 = scalar_lea.vmem %s6426_s0, %s3665_s20  ;;  %v813_v56 = vsub.s32 2, %v4266_v52  ;;  %v728_v58 = vsub.s32 0, %v4266_v52 }
  0x19   : > { %320 = vst [vmem:[#allocation2 + $0xc0] sm:$0x1] %v4106_v2  ;;  %321 = vst [vmem:[#allocation2 + $0xd8] sm:$0x1] %v4106_v2  ;;  %v347_v3 = vld [vmem:[%s4216_s23] sm:$0xff]  ;;  %v348_v4 = vld [vmem:[%s4216_s23 + $0x8] sm:$0xff]  ;;  %v4275_v55 = vrot.slane %v4272_v54, %v748_v53 }
  0x1a   : > { %322 = vst [vmem:[#allocation2 + $0xf0] sm:$0x1] %v4106_v2  ;;  %323 = vst [vmem:[#allocation2 + $0x108] sm:$0x1] %v4106_v2  ;;  %v349_v5 = vld [vmem:[%s4216_s23 + $0x10] sm:$0xff]  ;;  %v379_v6 = vpack.c.bf16 %v348_v4, %v347_v3  ;;  %v350_v7 = vld [vmem:[%s4216_s23 + $0x18] sm:$0xff]  ;;  %v4280_v59 = vrot.slane %v4272_v54, %v813_v56  ;;  %v4290_v0 = vrot.slane %v4272_v54, %v728_v58 }
  0x1b   : > { %324 = vst [vmem:[#allocation2 + $0x120] sm:$0x1] %v4106_v2  ;;  %325 = vst [vmem:[#allocation2 + $0x138] sm:$0x1] %v4106_v2  ;;  %v351_v8 = vld [vmem:[%s4216_s23 + $0x20] sm:$0xff]  ;;  %v352_v9 = vld [vmem:[%s4216_s23 + $0x28] sm:$0xff]  ;;  %v380_v10 = vpack.c.bf16 %v350_v7, %v349_v5 }
  0x1c   : > { %326 = vst [vmem:[#allocation2 + $0x150] sm:$0x1] %v4106_v2  ;;  %327 = vst [vmem:[#allocation2 + $0x168] sm:$0x1] %v4106_v2  ;;  %v381_v11 = vpack.c.bf16 %v352_v9, %v351_v8  ;;  %3854 = vmatprep.mubr.msk.bf16.mxu0 %vm401_vm1, %v379_v6  ;;  %v363_v12 = vld [vmem:[%s4216_s23 + $0x80] sm:$0xff]  ;;  %v364_v13 = vld [vmem:[%s4216_s23 + $0x88] sm:$0xff] }
  0x1d   : > { %328 = vst [vmem:[#allocation2 + $0x180] sm:$0x1] %v4106_v2  ;;  %329 = vst [vmem:[#allocation2 + $0x29] sm:$0x1] %v4106_v2  ;;  %3855 = vmatmul.mubr.msk.bf16.vlgmr.msra.gmra.mxu0 %vm401_vm1, %v380_v10  ;;  %v365_v14 = vld [vmem:[%s4216_s23 + $0x90] sm:$0xff]  ;;  %v354_v16 = vld [vmem:[%s4216_s23 + $0x38] sm:$0xff]  ;;  %v387_v17 = vpack.c.bf16 %v364_v13, %v363_v12 }
  0x1e   : > { %330 = vst [vmem:[#allocation2 + $0x41] sm:$0x1] %v4106_v2  ;;  %331 = vst [vmem:[#allocation2 + $0x59] sm:$0x1] %v4106_v2  ;;  %3858 = vmatprep.mubr.msk.bf16.mxu0 %vm401_vm1, %v381_v11  ;;  %v353_v15 = vld [vmem:[%s4216_s23 + $0x30] sm:$0xff]  ;;  %v366_v18 = vld [vmem:[%s4216_s23 + $0x98] sm:$0xff] }
  0x1f   : > { %332 = vst [vmem:[#allocation2 + $0x71] sm:$0x1] %v4106_v2  ;;  %333 = vst [vmem:[#allocation2 + $0x89] sm:$0x1] %v4106_v2  ;;  %v355_v19 = vld [vmem:[%s4216_s23 + $0x40] sm:$0xff]  ;;  %v356_v20 = vld [vmem:[%s4216_s23 + $0x48] sm:$0xff]  ;;  %v388_v21 = vpack.c.bf16 %v366_v18, %v365_v14  ;;  %3870 = vmatprep.mubr.msk.bf16.mxu1 %vm401_vm1, %v387_v17  ;;  %v382_v24 = vpack.c.bf16 %v354_v16, %v353_v15 }
  0x20   : > { %334 = vst [vmem:[#allocation2 + $0xa1] sm:$0x1] %v4106_v2  ;;  %335 = vst [vmem:[#allocation2 + $0xb9] sm:$0x1] %v4106_v2  ;;  %v367_v22 = vld [vmem:[%s4216_s23 + $0xa0] sm:$0xff]  ;;  %v368_v23 = vld [vmem:[%s4216_s23 + $0xa8] sm:$0xff]  ;;  %v383_v26 = vpack.c.bf16 %v356_v20, %v355_v19 }
  0x21   : > { %336 = vst [vmem:[#allocation2 + $0xd1] sm:$0x1] %v4106_v2  ;;  %337 = vst [vmem:[#allocation2 + $0xe9] sm:$0x1] %v4106_v2  ;;  %3871 = vmatmul.mubr.msk.bf16.vlgmr.msra.gmra.mxu1 %vm401_vm1, %v388_v21  ;;  %v389_v25 = vpack.c.bf16 %v368_v23, %v367_v22  ;;  %v369_v27 = vld [vmem:[%s4216_s23 + $0xb0] sm:$0xff]  ;;  %v370_v28 = vld [vmem:[%s4216_s23 + $0xb8] sm:$0xff] }
  0x22   : > { %338 = vst [vmem:[#allocation2 + $0x101] sm:$0x1] %v4106_v2  ;;  %339 = vst [vmem:[#allocation2 + $0x119] sm:$0x1] %v4106_v2  ;;  %v371_v29 = vld [vmem:[%s4216_s23 + $0xc0] sm:$0xff]  ;;  %v372_v30 = vld [vmem:[%s4216_s23 + $0xc8] sm:$0xff]  ;;  %v390_v31 = vpack.c.bf16 %v370_v28, %v369_v27 }
  0x23   : > { %340 = vst [vmem:[#allocation2 + $0x131] sm:$0x1] %v4106_v2  ;;  %341 = vst [vmem:[#allocation2 + $0x149] sm:$0x1] %v4106_v2  ;;  %3874 = vmatprep.mubr.msk.bf16.mxu1 %vm401_vm1, %v389_v25  ;;  %v357_v32 = vld [vmem:[%s4216_s23 + $0x50] sm:$0xff]  ;;  %v358_v33 = vld [vmem:[%s4216_s23 + $0x58] sm:$0xff]  ;;  %v391_v34 = vpack.c.bf16 %v372_v30, %v371_v29 }
  0x24   : > { %342 = vst [vmem:[#allocation2 + $0x161] sm:$0x1] %v4106_v2  ;;  %343 = vst [vmem:[#allocation2 + $0x179] sm:$0x1] %v4106_v2  ;;  %v359_v35 = vld [vmem:[%s4216_s23 + $0x60] sm:$0xff]  ;;  %v360_v36 = vld [vmem:[%s4216_s23 + $0x68] sm:$0xff]  ;;  %v384_v37 = vpack.c.bf16 %v358_v33, %v357_v32 }
  0x25   : > { %344 = vst [vmem:[#allocation2 + $0x191] sm:$0x1] %v4106_v2  ;;  %3859 = vmatmul.mubr.msk.bf16.gmra.mxu0 %vm401_vm1, %v382_v24  ;;  %v385_v38 = vpack.c.bf16 %v360_v36, %v359_v35  ;;  %v373_v39 = vld [vmem:[%s4216_s23 + $0xd0] sm:$0xff]  ;;  %v374_v40 = vld [vmem:[%s4216_s23 + $0xd8] sm:$0xff]  ;;  %v375_v41 = vld [vmem:[%s4216_s23 + $0xe0] sm:$0xff]  ;;  %v750_v60 = vmul.f32 0.0, %v4275_v55 }
  0x26   : > { %3862 = vmatprep.mubr.msk.bf16.mxu0 %vm401_vm1, %v383_v26  ;;  %v376_v42 = vld [vmem:[%s4216_s23 + $0xe8] sm:$0xff]  ;;  %v392_v43 = vpack.c.bf16 %v374_v40, %v373_v39  ;;  %v361_v44 = vld [vmem:[%s4216_s23 + $0x70] sm:$0xff]  ;;  %v362_v45 = vld [vmem:[%s4216_s23 + $0x78] sm:$0xff]  ;;  %v815_v2 = vmul.f32 0.0, %v4280_v59  ;;  %v890_v4 = vsub.s32 3, %v4266_v52  ;;  %v910_v5 = vsub.s32 4, %v4266_v52 }
  0x27   : > { %v393_v46 = vpack.c.bf16 %v376_v42, %v375_v41  ;;  %v386_v47 = vpack.c.bf16 %v362_v45, %v361_v44  ;;  %v377_v48 = vld [vmem:[%s4216_s23 + $0xf0] sm:$0xff]  ;;  %v378_v49 = vld [vmem:[%s4216_s23 + $0xf8] sm:$0xff]  ;;  %v775_v1 = vrot.slane %v750_v60, 1  ;;  %v974_v10 = vsub.s32 5, %v4266_v52  ;;  %s3698_s26 = sshll.u32 %s4176_s9, 12  ;;  %s4107_s19 = smov [#allocation4]  }
  0x28   : > { %v394_v50 = vpack.c.bf16 %v378_v49, %v377_v48  ;;  %v716_v57 = vld [vmem:[#allocation2 + $0x10] sm:$0x3]  ;;  %v1051_v11 = vsub.s32 6, %v4266_v52  ;;  %v730_v13 = vmul.f32 0.0, %v4290_v0  ;;  %vm839_vm3 = vcmask 1045504   ;;  %s6377_s17 = scalar_lea.hbm %s6434_s8, %s3698_s26  ;;  %s4048_s20 = sshll.u32 %s4107_s19, 4  ;;  %s4049_s20 = int_to_ptr.vmem [resolvable:$false] %s4048_s20 }
  0x29   : > { %3875 = vmatmul.mubr.msk.bf16.gmra.mxu1 %vm401_vm1, %v390_v31  ;;  %v752_v62 = vmul.f32 %v4275_v55, %v716_v57  ;;  %v817_v8 = vmul.f32 %v4280_v59, %v716_v57  ;;  %v840_v14 = vrot.slane %v815_v2, 2  ;;  %v4304_v21 = vrot.slane %v4272_v54, %v890_v4  ;;  %v4015_v57 = vld [vmem:[%s6431_s5 + $0x38] sm:$0xff]  }
  0x2a   : > { %3878 = vmatprep.mubr.msk.bf16.mxu1 %vm401_vm1, %v391_v34  ;;  %v1071_v22 = vsub.s32 7, %v4266_v52  ;;  %v4310_v31 = vrot.slane %v4272_v54, %v910_v5  ;;  %v803_v32 = vadd.f32 %v775_v1, %v730_v13  ;;  %v4332_v58 = vrot.slane %v4272_v54, %v1051_v11  ;;  %3920 = vmatprep.subr.bf16.mxu0 %v4015_v57 }
  0x2b   : > { %v778_v7 = vrot.slane %v752_v62, 1  ;;  %v843_v25 = vrot.slane %v817_v8, 2  ;;  %3921 = vmatpush3.bf16.msra.mxu0 %v4015_v57 }
  0x2c   : > { %v4326_v51 = vrot.slane %v4272_v54, %v1071_v22  ;;  %v868_v60 = vadd.f32 %v840_v14, %v803_v32 }
  0x2d   : > { %3863 = vmatmul.mubr.msk.bf16.gmra.mxu0 %vm401_vm1, %v384_v37  ;;  %v779_v24 = vsel %vm774_vm2, %v775_v1, %v778_v7  ;;  %v844_v41 = vsel %vm839_vm3, %v840_v14, %v843_v25 }
  0x2e   : > { %3866 = vmatprep.mubr.msk.bf16.mxu0 %vm401_vm1, %v385_v38  ;;  %v804_v40 = vadd.f32 %v779_v24, %v730_v13 }
  0x30   : > { %v4339_v2 = vadd.f32 %v844_v41, %v804_v40 }
  0x31   : > { %3879 = vmatmul.mubr.msk.bf16.gmra.mxu1 %vm401_vm1, %v392_v43 }
  0x32   : > { %3882 = vmatprep.mubr.msk.bf16.mxu1 %vm401_vm1, %v393_v46 }
  0x35   : > { %3867 = vmatmul.mubr.msk.bf16.gmra.mxu0 %vm401_vm1, %v386_v47 }
  0x39   : > { %3883 = vmatmul.mubr.msk.bf16.gmra.mxu1 %vm401_vm1, %v394_v50  ;;  %v4323_v50 = vrot.slane %v4272_v54, %v974_v10 }
  0xdd   : > { %v3856_v63 = vpop.f32.mrf.mxu0 }
  0xde   : > { %v497_v3 = vadd.f32 %v3856_v63, %v4286_v61  ;;  %v4337_v63 = vld [vmem:[%s6429_s3 + $0x8] ss:$0 sm:$0xff] }
  0xdf   : > { %v488_v6 = vpop.f32.mrf.mxu0 }
  0xe0   : > { %v617_v9 = vmax.f32 %v497_v3, 0.0  ;;  %v489_v12 = vadd.f32 %v4286_v61, %v488_v6 }
  0xe1   : > { %v3857_v15 = vpop.f32.mrf.mxu0  ;;  %v3872_v16 = vpop.f32.mrf.mxu1 }
  0xe2   : > { %v649_v17 = vmin.f32 %v617_v9, 6.0  ;;  %v615_v18 = vmax.f32 %v489_v12, 0.0  ;;  %v500_v19 = vadd.f32 %v3857_v15, %v4286_v61  ;;  %v561_v20 = vadd.f32 %v3872_v16, %v4286_v61 }
  0xe3   : > { %v491_v23 = vpop.f32.mrf.mxu0  ;;  %v552_v26 = vpop.f32.mrf.mxu1 }
  0xe4   : > { %681 = vst [vmem:[#allocation2 + $0x31] sm:$0xff] %v649_v17  ;;  %v647_v27 = vmin.f32 %v615_v18, 6.0  ;;  %v618_v28 = vmax.f32 %v500_v19, 0.0  ;;  %v492_v29 = vadd.f32 %v4286_v61, %v491_v23  ;;  %v633_v30 = vmax.f32 %v561_v20, 0.0 }
  0xe5   : > { %v3860_v33 = vpop.f32.mrf.mxu0  ;;  %v553_v34 = vadd.f32 %v4286_v61, %v552_v26  ;;  %v3873_v35 = vpop.f32.mrf.mxu1 }
  0xe6   : > { %679 = vst [vmem:[#allocation2 + $0x19] sm:$0xff] %v647_v27  ;;  %v650_v36 = vmin.f32 %v618_v28, 6.0  ;;  %v616_v37 = vmax.f32 %v492_v29, 0.0  ;;  %v513_v38 = vadd.f32 %v3860_v33, %v4286_v61  ;;  %v665_v39 = vmin.f32 %v633_v30, 6.0 }
  0xe7   : > { %v504_v42 = vpop.f32.mrf.mxu0  ;;  %v631_v43 = vmax.f32 %v553_v34, 0.0  ;;  %v564_v44 = vadd.f32 %v3873_v35, %v4286_v61  ;;  %v555_v45 = vpop.f32.mrf.mxu1 }
  0xe8   : > { %682 = vst [vmem:[#allocation2 + $0x39] sm:$0xff] %v650_v36  ;;  %v648_v46 = vmin.f32 %v616_v37, 6.0  ;;  %v621_v47 = vmax.f32 %v513_v38, 0.0  ;;  %v4317_v48 = vadd.f32 %v4286_v61, %v504_v42  ;;  %697 = vst [vmem:[#allocation2 + $0xf1] sm:$0xff] %v665_v39  ;;  %v4320_v49 = vadd.f32 %v4286_v61, %v555_v45 }
  0xe9   : > { %v3861_v52 = vpop.f32.mrf.mxu0  ;;  %v663_v53 = vmin.f32 %v631_v43, 6.0  ;;  %v634_v56 = vmax.f32 %v564_v44, 0.0 }
  0xea   : > { %680 = vst [vmem:[#allocation2 + $0x21] sm:$0xff] %v648_v46  ;;  %v653_v62 = vmin.f32 %v621_v47, 6.0  ;;  %v619_v3 = vmax.f32 %v4317_v48, 0.0  ;;  %v4343_v4 = vadd.f32 %v3861_v52, %v4286_v61 }
  0xeb   : > { %v720_v1 = vld [vmem:[#allocation2 + $0x30] sm:$0xff]  ;;  %695 = vst [vmem:[#allocation2 + $0xd9] sm:$0xff] %v663_v53  ;;  %v666_v5 = vmin.f32 %v634_v56, 6.0 }
  0xec   : > { %v4346_v54 = vmul.f32 %v4290_v0, %v720_v1  ;;  %v756_v6 = vmul.f32 %v4275_v55, %v720_v1  ;;  %v4350_v7 = vmul.f32 %v4280_v59, %v720_v1  ;;  %685 = vst [vmem:[#allocation2 + $0x61] sm:$0xff] %v653_v62  ;;  %v4354_v9 = vmul.f32 %v4304_v21, %v720_v1 }
  0xed   : > { %v915_v10 = vmul.f32 %v4310_v31, %v720_v1  ;;  %v4358_v11 = vmul.f32 %v4323_v50, %v720_v1  ;;  %v4361_v12 = vmul.f32 %v4326_v51, %v720_v1  ;;  %v717_v13 = vld [vmem:[#allocation2 + $0x18] sm:$0xff]  ;;  %698 = vst [vmem:[#allocation2 + $0xf9] sm:$0xff] %v666_v5  ;;  %v4365_v16 = vmul.f32 %v4332_v58, %v720_v1 }
  0xee   : > { %v785_v14 = vrot.slane %v756_v6, 1  ;;  %v850_v15 = vrot.slane %v4350_v7, 2  ;;  %v4368_v17 = vmul.f32 %v4337_v63, %v720_v1  ;;  %v4372_v20 = vmul.f32 %v4290_v0, %v717_v13 }
  0xef   : > { %v941_v18 = vrot.slane %v915_v10, 1  ;;  %v4375_v22 = vmul.f32 %v4275_v55, %v717_v13  ;;  %v721_v23 = vld [vmem:[#allocation2 + $0x38] sm:$0xff]  ;;  %v722_v24 = vld [vmem:[#allocation2 + $0x40] sm:$0x3]  ;;  %v1097_v25 = vrot.slane %v4361_v12, 1  ;;  %v4379_v26 = vmul.f32 %v4280_v59, %v717_v13 }
  0xf0   : > { %v892_v27 = vmul.f32 %v4304_v21, %v717_v13  ;;  %v4383_v28 = vmul.f32 %v4310_v31, %v717_v13  ;;  %v1161_v29 = vrot.slane %v4368_v17, 2  ;;  %v4388_v32 = vmul.f32 %v4323_v50, %v717_v13  ;;  %v881_v34 = vld [vmem:[#allocation2 + $0x40] sm:$0x3] }
  0xf1   : > { %v780_v30 = vrot.slane %v4375_v22, 1  ;;  %v757_v33 = vmul.f32 %v4275_v55, %v721_v23  ;;  %v845_v35 = vrot.slane %v4379_v26, 2  ;;  %v735_v37 = vmul.f32 %v4290_v0, %v721_v23  ;;  %v1039_v5 = vld [vmem:[#allocation2 + $0x40] sm:$0x3]  ;;  %v719_v22 = vld [vmem:[#allocation2 + $0x28] sm:$0x3] }
  0xf2   : > { %v4392_v36 = vadd.f32 %v892_v27, %v868_v60  ;;  %v758_v38 = vmul.f32 %v4275_v55, %v722_v24  ;;  %v936_v39 = vrot.slane %v4383_v28, 1  ;;  %v4398_v41 = vmul.f32 %v4280_v59, %v721_v23  ;;  %v718_v17 = vld [vmem:[#allocation2 + $0x20] sm:$0xff] }
  0xf3   : > { %v786_v40 = vrot.slane %v757_v33, 1  ;;  %v823_v42 = vmul.f32 %v4280_v59, %v722_v24  ;;  %v1000_v43 = vrot.slane %v4388_v32, 2  ;;  %v916_v45 = vmul.f32 %v4310_v31, %v721_v23 }
  0xf4   : > { %v788_v44 = vrot.slane %v758_v38, 1  ;;  %v917_v46 = vmul.f32 %v4310_v31, %v881_v34  ;;  %v851_v47 = vrot.slane %v4398_v41, 2  ;;  %v4406_v53 = vmul.f32 %v4304_v21, %v721_v23 }
  0xf5   : > { %v853_v52 = vrot.slane %v823_v42, 2  ;;  %v4409_v56 = vmul.f32 %v4323_v50, %v721_v23  ;;  %v942_v60 = vrot.slane %v916_v45, 1  ;;  %v981_v1 = vmul.f32 %v4323_v50, %v881_v34 }
  0xf6   : > { %v789_v57 = vsel %vm774_vm2, %v786_v40, %v788_v44  ;;  %v944_v62 = vrot.slane %v917_v46, 1  ;;  %v4414_v6 = vsel %vm774_vm2, %v785_v14, %v786_v40  ;;  %v4428_v33 = vmul.f32 %v4332_v58, %v721_v23 }
  0xf7   : > { %v4416_v10 = vadd.f32 %v789_v57, %v735_v37  ;;  %v4421_v12 = vsel %vm839_vm3, %v851_v47, %v853_v52  ;;  %v6435_v13 = vrot.slane %v4409_v56, 2  ;;  %v4425_v24 = vsel %vm774_vm2, %v941_v18, %v942_v60 }
  0xf8   : > { %v1008_v27 = vrot.slane %v981_v1, 2  ;;  %v1074_v14 = vmul.f32 %v4326_v51, %v721_v23  ;;  %v4432_v34 = vsel %vm774_vm2, %v942_v60, %v944_v62  ;;  %v1075_v37 = vmul.f32 %v4326_v51, %v1039_v5 }
  0xf9   : > { %v1138_v38 = vmul.f32 %v4337_v63, %v721_v23  ;;  %v1139_v40 = vmul.f32 %v4337_v63, %v1039_v5  ;;  %v733_v44 = vmul.f32 %v4290_v0, %v718_v17  ;;  %v754_v18 = vmul.f32 %v4275_v55, %v718_v17 }
  0xfa   : > { %v1098_v42 = vrot.slane %v1074_v14, 1  ;;  %v755_v45 = vmul.f32 %v4275_v55, %v719_v22  ;;  %v1100_v46 = vrot.slane %v1075_v37, 1  ;;  %v819_v1 = vmul.f32 %v4280_v59, %v718_v17 }
  0xfb   : > { %v1162_v52 = vrot.slane %v1138_v38, 2  ;;  %v1164_v57 = vrot.slane %v1139_v40, 2  ;;  %v4444_v60 = vsel %vm839_vm3, %v6435_v13, %v1008_v27  ;;  %v781_v23 = vrot.slane %v754_v18, 1  ;;  %v878_v40 = vld [vmem:[#allocation2 + $0x28] sm:$0x3] }
  0xfc   : > { %v783_v62 = vrot.slane %v755_v45, 1  ;;  %v820_v5 = vmul.f32 %v4280_v59, %v719_v22  ;;  %v4448_v14 = vsel %vm774_vm2, %v1097_v25, %v1098_v42  ;;  %v4451_v8 = vsel %vm774_vm2, %v1098_v42, %v1100_v46  ;;  %v885_v46 = vld [vmem:[#allocation2 + $0x60] sm:$0xff] }
  0xfd   : > { %6454 = vst [vmem:[#allocation7_spill] sm:$0xff] %v4448_v14  ;;  %6455 = vst [vmem:[#allocation8_spill] sm:$0xff] %v4451_v8  ;;  %v4454_v37 = vsel %vm839_vm3, %v1161_v29, %v1162_v52  ;;  %v846_v38 = vrot.slane %v819_v1, 2  ;;  %v782_v19 = vsel %vm774_vm2, %v780_v30, %v781_v23  ;;  %v893_v18 = vmul.f32 %v4304_v21, %v718_v17  ;;  %v4467_v29 = vld [vmem:[%s6433_s7] sm:$0x3] }
  0xfe   : > { %6456 = vst [vmem:[#allocation9_spill] sm:$0xff] %v4454_v37  ;;  %v784_v27 = vsel %vm774_vm2, %v781_v23, %v783_v62  ;;  %v848_v13 = vrot.slane %v820_v5, 2  ;;  %v4460_v22 = vsel %vm839_vm3, %v1162_v52, %v1164_v57  ;;  %v805_v25 = vadd.f32 %v782_v19, %v4372_v20  ;;  %6458 = vst [vmem:[#allocation11_spill] sm:$0xff] %v4467_v29  ;;  %v507_v62 = vpop.f32.mrf.mxu0 }
  0xff   : > { %6457 = vst [vmem:[#allocation10_spill] sm:$0xff] %v4460_v22  ;;  %v806_v45 = vadd.f32 %v784_v27, %v733_v44  ;;  %v913_v42 = vmul.f32 %v4310_v31, %v718_v17  ;;  %v847_v30 = vsel %vm839_vm3, %v845_v35, %v846_v38  ;;  %v914_v52 = vmul.f32 %v4310_v31, %v878_v40 }
 0x100   : > { %v849_v1 = vsel %vm839_vm3, %v846_v38, %v848_v13  ;;  %v977_v57 = vmul.f32 %v4323_v50, %v718_v17  ;;  %3972 = vmatprep.subr.msk.bf16.mxu1 %vm450_vm0, %v4467_v29  ;;  %v901_v20 = vadd.f32 %v893_v18, %v4339_v2  ;;  %v978_v23 = vmul.f32 %v4323_v50, %v878_v40 }
 0x101   : > { %v871_v19 = vadd.f32 %v849_v1, %v806_v45  ;;  %v937_v44 = vrot.slane %v913_v42, 1  ;;  %v870_v5 = vadd.f32 %v847_v30, %v805_v25  ;;  %v939_v26 = vrot.slane %v914_v52, 1  ;;  %v3864_v1 = vpop.f32.mrf.mxu0 }
 0x102   : > { %v1001_v27 = vrot.slane %v977_v57, 2  ;;  %v4480_v35 = vmul.f32 %v4310_v31, %v885_v46  ;;  %v1003_v17 = vrot.slane %v978_v23, 2  ;;  %v4486_v38 = vmul.f32 %v4304_v21, %v885_v46 }
 0x103   : > { %v938_v13 = vsel %vm774_vm2, %v936_v39, %v937_v44  ;;  %v4489_v2 = vmul.f32 %v4323_v50, %v885_v46  ;;  %v903_v40 = vadd.f32 %v4406_v53, %v871_v19  ;;  %v940_v18 = vsel %vm774_vm2, %v937_v44, %v939_v26 }
 0x104   : > { %v964_v25 = vadd.f32 %v938_v13, %v4392_v36  ;;  %v1002_v45 = vsel %vm839_vm3, %v1000_v43, %v1001_v27  ;;  %v965_v28 = vadd.f32 %v940_v18, %v901_v20  ;;  %v1004_v39 = vsel %vm839_vm3, %v1001_v27, %v1003_v17 }
 0x105   : > { %v4501_v57 = vmul.f32 %v4332_v58, %v885_v46  ;;  %v4504_v53 = vmul.f32 %v4326_v51, %v885_v46  ;;  %v4507_v36 = vmul.f32 %v4337_v63, %v885_v46  ;;  %v4510_v43 = vmul.f32 %v885_v46, %v4275_v55 }
 0x106   : > { %v1028_v52 = vadd.f32 %v1002_v45, %v964_v25  ;;  %v1029_v32 = vadd.f32 %v1004_v39, %v965_v28  ;;  %v4513_v19 = vmul.f32 %v885_v46, %v4280_v59  ;;  %v651_v20 = vmin.f32 %v619_v3, 6.0  ;;  %v520_v3 = vpop.f32.mrf.mxu0 }
 0x107   : > { %v4522_v26 = vmul.f32 %v885_v46, %v4290_v0  ;;  %v807_v27 = vadd.f32 %v4414_v6, %v4346_v54  ;;  %v852_v48 = vsel %vm839_vm3, %v850_v15, %v851_v47  ;;  %v902_v54 = vadd.f32 %v4354_v9, %v870_v5 }
 0x108   : > { %v4518_v44 = vadd.f32 %v4365_v16, %v1028_v52  ;;  %v4527_v13 = vadd.f32 %v4428_v33, %v1029_v32  ;;  %683 = vst [vmem:[#allocation2 + $0x49] sm:$0xff] %v651_v20  ;;  %v622_v6 = vmax.f32 %v4343_v4, 0.0  ;;  %v1785_v33 = vld [vmem:[#allocation2 + $0xf0] sm:$0xff]  ;;  %v6461_v25 = vrot.slane %v4409_v56, 2 }
 0x109   : > { %v872_v46 = vadd.f32 %v852_v48, %v807_v27  ;;  %v6462_v45 = vrot.slane %v4358_v11, 2  ;;  %v508_v41 = vadd.f32 %v4286_v61, %v507_v62  ;;  %v967_v7 = vadd.f32 %v4432_v34, %v903_v40 }
 0x10a   : > { %6459 = vst [vmem:[#allocation12_spill] sm:$0xff] %v4518_v44  ;;  %6460 = vst [vmem:[#allocation13_spill] sm:$0xff] %v4527_v13  ;;  %v529_v15 = vadd.f32 %v3864_v1, %v4286_v61  ;;  %v966_v47 = vadd.f32 %v4425_v24, %v902_v54  ;;  %v654_v39 = vmin.f32 %v622_v6, 6.0  ;;  %v4550_v9 = vadd.f32 %v4421_v12, %v4416_v10 }
 0x10b   : > { %v1007_v28 = vsel %vm839_vm3, %v6462_v45, %v6461_v25  ;;  %v521_v4 = vadd.f32 %v4286_v61, %v520_v3  ;;  %v620_v56 = vmax.f32 %v508_v41, 0.0  ;;  %v4554_v11 = vmul.f32 %v1785_v33, %v4290_v0 }
 0x10c   : > { %v625_v5 = vmax.f32 %v529_v15, 0.0  ;;  %v4557_v62 = vmul.f32 %v1785_v33, %v4275_v55  ;;  %v1030_v34 = vadd.f32 %v1007_v28, %v966_v47  ;;  %686 = vst [vmem:[#allocation2 + $0x69] sm:$0xff] %v654_v39  ;;  %v4560_v40 = vadd.f32 %v4444_v60, %v967_v7 }
 0x10d   : > { %6463 = vst [vmem:[#allocation14_spill] sm:$0xff] %v4554_v11  ;;  %v623_v24 = vmax.f32 %v521_v4, 0.0  ;;  %v4563_v1 = vmul.f32 %v1785_v33, %v4280_v59  ;;  %v652_v10 = vmin.f32 %v620_v56, 6.0  ;;  %v4567_v32 = vmul.f32 %v1785_v33, %v4304_v21 }
 0x10e   : > { %v657_v12 = vmin.f32 %v625_v5, 6.0  ;;  %v4571_v3 = vmul.f32 %v1785_v33, %v4310_v31  ;;  %v4574_v60 = vmul.f32 %v1785_v33, %v4323_v50  ;;  %v4584_v45 = vmul.f32 %v1785_v33, %v4332_v58  ;;  %v3865_v5 = vpop.f32.mrf.mxu0 }
 0x10f   : > { %6464 = vst [vmem:[#allocation15_spill] sm:$0xff] %v4563_v1  ;;  %6465 = vst [vmem:[#allocation16_spill] sm:$0xff] %v4567_v32  ;;  %v723_v20 = vld [vmem:[#allocation2 + $0x48] sm:$0xff]  ;;  %v655_v27 = vmin.f32 %v623_v24, 6.0  ;;  %v4613_v47 = vmul.f32 %v1785_v33, %v4326_v51  ;;  %v6468_v8 = vrot.slane %v4480_v35, 1 }
 0x110   : > { %6466 = vst [vmem:[#allocation17_spill] sm:$0xff] %v4574_v60  ;;  %v4577_v54 = vmul.f32 %v4275_v55, %v723_v20  ;;  %v4580_v6 = vmul.f32 %v4280_v59, %v723_v20  ;;  %v896_v25 = vmul.f32 %v4304_v21, %v723_v20  ;;  %684 = vst [vmem:[#allocation2 + $0x51] sm:$0xff] %v652_v10 }
 0x111   : > { %689 = vst [vmem:[#allocation2 + $0x91] sm:$0xff] %v657_v12  ;;  %6467 = vst [vmem:[#allocation18_spill] sm:$0xff] %v4584_v45  ;;  %v4587_v28 = vmul.f32 %v4290_v0, %v723_v20  ;;  %v4590_v41 = vmul.f32 %v4310_v31, %v723_v20  ;;  %v4593_v7 = vmul.f32 %v4323_v50, %v723_v20 }
 0x112   : > { %v4596_v15 = vmul.f32 %v4326_v51, %v723_v20  ;;  %687 = vst [vmem:[#allocation2 + $0x79] sm:$0xff] %v655_v27  ;;  %v1055_v4 = vmul.f32 %v4332_v58, %v723_v20  ;;  %v4602_v56 = vmul.f32 %v4337_v63, %v723_v20  ;;  %v4604_v24 = vadd.f32 %v896_v25, %v872_v46 }
 0x113   : > { %v886_v16 = vld [vmem:[#allocation2 + $0x68] sm:$0xff]  ;;  %v887_v30 = vld [vmem:[#allocation2 + $0x70] sm:$0x3]  ;;  %v4616_v20 = vmul.f32 %v4337_v63, %v1785_v33 }
 0x114   : > { %v4609_v52 = vadd.f32 %v1055_v4, %v1030_v34  ;;  %v1045_v39 = vld [vmem:[#allocation2 + $0x70] sm:$0x3]  ;;  %v922_v46 = vmul.f32 %v4310_v31, %v886_v16  ;;  %v923_v25 = vmul.f32 %v4310_v31, %v887_v30  ;;  %v4621_v12 = vmul.f32 %v4323_v50, %v886_v16 }
 0x115   : > { %v4624_v34 = vadd.f32 %v3865_v5, %v4286_v61  ;;  %v4627_v4 = vmul.f32 %v4304_v21, %v886_v16  ;;  %v987_v27 = vmul.f32 %v4323_v50, %v887_v30  ;;  %v1080_v48 = vmul.f32 %v4326_v51, %v886_v16  ;;  %v1270_v37 = vld [vmem:[#allocation2 + $0x70] sm:$0x3] }
 0x116   : > { %v1081_v33 = vmul.f32 %v4326_v51, %v1045_v39  ;;  %v952_v10 = vrot.slane %v922_v46, 1  ;;  %v954_v18 = vrot.slane %v923_v25, 1  ;;  %v1144_v23 = vmul.f32 %v4337_v63, %v886_v16 }
 0x117   : > { %v1018_v42 = vrot.slane %v987_v27, 2  ;;  %v1108_v45 = vrot.slane %v1080_v48, 1  ;;  %v1145_v5 = vmul.f32 %v4337_v63, %v1045_v39  ;;  %v4644_v46 = vmul.f32 %v4332_v58, %v886_v16  ;;  %v4646_v17 = vld [vmem:[#allocation2 + $0x50] sm:$0xff] }
 0x118   : > { %v1110_v22 = vrot.slane %v1081_v33, 1  ;;  %v4638_v30 = vsel %vm774_vm2, %v6468_v8, %v952_v10  ;;  %v4641_v13 = vsel %vm774_vm2, %v952_v10, %v954_v18  ;;  %v1172_v25 = vrot.slane %v1144_v23, 2  ;;  %v4016_v48 = vld [vmem:[%s6431_s5 + $0x30] sm:$0xff]   ;;  %v725_v23 = vld [vmem:[#allocation2 + $0x58] sm:$0x3] }
 0x119   : > { %v6469_v39 = vrot.slane %v4621_v12, 2  ;;  %v6470_v8 = vrot.slane %v4504_v53, 1  ;;  %v1174_v10 = vrot.slane %v1145_v5, 2  ;;  %v1281_v27 = vmul.f32 %v886_v16, %v4290_v0  ;;  %3922 = vmatprep.subr.bf16.mxu0 %v4016_v48 }
 0x11a   : > { %v4663_v33 = vsel %vm774_vm2, %v1108_v45, %v1110_v22  ;;  %v1297_v14 = vmul.f32 %v886_v16, %v4275_v55  ;;  %v1298_v44 = vmul.f32 %v1270_v37, %v4275_v55  ;;  %v4668_v32 = vmul.f32 %v886_v16, %v4280_v59  ;;  %3923 = vmatpush3.bf16.msra.mxu0 %v4016_v48  ;;  %v884_v48 = vld [vmem:[#allocation2 + $0x58] sm:$0x3] }
 0x11b   : > { %v4654_v35 = vsel %vm839_vm3, %v6469_v39, %v1018_v42  ;;  %v4659_v18 = vsel %vm774_vm2, %v6470_v8, %v1108_v45  ;;  %6472 = vst [vmem:[#allocation20_spill] sm:$0xff] %v4663_v33  ;;  %v6473_v42 = vrot.slane %v4507_v36, 2  ;;  %v4676_v5 = vsel %vm839_vm3, %v1172_v25, %v1174_v10 }
 0x11c   : > { %6471 = vst [vmem:[#allocation19_spill] sm:$0xff] %v4659_v18  ;;  %6475 = vst [vmem:[#allocation22_spill] sm:$0xff] %v4676_v5  ;;  %v1358_v39 = vmul.f32 %v1270_v37, %v4280_v59  ;;  %v760_v22 = vmul.f32 %v4275_v55, %v4646_v17  ;;  %v1321_v45 = vrot.slane %v1297_v14, 1  ;;  %v1323_v8 = vrot.slane %v1298_v44, 1 }
 0x11d   : > { %v4673_v53 = vsel %vm839_vm3, %v6473_v42, %v1172_v25  ;;  %v761_v33 = vmul.f32 %v4275_v55, %v725_v23  ;;  %v825_v42 = vmul.f32 %v4280_v59, %v4646_v17  ;;  %v826_v25 = vmul.f32 %v4280_v59, %v725_v23 }
 0x11e   : > { %6474 = vst [vmem:[#allocation21_spill] sm:$0xff] %v4673_v53  ;;  %v1383_v18 = vrot.slane %v1358_v39, 2  ;;  %v791_v36 = vrot.slane %v760_v22, 1  ;;  %v1324_v10 = vsel %vm774_vm2, %v1321_v45, %v1323_v8  ;;  %v737_v37 = vmul.f32 %v4290_v0, %v4646_v17 }
 0x11f   : > { %v793_v5 = vrot.slane %v761_v33, 1  ;;  %v897_v14 = vmul.f32 %v4304_v21, %v4646_v17  ;;  %v6476_v44 = vrot.slane %v4510_v43, 1  ;;  %v4696_v22 = vadd.f32 %v1324_v10, %v1281_v27 }
 0x120   : > { %v6477_v16 = vrot.slane %v4577_v54, 1  ;;  %v856_v8 = vrot.slane %v825_v42, 2  ;;  %v6478_v53 = vrot.slane %v4668_v32, 2  ;;  %v858_v43 = vrot.slane %v826_v25, 2 }
 0x121   : > { %v4694_v39 = vsel %vm774_vm2, %v6476_v44, %v1321_v45  ;;  %v794_v29 = vsel %vm774_vm2, %v791_v36, %v793_v5  ;;  %v905_v45 = vadd.f32 %v897_v14, %v4550_v9  ;;  %v919_v27 = vmul.f32 %v4310_v31, %v4646_v17 }
 0x122   : > { %v792_v23 = vsel %vm774_vm2, %v6477_v16, %v791_v36  ;;  %v4704_v33 = vsel %vm839_vm3, %v6478_v53, %v1383_v18  ;;  %v810_v11 = vadd.f32 %v794_v29, %v737_v37  ;;  %v920_v54 = vmul.f32 %v4310_v31, %v884_v48  ;;  %v1042_v16 = vld [vmem:[#allocation2 + $0x58] sm:$0x3] }
 0x123   : > { %v809_v1 = vadd.f32 %v792_v23, %v4587_v28  ;;  %v6479_v42 = vrot.slane %v4580_v6, 2  ;;  %v859_v18 = vsel %vm839_vm3, %v856_v8, %v858_v43  ;;  %v983_v53 = vmul.f32 %v4323_v50, %v4646_v17  ;;  %v1274_v43 = vld [vmem:[#allocation2 + $0x90] sm:$0xff] }
 0x124   : > { %v984_v28 = vmul.f32 %v4323_v50, %v884_v48  ;;  %v875_v29 = vadd.f32 %v859_v18, %v810_v11  ;;  %v947_v5 = vrot.slane %v919_v27, 1  ;;  %v949_v9 = vrot.slane %v920_v54, 1  ;;  %v4017_v27 = vld [vmem:[%s6431_s5 + $0x28] sm:$0xff]  }
 0x125   : > { %v857_v10 = vsel %vm839_vm3, %v6479_v42, %v856_v8  ;;  %v1056_v36 = vmul.f32 %v4332_v58, %v4646_v17  ;;  %v1011_v25 = vrot.slane %v983_v53, 2  ;;  %v1077_v6 = vmul.f32 %v4326_v51, %v4646_v17  ;;  %3924 = vmatprep.subr.bf16.mxu0 %v4017_v27 }
 0x126   : > { %v1013_v37 = vrot.slane %v984_v28, 2  ;;  %v1078_v14 = vmul.f32 %v4326_v51, %v1042_v16  ;;  %v874_v44 = vadd.f32 %v857_v10, %v809_v1  ;;  %v6480_v23 = vrot.slane %v4590_v41, 1  ;;  %3925 = vmatpush3.bf16.msra.mxu0 %v4017_v27 }
 0x127   : > { %v950_v48 = vsel %vm774_vm2, %v947_v5, %v949_v9  ;;  %v1064_v11 = vadd.f32 %v1056_v36, %v4560_v40  ;;  %v6481_v18 = vrot.slane %v4593_v7, 2  ;;  %v1103_v10 = vrot.slane %v1077_v6, 1 }
 0x128   : > { %v948_v8 = vsel %vm774_vm2, %v6480_v23, %v947_v5  ;;  %v969_v42 = vadd.f32 %v950_v48, %v905_v45  ;;  %v1014_v41 = vsel %vm839_vm3, %v1011_v25, %v1013_v37  ;;  %v1105_v53 = vrot.slane %v1078_v14, 1 }
 0x129   : > { %v968_v54 = vadd.f32 %v948_v8, %v4604_v24  ;;  %v1012_v1 = vsel %vm839_vm3, %v6481_v18, %v1011_v25  ;;  %v1141_v28 = vmul.f32 %v4337_v63, %v4646_v17  ;;  %v1142_v40 = vmul.f32 %v4337_v63, %v1042_v16 }
 0x12a   : > { %v4741_v5 = vadd.f32 %v4627_v4, %v875_v29  ;;  %v1033_v24 = vadd.f32 %v1014_v41, %v969_v42  ;;  %v4744_v45 = vmul.f32 %v1274_v43, %v4275_v55  ;;  %v6482_v7 = vrot.slane %v4596_v15, 1 }
 0x12b   : > { %v1032_v9 = vadd.f32 %v1012_v1, %v968_v54  ;;  %v1106_v25 = vsel %vm774_vm2, %v1103_v10, %v1105_v53  ;;  %v1167_v37 = vrot.slane %v1141_v28, 2  ;;  %v1169_v17 = vrot.slane %v1142_v40, 2  ;;  %v1046_v28 = vld [vmem:[#allocation2 + $0x78] sm:$0xff] }
 0x12c   : > { %v1104_v36 = vsel %vm774_vm2, %v6482_v7, %v1103_v10  ;;  %v1128_v29 = vadd.f32 %v1106_v25, %v1064_v11  ;;  %v4755_v6 = vmul.f32 %v1274_v43, %v4290_v0  ;;  %v4758_v14 = vadd.f32 %v4644_v46, %v1033_v24  ;;  %v3586_v46 = vld [vmem:[%s6430_s4] ss:$0 sm:$0xff] }
 0x12d   : > { %v4751_v16 = vadd.f32 %v4501_v57, %v1032_v9  ;;  %v1127_v4 = vadd.f32 %v1104_v36, %v4609_v52  ;;  %v6485_v15 = vrot.slane %v4602_v56, 2  ;;  %v1170_v8 = vsel %vm839_vm3, %v1167_v37, %v1169_v17  ;;  %v1575_v9 = vld [vmem:[#allocation2 + $0xd8] sm:$0xff] }
 0x12e   : > { %6484 = vst [vmem:[#allocation24_spill] sm:$0xff] %v4758_v14  ;;  %v4765_v48 = vmul.f32 %v1274_v43, %v4280_v59  ;;  %v1192_v27 = vadd.f32 %v1170_v8, %v1128_v29  ;;  %v4769_v11 = vmul.f32 %v1274_v43, %v4310_v31  ;;  %v4776_v54 = vmul.f32 %v1274_v43, %v4304_v21 }
 0x12f   : > { %6483 = vst [vmem:[#allocation23_spill] sm:$0xff] %v4751_v16  ;;  %v1168_v23 = vsel %vm839_vm3, %v6485_v15, %v1167_v37  ;;  %v4779_v42 = vmul.f32 %v1274_v43, %v4323_v50  ;;  %v4782_v18 = vmul.f32 %v1274_v43, %v4326_v51  ;;  %v4785_v10 = vmul.f32 %v1274_v43, %v4332_v58 }
 0x130   : > { %v1191_v57 = vadd.f32 %v1168_v23, %v1127_v4  ;;  %v1206_v41 = vadd.f32 %v3586_v46, %v1192_v27  ;;  %v4788_v53 = vmul.f32 %v4337_v63, %v1274_v43  ;;  %v906_v7 = vadd.f32 %v4486_v38, %v874_v44 }
 0x131   : > { %6486 = vst [vmem:[#allocation25_spill] sm:$0xff] %v4779_v42  ;;  %v6487_v17 = vrot.slane %v4621_v12, 2  ;;  %v6488_v4 = vrot.slane %v4489_v2, 2  ;;  %v1059_v15 = vmul.f32 %v4332_v58, %v1046_v28  ;;  %v4803_v23 = vmul.f32 %v4326_v51, %v1046_v28 }
 0x132   : > { %v1205_v1 = vadd.f32 %v3586_v46, %v1191_v57  ;;  %v1214_v25 = vmax.f32 %v1206_v41, 0.0  ;;  %v970_v29 = vadd.f32 %v4638_v30, %v906_v7  ;;  %v4806_v8 = vmul.f32 %v4337_v63, %v1046_v28 }
 0x133   : > { %v1017_v43 = vsel %vm839_vm3, %v6488_v4, %v6487_v17  ;;  %v4811_v44 = vmul.f32 %v1046_v28, %v4290_v0  ;;  %v4814_v12 = vmul.f32 %v1046_v28, %v4275_v55  ;;  %v1348_v2 = vadd.f32 %v4694_v39, %v4522_v26  ;;  %v4018_v39 = vld [vmem:[%s6431_s5 + $0x20] sm:$0xff]  }
 0x134   : > { %v1213_v36 = vmax.f32 %v1205_v1, 0.0  ;;  %v4818_v30 = vmin.f32 %v1214_v25, 6.0  ;;  %v1034_v57 = vadd.f32 %v1017_v43, %v970_v29  ;;  %v4822_v46 = vmul.f32 %v1046_v28, %v4280_v59  ;;  %3926 = vmatprep.subr.bf16.mxu0 %v4018_v39  ;;  %v1787_v4 = vld [vmem:[#allocation2 + $0x100] sm:$0x3] }
 0x135   : > { %v6491_v41 = vrot.slane %v4668_v32, 2  ;;  %v6492_v7 = vrot.slane %v4513_v19, 2  ;;  %v1429_v17 = vmul.f32 %v1046_v28, %v4304_v21  ;;  %v4832_v26 = vmul.f32 %v1046_v28, %v4310_v31  ;;  %3927 = vmatpush3.bf16.msra.mxu0 %v4018_v39 }
 0x136   : > { %v4808_v38 = vmin.f32 %v1213_v36, 6.0  ;;  %6490 = vst [vmem:[#allocation27_spill] sm:$0xff] %v4818_v30  ;;  %v4837_v25 = vadd.f32 %v1059_v15, %v1034_v57  ;;  %v4841_v32 = vmul.f32 %v1046_v28, %v4323_v50  ;;  %v4863_v15 = vmul.f32 %v1575_v9, %v4290_v0 }
 0x137   : > { %v1382_v36 = vsel %vm839_vm3, %v6492_v7, %v6491_v41  ;;  %v1985_v41 = vrot.slane %v4571_v3, 1  ;;  %v4857_v3 = vmul.f32 %v1575_v9, %v4326_v51  ;;  %v4860_v7 = vmul.f32 %v4337_v63, %v1575_v9 }
 0x138   : > { %6489 = vst [vmem:[#allocation26_spill] sm:$0xff] %v4808_v38  ;;  %v1408_v43 = vadd.f32 %v1382_v36, %v1348_v2  ;;  %v626_v2 = vmax.f32 %v4624_v34, 0.0  ;;  %v4854_v36 = vmul.f32 %v1575_v9, %v4332_v58  ;;  %6496 = vst [vmem:[#allocation31_spill] sm:$0xff] %v4863_v15  ;;  %v4866_v57 = vmul.f32 %v1575_v9, %v4275_v55 }
 0x139   : > { %6494 = vst [vmem:[#allocation29_spill] sm:$0xff] %v4857_v3  ;;  %6495 = vst [vmem:[#allocation30_spill] sm:$0xff] %v4860_v7  ;;  %v4869_v34 = vmul.f32 %v1575_v9, %v4280_v59  ;;  %v4873_v28 = vmul.f32 %v1575_v9, %v4304_v21  ;;  %v4876_v29 = vmul.f32 %v1575_v9, %v4310_v31 }
 0x13a   : > { %v4847_v56 = vadd.f32 %v1429_v17, %v1408_v43  ;;  %6493 = vst [vmem:[#allocation28_spill] sm:$0xff] %v4854_v36  ;;  %v523_v17 = vpop.f32.mrf.mxu0  ;;  %v658_v43 = vmin.f32 %v626_v2, 6.0  ;;  %6497 = vst [vmem:[#allocation32_spill] sm:$0xff] %v4866_v57  ;;  %v4879_v19 = vmul.f32 %v1575_v9, %v4323_v50  ;;  %v4881_v2 = vld [vmem:[#allocation2 + $0xf8] sm:$0xff]  ;;  %v971_v39 = vadd.f32 %v4641_v13, %v4741_v5 }
 0x13b   : > { %6498 = vst [vmem:[#allocation33_spill] sm:$0xff] %v4869_v34  ;;  %6499 = vst [vmem:[#allocation34_spill] sm:$0xff] %v4873_v28  ;;  %v524_v37 = vadd.f32 %v4286_v61, %v523_v17  ;;  %v4893_v52 = vadd.f32 %v4704_v33, %v4696_v22  ;;  %v1796_v27 = vmul.f32 %v4881_v2, %v4290_v0 }
 0x13c   : > { %6500 = vst [vmem:[#allocation35_spill] sm:$0xff] %v4876_v29  ;;  %6501 = vst [vmem:[#allocation36_spill] sm:$0xff] %v4879_v19  ;;  %v1814_v61 = vmul.f32 %v4881_v2, %v4275_v55  ;;  %v1815_v13 = vmul.f32 %v1787_v4, %v4275_v55  ;;  %v4901_v5 = vadd.f32 %v4654_v35, %v971_v39 }
 0x13d   : > { %690 = vst [vmem:[#allocation2 + $0x99] sm:$0xff] %v658_v43  ;;  %v1933_v43 = vld [vmem:[#allocation2 + $0x100] sm:$0x3]  ;;  %v624_v36 = vmax.f32 %v524_v37, 0.0  ;;  %v4905_v17 = vmul.f32 %v4881_v2, %v4280_v59  ;;  %v1875_v22 = vmul.f32 %v1787_v4, %v4280_v59  ;;  %v4910_v33 = vmul.f32 %v4881_v2, %v4310_v31 }
 0x13e   : > { %v1842_v9 = vrot.slane %v1814_v61, 1  ;;  %v1844_v40 = vrot.slane %v1815_v13, 1  ;;  %v4913_v24 = vmul.f32 %v1933_v43, %v4310_v31  ;;  %v4919_v14 = vmul.f32 %v4881_v2, %v4323_v50 }
 0x13f   : > { %6502 = vst [vmem:[#allocation37_spill] sm:$0xff] %v4905_v17  ;;  %v656_v37 = vmin.f32 %v624_v36, 6.0  ;;  %v1904_v35 = vrot.slane %v1875_v22, 2  ;;  %v6503_v4 = vrot.slane %v4557_v62, 1  ;;  %v4929_v61 = vmul.f32 %v4881_v2, %v4304_v21 }
 0x140   : > { %v1845_v36 = vsel %vm774_vm2, %v1842_v9, %v1844_v40 }
 0x141   : > { %688 = vst [vmem:[#allocation2 + $0x81] sm:$0xff] %v656_v37  ;;  %v4924_v16 = vsel %vm774_vm2, %v6503_v4, %v1842_v9  ;;  %6505 = vst [vmem:[#allocation39_spill] sm:$0xff] %v4929_v61  ;;  %v4932_v30 = vadd.f32 %v1845_v36, %v1796_v27  ;;  %v6507_v37 = vrot.slane %v4905_v17, 2  ;;  %v6509_v4 = vrot.slane %v4910_v33, 1 }
 0x142   : > { %6504 = vst [vmem:[#allocation38_spill] sm:$0xff] %v4924_v16  ;;  %v4945_v9 = vmul.f32 %v1933_v43, %v4323_v50  ;;  %v6517_v16 = vrot.slane %v4782_v18, 1 }
 0x143   : > { %6506 = vst [vmem:[#allocation40_spill] sm:$0xff] %v4932_v30  ;;  %v4937_v62 = vsel %vm839_vm3, %v6507_v37, %v1904_v35  ;;  %v4942_v40 = vsel %vm774_vm2, %v1985_v41, %v6509_v4 }
 0x144   : > { %v1275_v22 = vld [vmem:[#allocation2 + $0x98] sm:$0xff]  ;;  %v1276_v39 = vld [vmem:[#allocation2 + $0xa0] sm:$0x3]  ;;  %6508 = vst [vmem:[#allocation41_spill] sm:$0xff] %v4937_v62  ;;  %6510 = vst [vmem:[#allocation42_spill] sm:$0xff] %v4942_v40 }
 0x145   : > { %v1422_v1 = vld [vmem:[#allocation2 + $0xa0] sm:$0x3]  ;;  %v1303_v13 = vmul.f32 %v1275_v22, %v4275_v55  ;;  %v1304_v38 = vmul.f32 %v1276_v39, %v4275_v55  ;;  %v4950_v27 = vmul.f32 %v1275_v22, %v4280_v59  ;;  %v1285_v35 = vmul.f32 %v1275_v22, %v4290_v0 }
 0x146   : > { %v1364_v37 = vmul.f32 %v1276_v39, %v4280_v59  ;;  %v1449_v28 = vmul.f32 %v1275_v22, %v4310_v31  ;;  %v1450_v41 = vmul.f32 %v1422_v1, %v4310_v31  ;;  %v4959_v30 = vmul.f32 %v1275_v22, %v4323_v50  ;;  %v1568_v61 = vld [vmem:[#allocation2 + $0xa0] sm:$0x3] }
 0x147   : > { %v1331_v4 = vrot.slane %v1303_v13, 1  ;;  %v1333_v43 = vrot.slane %v1304_v38, 1  ;;  %v4962_v19 = vmul.f32 %v1275_v22, %v4304_v21  ;;  %v1510_v29 = vmul.f32 %v1422_v1, %v4323_v50 }
 0x148   : > { %v1393_v40 = vrot.slane %v1364_v37, 2  ;;  %v1475_v36 = vrot.slane %v1449_v28, 1  ;;  %v6511_v39 = vrot.slane %v4744_v45, 1  ;;  %v1477_v13 = vrot.slane %v1450_v41, 1 }
 0x149   : > { %v1334_v38 = vsel %vm774_vm2, %v1331_v4, %v1333_v43  ;;  %v6513_v37 = vrot.slane %v4950_v27, 2  ;;  %v6515_v1 = vrot.slane %v4769_v11, 1  ;;  %v4985_v45 = vmul.f32 %v1275_v22, %v4332_v58 }
 0x14a   : > { %v4968_v34 = vsel %vm774_vm2, %v6511_v39, %v1331_v4  ;;  %v4972_v15 = vadd.f32 %v1334_v38, %v1285_v35  ;;  %v1047_v39 = vld [vmem:[#allocation2 + $0x80] sm:$0xff]  ;;  %v1048_v4 = vld [vmem:[#allocation2 + $0x88] sm:$0x3]  ;;  %v1537_v41 = vrot.slane %v1510_v29, 2  ;;  %v1595_v43 = vmul.f32 %v1275_v22, %v4326_v51 }
 0x14b   : > { %v4977_v57 = vsel %vm839_vm3, %v6513_v37, %v1393_v40  ;;  %v4982_v28 = vsel %vm774_vm2, %v6515_v1, %v1475_v36  ;;  %v1596_v35 = vmul.f32 %v1568_v61, %v4326_v51  ;;  %v1655_v38 = vmul.f32 %v4337_v63, %v1275_v22 }
 0x14c   : > { %6512 = vst [vmem:[#allocation43_spill] sm:$0xff] %v4972_v15  ;;  %6514 = vst [vmem:[#allocation44_spill] sm:$0xff] %v4977_v57  ;;  %v1656_v40 = vmul.f32 %v4337_v63, %v1568_v61  ;;  %v1060_v37 = vmul.f32 %v4332_v58, %v1047_v39  ;;  %v1083_v11 = vmul.f32 %v4326_v51, %v1047_v39  ;;  %v1619_v7 = vrot.slane %v1595_v43, 1  ;;  %v1273_v43 = vld [vmem:[#allocation2 + $0x88] sm:$0x3] }
 0x14d   : > { %v1084_v1 = vmul.f32 %v4326_v51, %v1048_v4  ;;  %v4995_v62 = vsel %vm774_vm2, %v1475_v36, %v1477_v13  ;;  %v1621_v3 = vrot.slane %v1596_v35, 1  ;;  %v1679_v29 = vrot.slane %v1655_v38, 2 }
 0x14e   : > { %v1681_v57 = vrot.slane %v1656_v40, 2  ;;  %v1068_v15 = vadd.f32 %v1060_v37, %v4901_v5  ;;  %v1113_v60 = vrot.slane %v1083_v11, 1  ;;  %v6516_v22 = vrot.slane %v4959_v30, 2 }
 0x14f   : > { %v1115_v17 = vrot.slane %v1084_v1, 1  ;;  %v5006_v42 = vsel %vm774_vm2, %v6517_v16, %v1619_v7  ;;  %v5009_v36 = vsel %vm774_vm2, %v1619_v7, %v1621_v3  ;;  %v1147_v13 = vmul.f32 %v4337_v63, %v1047_v39 }
 0x150   : > { %v5001_v61 = vsel %vm839_vm3, %v6516_v22, %v1537_v41  ;;  %6518 = vst [vmem:[#allocation45_spill] sm:$0xff] %v5006_v42  ;;  %6519 = vst [vmem:[#allocation46_spill] sm:$0xff] %v5009_v36  ;;  %v6520_v5 = vrot.slane %v4788_v53, 2  ;;  %v6522_v38 = vrot.slane %v4803_v23, 1  ;;  %v1148_v16 = vmul.f32 %v4337_v63, %v1048_v4 }
 0x151   : > { %v1116_v18 = vsel %vm774_vm2, %v1113_v60, %v1115_v17  ;;  %v5023_v40 = vsel %vm839_vm3, %v1679_v29, %v1681_v57  ;;  %v1177_v37 = vrot.slane %v1147_v13, 2  ;;  %v1300_v53 = vmul.f32 %v1047_v39, %v4275_v55  ;;  %v1419_v17 = vld [vmem:[#allocation2 + $0x88] sm:$0x3] }
 0x152   : > { %v5015_v35 = vsel %vm839_vm3, %v6520_v5, %v1679_v29  ;;  %v1114_v41 = vsel %vm774_vm2, %v6522_v38, %v1113_v60  ;;  %6523 = vst [vmem:[#allocation48_spill] sm:$0xff] %v5023_v40  ;;  %v1132_v3 = vadd.f32 %v1116_v18, %v1068_v15  ;;  %v1179_v11 = vrot.slane %v1148_v16, 2 }
 0x153   : > { %6521 = vst [vmem:[#allocation47_spill] sm:$0xff] %v5015_v35  ;;  %v1131_v7 = vadd.f32 %v1114_v41, %v4837_v25  ;;  %v1301_v1 = vmul.f32 %v1273_v43, %v4275_v55  ;;  %v1360_v23 = vmul.f32 %v1047_v39, %v4280_v59  ;;  %v1283_v22 = vmul.f32 %v1047_v39, %v4290_v0  ;;  %v4019_v25 = vld [vmem:[%s6431_s5 + $0x18] sm:$0xff]  }
 0x154   : > { %v1361_v60 = vmul.f32 %v1273_v43, %v4280_v59  ;;  %v1430_v63 = vmul.f32 %v1047_v39, %v4304_v21  ;;  %v1446_v57 = vmul.f32 %v1047_v39, %v4310_v31  ;;  %v6524_v15 = vrot.slane %v4806_v8, 2  ;;  %3928 = vmatprep.subr.bf16.mxu0 %v4019_v25 }
 0x155   : > { %v1180_v29 = vsel %vm839_vm3, %v1177_v37, %v1179_v11  ;;  %v1326_v13 = vrot.slane %v1300_v53, 1  ;;  %v1328_v5 = vrot.slane %v1301_v1, 1  ;;  %v1386_v43 = vrot.slane %v1360_v23, 2  ;;  %3929 = vmatpush3.bf16.msra.mxu0 %v4019_v25  ;;  %v3876_v25 = vpop.f32.mrf.mxu1 }
 0x156   : > { %v1178_v4 = vsel %vm839_vm3, %v6524_v15, %v1177_v37  ;;  %v1388_v41 = vrot.slane %v1361_v60, 2  ;;  %v1438_v18 = vadd.f32 %v1430_v63, %v4893_v52  ;;  %v6526_v16 = vrot.slane %v4814_v12, 1 }
 0x157   : > { %v5040_v38 = vadd.f32 %v1178_v4, %v1131_v7  ;;  %v1329_v35 = vsel %vm774_vm2, %v1326_v13, %v1328_v5  ;;  %v1447_v8 = vmul.f32 %v1419_v17, %v4310_v31  ;;  %v1470_v15 = vrot.slane %v1446_v57, 1  ;;  %v3868_v57 = vpop.f32.mrf.mxu0 }
 0x158   : > { %v1327_v40 = vsel %vm774_vm2, %v6526_v16, %v1326_v13  ;;  %v1351_v11 = vadd.f32 %v1329_v35, %v1283_v22  ;;  %v6527_v7 = vrot.slane %v4822_v46, 2  ;;  %v1389_v52 = vsel %vm839_vm3, %v1386_v43, %v1388_v41 }
 0x159   : > { %6525 = vst [vmem:[#allocation49_spill] sm:$0xff] %v5040_v38  ;;  %v1350_v37 = vadd.f32 %v1327_v40, %v4811_v44  ;;  %v6528_v1 = vrot.slane %v4832_v26, 1  ;;  %v1472_v23 = vrot.slane %v1447_v8, 1  ;;  %v1506_v60 = vmul.f32 %v1047_v39, %v4323_v50  ;;  %v2079_v40 = vld [vmem:[#allocation2 + $0x100] sm:$0x3]  ;;  %v4020_v26 = vld [vmem:[%s6431_s5 + $0x10] sm:$0xff]  }
 0x15a   : > { %v1387_v53 = vsel %vm839_vm3, %v6527_v7, %v1386_v43  ;;  %v1507_v63 = vmul.f32 %v1419_v17, %v4323_v50  ;;  %v5058_v4 = vadd.f32 %v1180_v29, %v1132_v3  ;;  %v1411_v35 = vadd.f32 %v1389_v52, %v1351_v11  ;;  %3930 = vmatprep.subr.bf16.mxu0 %v4020_v26 }
 0x15b   : > { %v1471_v12 = vsel %vm774_vm2, %v6528_v1, %v1470_v15  ;;  %v1410_v44 = vadd.f32 %v1387_v53, %v1350_v37  ;;  %v1473_v22 = vsel %vm774_vm2, %v1470_v15, %v1472_v23  ;;  %v1530_v13 = vrot.slane %v1506_v60, 2  ;;  %v536_v15 = vpop.f32.mrf.mxu0  ;;  %3931 = vmatpush3.bf16.msra.mxu0 %v4020_v26  ;;  %v5098_v1 = vld [vmem:[%s6428_s2] ss:$0 sm:$0xff] }
 0x15c   : > { %6529 = vst [vmem:[#allocation50_spill] sm:$0xff] %v5058_v4  ;;  %v1497_v46 = vadd.f32 %v1471_v12, %v4847_v56  ;;  %v1532_v5 = vrot.slane %v1507_v63, 2  ;;  %v6530_v39 = vrot.slane %v4913_v24, 1  ;;  %v6531_v17 = vrot.slane %v4910_v33, 1 }
 0x15d   : > { %v5073_v29 = vadd.f32 %v4962_v19, %v1411_v35  ;;  %v1498_v56 = vadd.f32 %v1473_v22, %v1438_v18  ;;  %v2048_v43 = vrot.slane %v4945_v9, 2  ;;  %v2106_v41 = vmul.f32 %v4881_v2, %v4326_v51  ;;  %v568_v18 = vpop.f32.mrf.mxu1 }
 0x15e   : > { %v5070_v3 = vsel %vm774_vm2, %v6531_v17, %v6530_v39  ;;  %v6532_v16 = vrot.slane %v4841_v32, 2  ;;  %v1533_v24 = vsel %vm839_vm3, %v1530_v13, %v1532_v5  ;;  %v5084_v33 = vmul.f32 %v4881_v2, %v4332_v58  ;;  %v5090_v32 = vld [vmem:[%s6429_s3 + $0x8] ss:$0 sm:$0xff] }
 0x15f   : > { %v2107_v19 = vmul.f32 %v2079_v40, %v4326_v51  ;;  %v1558_v37 = vadd.f32 %v1533_v24, %v1498_v56  ;;  %v2130_v11 = vrot.slane %v2106_v41, 1  ;;  %v2166_v7 = vmul.f32 %v5090_v32, %v4881_v2  ;;  %v3877_v5 = vpop.f32.mrf.mxu1 }
 0x160   : > { %v1531_v8 = vsel %vm839_vm3, %v6532_v16, %v1530_v13  ;;  %6533 = vst [vmem:[#allocation51_spill] sm:$0xff] %v5084_v33  ;;  %v2167_v52 = vmul.f32 %v5090_v32, %v2079_v40  ;;  %v545_v12 = vadd.f32 %v5098_v1, %v3868_v57  ;;  %v6534_v23 = vmax.f32 %v4320_v49, 0.0  ;;  %v3869_v13 = vpop.f32.mrf.mxu0 }
 0x161   : > { %v1557_v9 = vadd.f32 %v1531_v8, %v1497_v46  ;;  %v2132_v53 = vrot.slane %v2107_v19, 1  ;;  %v5107_v35 = vadd.f32 %v4985_v45, %v1558_v37  ;;  %v6537_v2 = vrot.slane %v4919_v14, 2 }
 0x162   : > { %v664_v60 = vmin.f32 %v6534_v23, 6.0  ;;  %v2190_v40 = vrot.slane %v2166_v7, 2  ;;  %v6538_v26 = vrot.slane %v4613_v47, 1  ;;  %v2192_v57 = vrot.slane %v2167_v52, 2  ;;  %v539_v23 = vpop.f32.mrf.mxu0 }
 0x163   : > { %v5104_v63 = vadd.f32 %v4785_v10, %v1557_v9  ;;  %6536 = vst [vmem:[#allocation53_spill] sm:$0xff] %v5107_v35  ;;  %v5112_v46 = vsel %vm839_vm3, %v6537_v2, %v2048_v43  ;;  %v629_v49 = vmax.f32 %v545_v12, 0.0  ;;  %v537_v10 = vadd.f32 %v5098_v1, %v536_v15  ;;  %v6547_v9 = vld [vmem:[#allocation25_spill] sm:$0xff] }
 0x164   : > { %v5117_v22 = vsel %vm774_vm2, %v6538_v26, %v2130_v11  ;;  %696 = vst [vmem:[#allocation2 + $0xe1] sm:$0xff] %v664_v60  ;;  %v5121_v45 = vsel %vm774_vm2, %v2130_v11, %v2132_v53  ;;  %v6541_v39 = vrot.slane %v4616_v20, 2  ;;  %v1352_v47 = vadd.f32 %v4968_v34, %v4755_v6  ;;  %v6550_v11 = vld [vmem:[#allocation38_spill] sm:$0xff]  ;;  %v5159_v60 = vpop.f32.mrf.mxu1  ;;  %v6570_v26 = vld [vmem:[#allocation32_spill] sm:$0xff] }
 0x165   : > { %6535 = vst [vmem:[#allocation52_spill] sm:$0xff] %v5104_v63  ;;  %6539 = vst [vmem:[#allocation54_spill] sm:$0xff] %v5117_v22  ;;  %v1439_v56 = vadd.f32 %v4776_v54, %v1410_v44  ;;  %v5132_v43 = vsel %vm839_vm3, %v2190_v40, %v2192_v57  ;;  %v661_v41 = vmin.f32 %v629_v49, 6.0  ;;  %v627_v16 = vmax.f32 %v537_v10, 0.0  ;;  %v6556_v10 = vld [vmem:[#allocation17_spill] sm:$0xff] }
 0x166   : > { %6540 = vst [vmem:[#allocation55_spill] sm:$0xff] %v5121_v45  ;;  %v5126_v17 = vsel %vm839_vm3, %v6541_v39, %v2190_v40  ;;  %6543 = vst [vmem:[#allocation57_spill] sm:$0xff] %v5132_v43  ;;  %v6544_v8 = vrot.slane %v4950_v27, 2  ;;  %v6545_v24 = vrot.slane %v4765_v48, 2  ;;  %v6546_v15 = vrot.slane %v4959_v30, 2  ;;  %v6549_v48 = vld [vmem:[#allocation14_spill] sm:$0xff] }
 0x167   : > { %6542 = vst [vmem:[#allocation56_spill] sm:$0xff] %v5126_v17  ;;  %v1499_v20 = vadd.f32 %v4982_v28, %v1439_v56  ;;  %v6548_v37 = vrot.slane %v6547_v9, 2  ;;  %v577_v54 = vadd.f32 %v5098_v1, %v3876_v25  ;;  %v5147_v34 = vadd.f32 %v5098_v1, %v3869_v13  ;;  %693 = vst [vmem:[#allocation2 + $0xc1] sm:$0xff] %v661_v41  ;;  %v6551_v28 = vld [vmem:[#allocation37_spill] sm:$0xff]  ;;  %v6553_v30 = vld [vmem:[#allocation15_spill] sm:$0xff] }
 0x168   : > { %v1392_v19 = vsel %vm839_vm3, %v6545_v24, %v6544_v8  ;;  %v659_v44 = vmin.f32 %v627_v16, 6.0  ;;  %v5150_v27 = vadd.f32 %v5098_v1, %v568_v18  ;;  %v1863_v7 = vadd.f32 %v6550_v11, %v6549_v48  ;;  %v6558_v56 = vld [vmem:[#allocation11_spill] sm:$0xff]  ;;  %v5199_v48 = vpop.f32.mrf.mxu1  ;;  %v6563_v43 = vld [vmem:[#allocation29_spill] sm:$0xff] }
 0x169   : > { %v1536_v6 = vsel %vm839_vm3, %v6548_v37, %v6546_v15  ;;  %v6552_v53 = vrot.slane %v6551_v28, 2  ;;  %v6554_v52 = vrot.slane %v6553_v30, 2  ;;  %v5161_v25 = vadd.f32 %v1392_v19, %v1352_v47  ;;  %v6560_v15 = vld [vmem:[#allocation44_spill] sm:$0xff] }
 0x16a   : > { %v5163_v2 = vadd.f32 %v1536_v6, %v1499_v20  ;;  %v637_v40 = vmax.f32 %v577_v54, 0.0  ;;  %691 = vst [vmem:[#allocation2 + $0xa9] sm:$0xff] %v659_v44  ;;  %v6555_v49 = vrot.slane %v4919_v14, 2  ;;  %v6557_v13 = vrot.slane %v6556_v10, 2  ;;  %v6559_v20 = vld [vmem:[#allocation43_spill] sm:$0xff] }
 0x16b   : > { %v1903_v12 = vsel %vm839_vm3, %v6554_v52, %v6552_v53  ;;  %v2947_v47 = vsel %vm450_vm0, %v6558_v56, 0  ;;  %v5178_v41 = vld [vmem:[#allocation2 + $0xe0] sm:$0xff]  ;;  %v1577_v16 = vld [vmem:[#allocation2 + $0xe8] sm:$0x3]  ;;  %v5181_v19 = vadd.f32 %v5098_v1, %v539_v23  ;;  %v5185_v14 = vadd.f32 %v6560_v15, %v6559_v20 }
 0x16c   : > { %v5167_v57 = vadd.f32 %v1903_v12, %v1863_v7  ;;  %v5174_v39 = vsel %vm839_vm3, %v6557_v13, %v6555_v49  ;;  %v1784_v8 = vld [vmem:[#allocation2 + $0xe8] sm:$0x3]  ;;  %v669_v24 = vmin.f32 %v637_v40, 6.0  ;;  %3887 = vmatpush3.bf16.msra.mxu1 %v2947_v47  ;;  %v5189_v9 = vadd.f32 %v4995_v62, %v5073_v29 }
 0x16d   : > { %v1604_v37 = vmul.f32 %v5178_v41, %v4326_v51  ;;  %v1605_v6 = vmul.f32 %v1577_v16, %v4326_v51  ;;  %v1664_v54 = vmul.f32 %v5090_v32, %v5178_v41  ;;  %v5197_v44 = vadd.f32 %v5098_v1, %v3877_v5 }
 0x16e   : > { %v5203_v11 = vmul.f32 %v5178_v41, %v4332_v58  ;;  %v1665_v62 = vmul.f32 %v5090_v32, %v1577_v16  ;;  %v1811_v29 = vmul.f32 %v5178_v41, %v4275_v55  ;;  %v1812_v7 = vmul.f32 %v1784_v8, %v4275_v55  ;;  %701 = vst [vmem:[#allocation2 + $0x121] sm:$0xff] %v669_v24  ;;  %v1426_v52 = vld [vmem:[#allocation2 + $0xc0] sm:$0xff]  ;;  %v5223_v16 = vpop.f32.mrf.mxu1 }
 0x16f   : > { %v1634_v28 = vrot.slane %v1604_v37, 1  ;;  %v1636_v53 = vrot.slane %v1605_v6, 1  ;;  %v1694_v30 = vrot.slane %v1664_v54, 2  ;;  %v1794_v5 = vmul.f32 %v5178_v41, %v4290_v0  ;;  %v4021_v6 = vld [vmem:[%s6431_s5 + $0x8] sm:$0xff]  }
 0x170   : > { %6561 = vst [vmem:[#allocation25_spill] sm:$0xff] %v5203_v11  ;;  %v1696_v12 = vrot.slane %v1665_v62, 2  ;;  %v1837_v23 = vrot.slane %v1811_v29, 1  ;;  %v1839_v40 = vrot.slane %v1812_v7, 1  ;;  %v1871_v49 = vmul.f32 %v5178_v41, %v4280_v59  ;;  %3932 = vmatprep.subr.bf16.mxu0 %v4021_v6 }
 0x171   : > { %v5214_v10 = vmul.f32 %v1426_v52, %v4304_v21  ;;  %v5217_v13 = vmul.f32 %v1426_v52, %v4310_v31  ;;  %v5220_v56 = vmul.f32 %v1426_v52, %v4323_v50  ;;  %v1872_v47 = vmul.f32 %v1784_v8, %v4280_v59  ;;  %v1930_v8 = vld [vmem:[#allocation2 + $0xe8] sm:$0x3]  ;;  %3933 = vmatpush3.bf16.msra.mxu0 %v4021_v6 }
 0x172   : > { %v5226_v24 = vmul.f32 %v1426_v52, %v4332_v58  ;;  %v5229_v20 = vmul.f32 %v1426_v52, %v4326_v51  ;;  %v5232_v15 = vmul.f32 %v5090_v32, %v1426_v52  ;;  %v5235_v37 = vmul.f32 %v1426_v52, %v4275_v55 }
 0x173   : > { %v5243_v62 = vmul.f32 %v1426_v52, %v4290_v0  ;;  %v5246_v29 = vmul.f32 %v1426_v52, %v4280_v59  ;;  %v6564_v17 = vrot.slane %v6563_v43, 1  ;;  %v5258_v22 = vsel %vm774_vm2, %v1634_v28, %v1636_v53  ;;  %v6567_v52 = vld [vmem:[#allocation30_spill] sm:$0xff]  ;;  %v5268_v43 = vpop.f32.mrf.mxu1 }
 0x174   : > { %6562 = vst [vmem:[#allocation14_spill] sm:$0xff] %v5226_v24  ;;  %6566 = vst [vmem:[#allocation37_spill] sm:$0xff] %v5258_v22  ;;  %v6568_v33 = vrot.slane %v6567_v52, 2  ;;  %v6571_v11 = vrot.slane %v6570_v26, 1  ;;  %v1897_v54 = vrot.slane %v1871_v49, 2  ;;  %v1899_v35 = vrot.slane %v1872_v47, 2 }
 0x175   : > { %v5254_v45 = vsel %vm774_vm2, %v6564_v17, %v1634_v28  ;;  %v1840_v17 = vsel %vm774_vm2, %v1837_v23, %v1839_v40  ;;  %v5273_v28 = vsel %vm839_vm3, %v1694_v30, %v1696_v12  ;;  %v1958_v26 = vmul.f32 %v1930_v8, %v4310_v31  ;;  %v1277_v52 = vld [vmem:[#allocation2 + $0xa8] sm:$0xff]  ;;  %v5289_v49 = vpop.f32.mrf.mxu1  ;;  %v6592_v24 = vld [vmem:[#allocation16_spill] sm:$0xff] }
 0x176   : > { %6565 = vst [vmem:[#allocation38_spill] sm:$0xff] %v5254_v45  ;;  %v5263_v7 = vsel %vm839_vm3, %v6568_v33, %v1694_v30  ;;  %v1838_v18 = vsel %vm774_vm2, %v6571_v11, %v1837_v23  ;;  %v6572_v45 = vld [vmem:[#allocation31_spill] sm:$0xff]  ;;  %6573 = vst [vmem:[#allocation17_spill] sm:$0xff] %v5273_v28  ;;  %v1862_v53 = vadd.f32 %v1840_v17, %v1794_v5  ;;  %v6574_v11 = vld [vmem:[#allocation33_spill] sm:$0xff] }
 0x177   : > { %6569 = vst [vmem:[#allocation15_spill] sm:$0xff] %v5263_v7  ;;  %v1861_v36 = vadd.f32 %v1838_v18, %v6572_v45  ;;  %v1957_v33 = vmul.f32 %v5178_v41, %v4310_v31  ;;  %v6575_v7 = vrot.slane %v6574_v11, 2  ;;  %v1900_v23 = vsel %vm839_vm3, %v1897_v54, %v1899_v35  ;;  %v6576_v35 = vld [vmem:[#allocation39_spill] sm:$0xff] }
 0x178   : > { %v2017_v45 = vmul.f32 %v5178_v41, %v4323_v50  ;;  %v2018_v18 = vmul.f32 %v1930_v8, %v4323_v50  ;;  %v1922_v30 = vadd.f32 %v1900_v23, %v1862_v53  ;;  %v5287_v5 = vmul.f32 %v5178_v41, %v4304_v21  ;;  %v6577_v28 = vld [vmem:[#allocation35_spill] sm:$0xff] }
 0x179   : > { %v1898_v6 = vsel %vm839_vm3, %v6575_v7, %v1897_v54  ;;  %v1981_v12 = vrot.slane %v1957_v33, 1  ;;  %v1983_v40 = vrot.slane %v1958_v26, 1  ;;  %v5292_v7 = vmul.f32 %v1277_v52, %v4275_v55  ;;  %v6579_v33 = vld [vmem:[#allocation36_spill] sm:$0xff] }
 0x17a   : > { %v1921_v47 = vadd.f32 %v1898_v6, %v1861_v36  ;;  %v2041_v17 = vrot.slane %v2017_v45, 2  ;;  %v2043_v11 = vrot.slane %v2018_v18, 2  ;;  %v1951_v54 = vadd.f32 %v6576_v35, %v1922_v30 }
 0x17b   : > { %v6578_v22 = vrot.slane %v6577_v28, 1  ;;  %v5301_v41 = vmul.f32 %v1277_v52, %v4290_v0  ;;  %v5304_v53 = vmul.f32 %v1277_v52, %v4280_v59  ;;  %v5307_v36 = vsel %vm774_vm2, %v1981_v12, %v1983_v40 }
 0x17c   : > { %v6580_v26 = vrot.slane %v6579_v33, 2  ;;  %v5315_v23 = vsel %vm839_vm3, %v2041_v17, %v2043_v11  ;;  %v5321_v18 = vmul.f32 %v1277_v52, %v4310_v31  ;;  %v5324_v30 = vmul.f32 %v1277_v52, %v4323_v50  ;;  %v1937_v33 = vld [vmem:[#allocation2 + $0x120] sm:$0xff] }
 0x17d   : > { %v5298_v8 = vsel %vm774_vm2, %v6578_v22, %v1981_v12  ;;  %v1433_v22 = vmul.f32 %v1277_v52, %v4304_v21  ;;  %v3884_v12 = vpop.f32.mrf.mxu1  ;;  %v1580_v35 = vmul.f32 %v1277_v52, %v4332_v58  ;;  %v5334_v11 = vmul.f32 %v5090_v32, %v1277_v52 }
 0x17e   : > { %v5312_v6 = vsel %vm839_vm3, %v6580_v26, %v2041_v17  ;;  %6581 = vst [vmem:[#allocation11_spill] sm:$0xff] %v5324_v30  ;;  %v5331_v17 = vmul.f32 %v1277_v52, %v4326_v51  ;;  %v5339_v28 = vmul.f32 %v1937_v33, %v4304_v21  ;;  %v5342_v42 = vmul.f32 %v1937_v33, %v4310_v31 }
 0x17f   : > { %v5327_v40 = vadd.f32 %v1433_v22, %v5161_v25  ;;  %6584 = vst [vmem:[#allocation29_spill] sm:$0xff] %v5334_v11  ;;  %v5345_v25 = vadd.f32 %v1580_v35, %v5163_v2  ;;  %v5350_v52 = vmul.f32 %v1937_v33, %v4323_v50  ;;  %v5354_v45 = vmul.f32 %v1937_v33, %v4332_v58  ;;  %v600_v2 = vpop.f32.mrf.mxu1 }
 0x180   : > { %6583 = vst [vmem:[#allocation44_spill] sm:$0xff] %v5331_v17  ;;  %6585 = vst [vmem:[#allocation30_spill] sm:$0xff] %v5339_v28  ;;  %v5357_v4 = vmul.f32 %v1937_v33, %v4326_v51  ;;  %v5360_v38 = vmul.f32 %v5090_v32, %v1937_v33  ;;  %v5363_v35 = vmul.f32 %v1937_v33, %v4290_v0  ;;  %v6590_v26 = vmax.f32 %v5147_v34, 0.0 }
 0x181   : > { %6582 = vst [vmem:[#allocation43_spill] sm:$0xff] %v5327_v40  ;;  %6586 = vst [vmem:[#allocation32_spill] sm:$0xff] %v5342_v42  ;;  %v5366_v63 = vmul.f32 %v1937_v33, %v4275_v55  ;;  %v5369_v22 = vmul.f32 %v1937_v33, %v4280_v59  ;;  %v6591_v11 = vmax.f32 %v5150_v27, 0.0  ;;  %v1950_v17 = vadd.f32 %v6592_v24, %v1921_v47  ;;  %v6593_v33 = vld [vmem:[#allocation42_spill] sm:$0xff]  ;;  %v3885_v47 = vpop.f32.mrf.mxu1  ;;  %v2850_v40 = vld [vmem:[%s4216_s23] sm:$0xff] }
 0x182   : > { %6587 = vst [vmem:[#allocation31_spill] sm:$0xff] %v5345_v25  ;;  %6588 = vst [vmem:[#allocation33_spill] sm:$0xff] %v5354_v45  ;;  %v662_v28 = vmin.f32 %v6590_v26, 6.0  ;;  %v628_v34 = vmax.f32 %v5181_v19, 0.0  ;;  %v5385_v45 = vadd.f32 %v5001_v61, %v5189_v9  ;;  %v638_v27 = vmax.f32 %v5197_v44, 0.0  ;;  %v6595_v44 = vld [vmem:[#allocation41_spill] sm:$0xff] }
 0x183   : > { %6589 = vst [vmem:[#allocation39_spill] sm:$0xff] %v5363_v35  ;;  %v667_v25 = vmin.f32 %v6591_v11, 6.0  ;;  %v2010_v26 = vadd.f32 %v6593_v33, %v1950_v17  ;;  %v572_v24 = vadd.f32 %v5098_v1, %v5159_v60  ;;  %v593_v19 = vadd.f32 %v5098_v1, %v5199_v48 }
 0x184   : > { %694 = vst [vmem:[#allocation2 + $0xc9] sm:$0xff] %v662_v28  ;;  %v660_v11 = vmin.f32 %v628_v34, 6.0  ;;  %v2011_v28 = vadd.f32 %v5070_v3, %v1951_v54  ;;  %v585_v17 = vadd.f32 %v5098_v1, %v5223_v16  ;;  %v670_v61 = vmin.f32 %v638_v27, 6.0  ;;  %v2851_v16 = vld [vmem:[%s4216_s23 + $0x8] sm:$0xff]  ;;  %v2852_v27 = vld [vmem:[%s4216_s23 + $0x10] sm:$0xff] }
 0x185   : > { %699 = vst [vmem:[#allocation2 + $0x109] sm:$0xff] %v667_v25  ;;  %v636_v9 = vmax.f32 %v572_v24, 0.0  ;;  %v6594_v25 = vld [vmem:[#allocation40_spill] sm:$0xff]  ;;  %v596_v60 = vadd.f32 %v5098_v1, %v5268_v43  ;;  %v5403_v34 = vadd.f32 %v5174_v39, %v2010_v26  ;;  %v641_v3 = vmax.f32 %v593_v19, 0.0  ;;  %v603_v39 = vpop.f32.mrf.mxu1 }
 0x186   : > { %v5397_v33 = vadd.f32 %v6595_v44, %v6594_v25  ;;  %692 = vst [vmem:[#allocation2 + $0xb1] sm:$0xff] %v660_v11  ;;  %v639_v54 = vmax.f32 %v585_v17, 0.0  ;;  %v5407_v48 = vadd.f32 %v5098_v1, %v5289_v49  ;;  %v2853_v24 = vld [vmem:[%s4216_s23 + $0x18] sm:$0xff]  ;;  %702 = vst [vmem:[#allocation2 + $0x129] sm:$0xff] %v670_v61  ;;  %v5413_v44 = vadd.f32 %v5112_v46, %v2011_v28 }
 0x187   : > { %v668_v25 = vmin.f32 %v636_v9, 6.0  ;;  %v642_v43 = vmax.f32 %v596_v60, 0.0  ;;  %v5416_v30 = vadd.f32 %v5098_v1, %v3884_v12  ;;  %v673_v26 = vmin.f32 %v641_v3, 6.0 }
 0x188   : > { %v671_v11 = vmin.f32 %v639_v54, 6.0  ;;  %v5420_v49 = vadd.f32 %v5098_v1, %v600_v2  ;;  %v5423_v46 = vadd.f32 %v5098_v1, %v3885_v47  ;;  %v2882_v28 = vpack.c.bf16 %v2851_v16, %v2850_v40 }
 0x189   : > { %700 = vst [vmem:[#allocation2 + $0x111] sm:$0xff] %v668_v25  ;;  %v674_v61 = vmin.f32 %v642_v43, 6.0  ;;  %v2883_v9 = vpack.c.bf16 %v2853_v24, %v2852_v27  ;;  %705 = vst [vmem:[#allocation2 + $0x151] sm:$0xff] %v673_v26  ;;  %v5429_v2 = vadd.f32 %v5098_v1, %v603_v39  ;;  %v6599_v19 = vrot.slane %v5217_v13, 1 }
 0x18a   : > { %6596 = vst [vmem:[#allocation35_spill] sm:$0xff] %v5420_v49  ;;  %6597 = vst [vmem:[#allocation36_spill] sm:$0xff] %v5423_v46  ;;  %3888 = vmatprep.mubr.msk.bf16.mxu1 %vm401_vm1, %v2882_v28  ;;  %v6601_v13 = vrot.slane %v5229_v20, 1 }
 0x18b   : > { %v1427_v17 = vld [vmem:[#allocation2 + $0xc8] sm:$0xff]  ;;  %v1428_v35 = vld [vmem:[#allocation2 + $0xd0] sm:$0x3]  ;;  %703 = vst [vmem:[#allocation2 + $0x139] sm:$0xff] %v671_v11  ;;  %6598 = vst [vmem:[#allocation16_spill] sm:$0xff] %v5429_v2  ;;  %3889 = vmatmul.mubr.msk.bf16.vlgmr.msra.gmra.mxu1 %vm401_vm1, %v2883_v9  ;;  %v6600_v9 = vrot.slane %v5220_v56, 2 }
 0x18c   : > { %v1574_v42 = vld [vmem:[#allocation2 + $0xd0] sm:$0x3]  ;;  %v1455_v12 = vmul.f32 %v1427_v17, %v4310_v31  ;;  %v1456_v60 = vmul.f32 %v1428_v35, %v4310_v31  ;;  %v1515_v3 = vmul.f32 %v1427_v17, %v4323_v50  ;;  %v5432_v54 = vmul.f32 %v1427_v17, %v4304_v21  ;;  %706 = vst [vmem:[#allocation2 + $0x159] sm:$0xff] %v674_v61 }
 0x18d   : > { %v1516_v25 = vmul.f32 %v1428_v35, %v4323_v50  ;;  %v1601_v47 = vmul.f32 %v1427_v17, %v4326_v51  ;;  %v1602_v40 = vmul.f32 %v1574_v42, %v4326_v51  ;;  %v1661_v43 = vmul.f32 %v5090_v32, %v1427_v17  ;;  %v1781_v35 = vld [vmem:[#allocation2 + $0xd0] sm:$0x3] }
 0x18e   : > { %v1485_v16 = vrot.slane %v1455_v12, 1  ;;  %v1487_v27 = vrot.slane %v1456_v60, 1  ;;  %v1545_v24 = vrot.slane %v1515_v3, 2  ;;  %v1662_v11 = vmul.f32 %v5090_v32, %v1574_v42 }
 0x18f   : > { %v1547_v1 = vrot.slane %v1516_v25, 2  ;;  %v1629_v39 = vrot.slane %v1601_v47, 1  ;;  %v1631_v26 = vrot.slane %v1602_v40, 1  ;;  %v5450_v28 = vmul.f32 %v1427_v17, %v4332_v58  ;;  %v1788_v25 = vld [vmem:[#allocation2 + $0x108] sm:$0xff] }
 0x190   : > { %v5444_v2 = vsel %vm774_vm2, %v6599_v19, %v1485_v16  ;;  %v5447_v61 = vsel %vm774_vm2, %v1485_v16, %v1487_v27  ;;  %v1689_v12 = vrot.slane %v1661_v43, 2  ;;  %v5455_v60 = vsel %vm839_vm3, %v6600_v9, %v1545_v24 }
 0x191   : > { %v5458_v42 = vsel %vm839_vm3, %v1545_v24, %v1547_v1  ;;  %v5463_v19 = vsel %vm774_vm2, %v6601_v13, %v1629_v39  ;;  %v1691_v3 = vrot.slane %v1662_v11, 2  ;;  %v5466_v47 = vsel %vm774_vm2, %v1629_v39, %v1631_v26 }
 0x192   : > { %6602 = vst [vmem:[#allocation42_spill] sm:$0xff] %v5463_v19  ;;  %6603 = vst [vmem:[#allocation40_spill] sm:$0xff] %v5466_v47  ;;  %v6604_v40 = vrot.slane %v5232_v15, 2  ;;  %v1808_v16 = vmul.f32 %v1427_v17, %v4275_v55  ;;  %v1809_v27 = vmul.f32 %v1781_v35, %v4275_v55  ;;  %v1792_v20 = vmul.f32 %v1427_v17, %v4290_v0  ;;  %v5504_v19 = vld [vmem:[#allocation2 + $0xb0] sm:$0xff] }
 0x193   : > { %v5476_v24 = vsel %vm839_vm3, %v1689_v12, %v1691_v3  ;;  %v1868_v43 = vmul.f32 %v1427_v17, %v4280_v59  ;;  %v1869_v1 = vmul.f32 %v1781_v35, %v4280_v59  ;;  %v5482_v15 = vmul.f32 %v1788_v25, %v4275_v55 }
 0x194   : > { %v5471_v56 = vsel %vm839_vm3, %v6604_v40, %v1689_v12  ;;  %6606 = vst [vmem:[#allocation58_spill] sm:$0xff] %v5476_v24  ;;  %v1832_v39 = vrot.slane %v1808_v16, 1  ;;  %v1834_v26 = vrot.slane %v1809_v27, 1  ;;  %v5485_v11 = vmul.f32 %v1788_v25, %v4280_v59 }
 0x195   : > { %6605 = vst [vmem:[#allocation41_spill] sm:$0xff] %v5471_v56  ;;  %v1892_v9 = vrot.slane %v1868_v43, 2  ;;  %v1894_v13 = vrot.slane %v1869_v1, 2  ;;  %v1944_v40 = vmul.f32 %v1788_v25, %v4304_v21  ;;  %v5489_v12 = vmul.f32 %v1788_v25, %v4310_v31 }
 0x196   : > { %v6607_v3 = vrot.slane %v5235_v37, 1  ;;  %v1835_v35 = vsel %vm774_vm2, %v1832_v39, %v1834_v26  ;;  %v5496_v16 = vmul.f32 %v1788_v25, %v4290_v0  ;;  %v6608_v1 = vrot.slane %v5246_v29, 2 }
 0x197   : > { %v1860_v43 = vadd.f32 %v1835_v35, %v1792_v20  ;;  %v1895_v37 = vsel %vm839_vm3, %v1892_v9, %v1894_v13  ;;  %v5511_v26 = vmul.f32 %v1788_v25, %v4323_v50  ;;  %v1279_v35 = vld [vmem:[#allocation2 + $0xb8] sm:$0x3]  ;;  %v1306_v13 = vmul.f32 %v5504_v19, %v4275_v55 }
 0x198   : > { %v1833_v17 = vsel %vm774_vm2, %v6607_v3, %v1832_v39  ;;  %v1893_v56 = vsel %vm839_vm3, %v6608_v1, %v1892_v9  ;;  %v5508_v39 = vadd.f32 %v1944_v40, %v5167_v57  ;;  %v2091_v3 = vmul.f32 %v1788_v25, %v4332_v58 }
 0x199   : > { %v1859_v24 = vadd.f32 %v1833_v17, %v5243_v62  ;;  %v1920_v20 = vadd.f32 %v1895_v37, %v1860_v43  ;;  %v5516_v17 = vmul.f32 %v1788_v25, %v4326_v51  ;;  %v5523_v57 = vmul.f32 %v5090_v32, %v1788_v25 }
 0x19a   : > { %v5520_v9 = vadd.f32 %v2091_v3, %v5403_v34  ;;  %v1287_v34 = vmul.f32 %v5504_v19, %v4290_v0  ;;  %v1307_v3 = vmul.f32 %v1279_v35, %v4275_v55  ;;  %v1336_v25 = vrot.slane %v1306_v13, 1 }
 0x19b   : > { %v1919_v62 = vadd.f32 %v1893_v56, %v1859_v24  ;;  %v4023_v56 = vld [vmem:[%s6431_s5] sm:$0xff]   ;;  %v6609_v24 = vld [vmem:[#allocation34_spill] sm:$0xff]  ;;  %v1949_v43 = vadd.f32 %v5287_v5, %v1920_v20  ;;  %v1366_v1 = vmul.f32 %v5504_v19, %v4280_v59  ;;  %v1367_v29 = vmul.f32 %v1279_v35, %v4280_v59 }
 0x19c   : > { %3934 = vmatprep.subr.bf16.mxu0 %v4023_v56  ;;  %v1434_v5 = vmul.f32 %v5504_v19, %v4304_v21  ;;  %v1452_v20 = vmul.f32 %v5504_v19, %v4310_v31  ;;  %v6610_v13 = vrot.slane %v5292_v7, 1  ;;  %v1338_v27 = vrot.slane %v1307_v3, 1 }
 0x19d   : > { %v1948_v40 = vadd.f32 %v6609_v24, %v1919_v62  ;;  %v2009_v62 = vadd.f32 %v5307_v36, %v1949_v43  ;;  %v1425_v24 = vld [vmem:[#allocation2 + $0xb8] sm:$0x3]  ;;  %3935 = vmatpush3.bf16.msra.mxu0 %v4023_v56  ;;  %v1396_v46 = vrot.slane %v1366_v1, 2  ;;  %v1398_v35 = vrot.slane %v1367_v29, 2 }
 0x19e   : > { %v1337_v37 = vsel %vm774_vm2, %v6610_v13, %v1336_v25  ;;  %v1339_v43 = vsel %vm774_vm2, %v1336_v25, %v1338_v27  ;;  %v6613_v56 = vrot.slane %v5304_v53, 2  ;;  %v1442_v3 = vadd.f32 %v1434_v5, %v5185_v14  ;;  %v1571_v5 = vld [vmem:[#allocation2 + $0xb8] sm:$0x3] }
 0x19f   : > { %v2008_v47 = vadd.f32 %v5298_v8, %v1948_v40  ;;  %v5552_v8 = vadd.f32 %v5315_v23, %v2009_v62  ;;  %v1354_v40 = vadd.f32 %v1337_v37, %v5301_v41  ;;  %v1453_v29 = vmul.f32 %v1425_v24, %v4310_v31 }
 0x1a0   : > { %v1397_v7 = vsel %vm839_vm3, %v6613_v56, %v1396_v46  ;;  %v1355_v1 = vadd.f32 %v1339_v43, %v1287_v34  ;;  %v1512_v23 = vmul.f32 %v5504_v19, %v4323_v50  ;;  %v1399_v62 = vsel %vm839_vm3, %v1396_v46, %v1398_v35 }
 0x1a1   : > { %v5549_v49 = vadd.f32 %v5312_v6, %v2008_v47  ;;  %6612 = vst [vmem:[#allocation59_spill] sm:$0xff] %v5552_v8  ;;  %v1414_v6 = vadd.f32 %v1397_v7, %v1354_v40  ;;  %v1480_v47 = vrot.slane %v1452_v20, 1  ;;  %v1482_v13 = vrot.slane %v1453_v29, 1  ;;  %v6615_v40 = vld [vmem:[#allocation43_spill] sm:$0xff] }
 0x1a2   : > { %v1513_v41 = vmul.f32 %v1425_v24, %v4323_v50  ;;  %v1598_v53 = vmul.f32 %v5504_v19, %v4326_v51  ;;  %v1415_v27 = vadd.f32 %v1399_v62, %v1355_v1  ;;  %v6614_v14 = vrot.slane %v5321_v18, 1 }
 0x1a3   : > { %6611 = vst [vmem:[#allocation34_spill] sm:$0xff] %v5549_v49  ;;  %v1443_v37 = vadd.f32 %v5214_v10, %v1414_v6  ;;  %v1540_v25 = vrot.slane %v1512_v23, 2  ;;  %v1483_v20 = vsel %vm774_vm2, %v1480_v47, %v1482_v13  ;;  %v1581_v24 = vmul.f32 %v5504_v19, %v4332_v58  ;;  %v6616_v10 = vld [vmem:[#allocation11_spill] sm:$0xff] }
 0x1a4   : > { %v1481_v34 = vsel %vm774_vm2, %v6614_v14, %v1480_v47  ;;  %v1542_v46 = vrot.slane %v1513_v41, 2  ;;  %v1444_v35 = vadd.f32 %v5432_v54, %v1415_v27  ;;  %v1502_v56 = vadd.f32 %v1483_v20, %v1442_v3  ;;  %v6619_v3 = vld [vmem:[#allocation44_spill] sm:$0xff] }
 0x1a5   : > { %v1501_v43 = vadd.f32 %v1481_v34, %v6615_v40  ;;  %v1503_v7 = vadd.f32 %v5444_v2, %v1443_v37  ;;  %v6617_v29 = vrot.slane %v6616_v10, 2  ;;  %v1599_v47 = vmul.f32 %v1571_v5, %v4326_v51  ;;  %v2085_v10 = vld [vmem:[#allocation2 + $0x130] sm:$0x3] }
 0x1a6   : > { %v1543_v1 = vsel %vm839_vm3, %v1540_v25, %v1542_v46  ;;  %v1624_v23 = vrot.slane %v1598_v53, 1  ;;  %v1504_v62 = vadd.f32 %v5447_v61, %v1444_v35  ;;  %v1589_v41 = vadd.f32 %v1581_v24, %v5385_v45  ;;  %v6622_v61 = vld [vmem:[#allocation14_spill] sm:$0xff]  ;;  %v6623_v45 = vld [vmem:[#allocation31_spill] sm:$0xff] }
 0x1a7   : > { %v1541_v18 = vsel %vm839_vm3, %v6617_v29, %v1540_v25  ;;  %v1562_v13 = vadd.f32 %v1543_v1, %v1502_v56  ;;  %v1658_v54 = vmul.f32 %v5090_v32, %v5504_v19  ;;  %v5588_v2 = vadd.f32 %v5455_v60, %v1503_v7  ;;  %v1939_v25 = vld [vmem:[#allocation2 + $0x130] sm:$0x3]  ;;  %v6625_v29 = vld [vmem:[#allocation29_spill] sm:$0xff] }
 0x1a8   : > { %v1561_v6 = vadd.f32 %v1541_v18, %v1501_v43  ;;  %v6620_v27 = vrot.slane %v6619_v3, 1  ;;  %v1626_v14 = vrot.slane %v1599_v47, 1  ;;  %v1659_v34 = vmul.f32 %v5090_v32, %v1571_v5  ;;  %v1938_v43 = vld [vmem:[#allocation2 + $0x128] sm:$0xff] }
 0x1a9   : > { %6618 = vst [vmem:[#allocation43_spill] sm:$0xff] %v5588_v2  ;;  %v5595_v53 = vadd.f32 %v5458_v42, %v1504_v62  ;;  %v1684_v19 = vrot.slane %v1658_v54, 2  ;;  %v5602_v60 = vadd.f32 %v5450_v28, %v1562_v13  ;;  %v1966_v35 = vmul.f32 %v1938_v43, %v4310_v31 }
 0x1aa   : > { %v1625_v37 = vsel %vm774_vm2, %v6620_v27, %v1624_v23  ;;  %v5598_v20 = vadd.f32 %v6622_v61, %v1561_v6  ;;  %v1627_v46 = vsel %vm774_vm2, %v1624_v23, %v1626_v14  ;;  %v1686_v24 = vrot.slane %v1659_v34, 2  ;;  %v2292_v14 = vld [vmem:[#allocation2 + $0x130] sm:$0x3]  ;;  %v6627_v34 = vld [vmem:[#allocation32_spill] sm:$0xff] }
 0x1ab   : > { %6621 = vst [vmem:[#allocation11_spill] sm:$0xff] %v5595_v53  ;;  %v1648_v40 = vadd.f32 %v1625_v37, %v6623_v45  ;;  %6624 = vst [vmem:[#allocation44_spill] sm:$0xff] %v5602_v60  ;;  %v1649_v5 = vadd.f32 %v1627_v46, %v1589_v41  ;;  %v5607_v56 = vmul.f32 %v1938_v43, %v4304_v21  ;;  %v6626_v18 = vrot.slane %v6625_v29, 2 }
 0x1ac   : > { %v1967_v42 = vmul.f32 %v1939_v25, %v4310_v31  ;;  %v5611_v7 = vmul.f32 %v1938_v43, %v4323_v50  ;;  %v1687_v1 = vsel %vm839_vm3, %v1684_v19, %v1686_v24  ;;  %v1996_v6 = vrot.slane %v1966_v35, 1 }
 0x1ad   : > { %v1685_v28 = vsel %vm839_vm3, %v6626_v18, %v1684_v19  ;;  %v2027_v47 = vmul.f32 %v1939_v25, %v4323_v50  ;;  %v5620_v62 = vadd.f32 %v1687_v1, %v1649_v5  ;;  %v5624_v3 = vmul.f32 %v1938_v43, %v4332_v58  ;;  %v1789_v1 = vld [vmem:[#allocation2 + $0x110] sm:$0xff] }
 0x1ae   : > { %v5618_v23 = vadd.f32 %v1685_v28, %v1648_v40  ;;  %v1998_v13 = vrot.slane %v1967_v42, 1  ;;  %v6451_v41 = vrot.slane %v5611_v7, 2  ;;  %v2112_v27 = vmul.f32 %v1938_v43, %v4326_v51 }
 0x1af   : > { %v2058_v54 = vrot.slane %v2027_v47, 2  ;;  %v2113_v37 = vmul.f32 %v2085_v10, %v4326_v51  ;;  %v6628_v61 = vrot.slane %v6627_v34, 1  ;;  %v2172_v40 = vmul.f32 %v5090_v32, %v1938_v43 }
 0x1b0   : > { %v5634_v45 = vsel %vm774_vm2, %v1996_v6, %v1998_v13  ;;  %v2173_v19 = vmul.f32 %v5090_v32, %v2085_v10  ;;  %v2140_v46 = vrot.slane %v2112_v27, 1  ;;  %v2303_v35 = vmul.f32 %v1938_v43, %v4290_v0 }
 0x1b1   : > { %v5631_v25 = vsel %vm774_vm2, %v6628_v61, %v1996_v6  ;;  %v2142_v24 = vrot.slane %v2113_v37, 1  ;;  %v2319_v5 = vmul.f32 %v1938_v43, %v4275_v55  ;;  %v2200_v42 = vrot.slane %v2172_v40, 2  ;;  %v1790_v37 = vld [vmem:[#allocation2 + $0x118] sm:$0x3] }
 0x1b2   : > { %v2202_v29 = vrot.slane %v2173_v19, 2  ;;  %v2320_v18 = vmul.f32 %v2292_v14, %v4275_v55  ;;  %v5642_v28 = vmul.f32 %v1938_v43, %v4280_v59  ;;  %v5647_v6 = vsel %vm839_vm3, %v6451_v41, %v2058_v54 }
 0x1b3   : > { %v6629_v10 = vrot.slane %v5357_v4, 1  ;;  %v2343_v13 = vrot.slane %v2319_v5, 1  ;;  %v2380_v27 = vmul.f32 %v2292_v14, %v4280_v59  ;;  %v5656_v34 = vsel %vm774_vm2, %v2140_v46, %v2142_v24 }
 0x1b4   : > { %6631 = vst [vmem:[#allocation31_spill] sm:$0xff] %v5656_v34  ;;  %v6632_v43 = vrot.slane %v5360_v38, 2  ;;  %v5664_v54 = vsel %vm839_vm3, %v2200_v42, %v2202_v29  ;;  %v2345_v40 = vrot.slane %v2320_v18, 1  ;;  %v6635_v4 = vrot.slane %v5366_v63, 1  ;;  %v1936_v29 = vld [vmem:[#allocation2 + $0x118] sm:$0x3] }
 0x1b5   : > { %v5652_v47 = vsel %vm774_vm2, %v6629_v10, %v2140_v46  ;;  %6634 = vst [vmem:[#allocation32_spill] sm:$0xff] %v5664_v54  ;;  %v2405_v5 = vrot.slane %v2380_v27, 2  ;;  %v1817_v46 = vmul.f32 %v1789_v1, %v4275_v55  ;;  %v1818_v38 = vmul.f32 %v1790_v37, %v4275_v55 }
 0x1b6   : > { %6630 = vst [vmem:[#allocation14_spill] sm:$0xff] %v5652_v47  ;;  %v5661_v61 = vsel %vm839_vm3, %v6632_v43, %v2200_v42  ;;  %v5669_v19 = vsel %vm774_vm2, %v6635_v4, %v2343_v13  ;;  %v2346_v24 = vsel %vm774_vm2, %v2343_v13, %v2345_v40  ;;  %v1877_v10 = vmul.f32 %v1789_v1, %v4280_v59 }
 0x1b7   : > { %6633 = vst [vmem:[#allocation29_spill] sm:$0xff] %v5661_v61  ;;  %v1878_v42 = vmul.f32 %v1790_v37, %v4280_v59  ;;  %v5677_v18 = vadd.f32 %v2346_v24, %v2303_v35  ;;  %v1798_v63 = vmul.f32 %v1789_v1, %v4290_v0  ;;  %v1847_v43 = vrot.slane %v1817_v46, 1 }
 0x1b8   : > { %v1945_v4 = vmul.f32 %v1789_v1, %v4304_v21  ;;  %v1849_v41 = vrot.slane %v1818_v38, 1  ;;  %v1907_v27 = vrot.slane %v1877_v10, 2  ;;  %v1963_v14 = vmul.f32 %v1789_v1, %v4310_v31 }
 0x1b9   : > { %v1909_v36 = vrot.slane %v1878_v42, 2  ;;  %v6636_v13 = vrot.slane %v5482_v15, 1  ;;  %v1964_v37 = vmul.f32 %v1936_v29, %v4310_v31  ;;  %v2023_v35 = vmul.f32 %v1789_v1, %v4323_v50 }
 0x1ba   : > { %v1953_v54 = vadd.f32 %v1945_v4, %v5397_v33  ;;  %v1850_v24 = vsel %vm774_vm2, %v1847_v43, %v1849_v41  ;;  %v6637_v38 = vrot.slane %v5485_v11, 2  ;;  %v1991_v15 = vrot.slane %v1963_v14, 1  ;;  %v2082_v41 = vld [vmem:[#allocation2 + $0x118] sm:$0x3] }
 0x1bb   : > { %v1848_v40 = vsel %vm774_vm2, %v6636_v13, %v1847_v43  ;;  %v1910_v42 = vsel %vm839_vm3, %v1907_v27, %v1909_v36  ;;  %v1866_v61 = vadd.f32 %v1850_v24, %v1798_v63  ;;  %v1993_v34 = vrot.slane %v1964_v37, 1  ;;  %v2296_v24 = vld [vmem:[#allocation2 + $0x150] sm:$0xff] }
 0x1bc   : > { %v1865_v46 = vadd.f32 %v1848_v40, %v5496_v16  ;;  %v1908_v10 = vsel %vm839_vm3, %v6637_v38, %v1907_v27  ;;  %v2024_v13 = vmul.f32 %v1936_v29, %v4323_v50  ;;  %v6638_v33 = vrot.slane %v5642_v28, 2 }
 0x1bd   : > { %v2051_v47 = vrot.slane %v2023_v35, 2  ;;  %v2092_v16 = vmul.f32 %v1789_v1, %v4332_v58  ;;  %v2109_v11 = vmul.f32 %v1789_v1, %v4326_v51  ;;  %v1926_v43 = vadd.f32 %v1910_v42, %v1866_v61 }
 0x1be   : > { %v5698_v4 = vsel %vm839_vm3, %v6638_v33, %v2405_v5  ;;  %v6639_v40 = vrot.slane %v5489_v12, 1  ;;  %v1994_v14 = vsel %vm774_vm2, %v1991_v15, %v1993_v34  ;;  %v2053_v63 = vrot.slane %v2024_v13, 2 }
 0x1bf   : > { %v1925_v29 = vadd.f32 %v1908_v10, %v1865_v46  ;;  %v2013_v37 = vadd.f32 %v1994_v14, %v1953_v54  ;;  %v6640_v5 = vrot.slane %v5511_v26, 2  ;;  %v2100_v61 = vadd.f32 %v2092_v16, %v5413_v44  ;;  %v6642_v44 = vld [vmem:[#allocation33_spill] sm:$0xff] }
 0x1c0   : > { %v1992_v36 = vsel %vm774_vm2, %v6639_v40, %v1991_v15  ;;  %v2054_v38 = vsel %vm839_vm3, %v2051_v47, %v2053_v63  ;;  %v2110_v12 = vmul.f32 %v2082_v41, %v4326_v51  ;;  %v2135_v42 = vrot.slane %v2109_v11, 1 }
 0x1c1   : > { %v2012_v27 = vadd.f32 %v1992_v36, %v5508_v39  ;;  %v2052_v35 = vsel %vm839_vm3, %v6640_v5, %v2051_v47  ;;  %v2073_v40 = vadd.f32 %v2054_v38, %v2013_v37  ;;  %v2169_v34 = vmul.f32 %v5090_v32, %v1789_v1 }
 0x1c2   : > { %v2170_v46 = vmul.f32 %v5090_v32, %v2082_v41  ;;  %v5716_v39 = vadd.f32 %v5607_v56, %v1926_v43  ;;  %v6641_v26 = vrot.slane %v5516_v17, 1  ;;  %v2137_v10 = vrot.slane %v2110_v12, 1  ;;  %v2086_v12 = vld [vmem:[#allocation2 + $0x138] sm:$0xff] }
 0x1c3   : > { %v2072_v33 = vadd.f32 %v2052_v35, %v2012_v27  ;;  %v5722_v47 = vmul.f32 %v2296_v24, %v4275_v55  ;;  %v2195_v16 = vrot.slane %v2169_v34, 2  ;;  %v5729_v1 = vmul.f32 %v2296_v24, %v4290_v0  ;;  %v6648_v34 = vld [vmem:[#allocation30_spill] sm:$0xff] }
 0x1c4   : > { %v2136_v54 = vsel %vm774_vm2, %v6641_v26, %v2135_v42  ;;  %v5732_v56 = vadd.f32 %v5624_v3, %v2073_v40  ;;  %v2138_v17 = vsel %vm774_vm2, %v2135_v42, %v2137_v10  ;;  %v2197_v41 = vrot.slane %v2170_v46, 2 }
 0x1c5   : > { %v5725_v15 = vadd.f32 %v6642_v44, %v2072_v33  ;;  %v2159_v13 = vadd.f32 %v2136_v54, %v5520_v9  ;;  %v5736_v11 = vmul.f32 %v2296_v24, %v4280_v59  ;;  %v2160_v43 = vadd.f32 %v2138_v17, %v2100_v61 }
 0x1c6   : > { %6644 = vst [vmem:[#allocation60_spill] sm:$0xff] %v5732_v56  ;;  %v6645_v36 = vrot.slane %v5523_v57, 2  ;;  %v2352_v9 = vrot.slane %v5722_v47, 1  ;;  %v5743_v63 = vmul.f32 %v2296_v24, %v4310_v31  ;;  %v2198_v27 = vsel %vm839_vm3, %v2195_v16, %v2197_v41  ;;  %v6651_v41 = vld [vmem:[#allocation39_spill] sm:$0xff] }
 0x1c7   : > { %6643 = vst [vmem:[#allocation33_spill] sm:$0xff] %v5725_v15  ;;  %v5749_v37 = vmul.f32 %v2296_v24, %v4304_v21  ;;  %v5752_v5 = vmul.f32 %v2296_v24, %v4323_v50  ;;  %v5754_v35 = vadd.f32 %v2198_v27, %v2160_v43  ;;  %v5759_v61 = vmul.f32 %v2296_v24, %v4326_v51 }
 0x1c8   : > { %v2196_v14 = vsel %vm839_vm3, %v6645_v36, %v2195_v16  ;;  %v2496_v38 = vrot.slane %v5743_v63, 1  ;;  %v5763_v33 = vmul.f32 %v2296_v24, %v4332_v58  ;;  %v5766_v40 = vmul.f32 %v5090_v32, %v2296_v24  ;;  %v2297_v36 = vld [vmem:[#allocation2 + $0x158] sm:$0xff] }
 0x1c9   : > { %v5746_v3 = vadd.f32 %v2196_v14, %v2159_v13  ;;  %6647 = vst [vmem:[#allocation62_spill] sm:$0xff] %v5754_v35  ;;  %v1954_v46 = vadd.f32 %v6648_v34, %v1925_v29  ;;  %v6649_v54 = vrot.slane %v5611_v7, 2  ;;  %v6650_v10 = vrot.slane %v5350_v52, 2  ;;  %v2298_v14 = vld [vmem:[#allocation2 + $0x160] sm:$0x3] }
 0x1ca   : > { %v5776_v44 = vmul.f32 %v2086_v12, %v4326_v51  ;;  %v5779_v13 = vmul.f32 %v5090_v32, %v2086_v12  ;;  %v2095_v29 = vmul.f32 %v2086_v12, %v4332_v58  ;;  %v5785_v17 = vmul.f32 %v2086_v12, %v4275_v55 }
 0x1cb   : > { %6646 = vst [vmem:[#allocation61_spill] sm:$0xff] %v5746_v3  ;;  %v2057_v47 = vsel %vm839_vm3, %v6650_v10, %v6649_v54  ;;  %v2014_v24 = vadd.f32 %v5631_v25, %v1954_v46  ;;  %v5789_v52 = vmul.f32 %v2086_v12, %v4290_v0  ;;  %v2370_v43 = vadd.f32 %v5669_v19, %v6651_v41 }
 0x1cc   : > { %v5794_v32 = vmul.f32 %v2086_v12, %v4280_v59  ;;  %v6652_v27 = vrot.slane %v5642_v28, 2  ;;  %v6653_v34 = vrot.slane %v5369_v22, 2  ;;  %v2451_v54 = vmul.f32 %v2086_v12, %v4304_v21 }
 0x1cd   : > { %v2074_v63 = vadd.f32 %v2057_v47, %v2014_v24  ;;  %v5805_v19 = vmul.f32 %v2086_v12, %v4310_v31  ;;  %v5808_v41 = vmul.f32 %v2086_v12, %v4323_v50  ;;  %v2325_v28 = vmul.f32 %v2297_v36, %v4275_v55  ;;  %v2590_v12 = vld [vmem:[#allocation2 + $0x160] sm:$0x3] }
 0x1ce   : > { %v2404_v46 = vsel %vm839_vm3, %v6653_v34, %v6652_v27  ;;  %v2326_v22 = vmul.f32 %v2298_v14, %v4275_v55  ;;  %v2444_v27 = vld [vmem:[#allocation2 + $0x160] sm:$0x3]  ;;  %v2471_v42 = vmul.f32 %v2297_v36, %v4310_v31  ;;  %v5827_v16 = vmul.f32 %v2297_v36, %v4304_v21 }
 0x1cf   : > { %v2430_v7 = vadd.f32 %v2404_v46, %v2370_v43  ;;  %v5810_v47 = vadd.f32 %v2095_v29, %v2074_v63  ;;  %v2307_v43 = vmul.f32 %v2297_v36, %v4290_v0  ;;  %v2385_v46 = vmul.f32 %v2297_v36, %v4280_v59 }
 0x1d0   : > { %v2353_v25 = vrot.slane %v2325_v28, 1  ;;  %v2355_v29 = vrot.slane %v2326_v22, 1  ;;  %v2386_v63 = vmul.f32 %v2298_v14, %v4280_v59  ;;  %v2472_v57 = vmul.f32 %v2444_v27, %v4310_v31 }
 0x1d1   : > { %v5815_v34 = vadd.f32 %v2451_v54, %v2430_v7  ;;  %v2413_v24 = vrot.slane %v2385_v46, 2  ;;  %v2531_v7 = vmul.f32 %v2297_v36, %v4323_v50  ;;  %v2532_v26 = vmul.f32 %v2444_v27, %v4323_v50 }
 0x1d2   : > { %v2356_v54 = vsel %vm774_vm2, %v2353_v25, %v2355_v29  ;;  %v2415_v10 = vrot.slane %v2386_v63, 2  ;;  %v2354_v28 = vsel %vm774_vm2, %v2352_v9, %v2353_v25  ;;  %v2497_v22 = vrot.slane %v2471_v42, 1  ;;  %v5843_v9 = vld [vmem:[%s6429_s3 + $0x8] ss:$0 sm:$0xff] }
 0x1d3   : > { %v2499_v14 = vrot.slane %v2472_v57, 1  ;;  %v2557_v46 = vrot.slane %v2531_v7, 2  ;;  %v2375_v56 = vadd.f32 %v2356_v54, %v2307_v43  ;;  %v2559_v35 = vrot.slane %v2532_v26, 2 }
 0x1d4   : > { %v2416_v15 = vsel %vm839_vm3, %v2413_v24, %v2415_v10  ;;  %v2617_v3 = vmul.f32 %v2297_v36, %v4326_v51  ;;  %v5834_v29 = vsel %vm774_vm2, %v2496_v38, %v2497_v22  ;;  %v5837_v63 = vmul.f32 %v2297_v36, %v4332_v58 }
 0x1d5   : > { %v2618_v27 = vmul.f32 %v2590_v12, %v4326_v51  ;;  %v2677_v57 = vmul.f32 %v5843_v9, %v2297_v36  ;;  %v5847_v42 = vsel %vm774_vm2, %v2497_v22, %v2499_v14  ;;  %v2678_v38 = vmul.f32 %v5843_v9, %v2590_v12  ;;  %v6655_v12 = vld [vmem:[#allocation35_spill] sm:$0xff] }
 0x1d6   : > { %v2641_v26 = vrot.slane %v2617_v3, 1  ;;  %v6654_v25 = vmax.f32 %v5407_v48, 0.0  ;;  %v5853_v43 = vsel %vm839_vm3, %v2557_v46, %v2559_v35  ;;  %v2015_v8 = vadd.f32 %v5634_v45, %v5716_v39 }
 0x1d7   : > { %v2643_v7 = vrot.slane %v2618_v27, 1  ;;  %v2701_v54 = vrot.slane %v2677_v57, 2  ;;  %v2703_v36 = vrot.slane %v2678_v38, 2  ;;  %v5859_v3 = vadd.f32 %v5698_v4, %v5677_v18  ;;  %v2854_v4 = vld [vmem:[%s4216_s23 + $0x20] sm:$0xff] }
 0x1d8   : > { %v672_v10 = vmin.f32 %v6654_v25, 6.0  ;;  %v645_v48 = vmax.f32 %v5416_v30, 0.0  ;;  %v643_v22 = vmax.f32 %v6655_v12, 0.0  ;;  %v6656_v35 = vrot.slane %v5759_v61, 1 }
 0x1d9   : > { %v5869_v45 = vsel %vm774_vm2, %v2641_v26, %v2643_v7  ;;  %v6659_v39 = vrot.slane %v5766_v40, 2  ;;  %v2374_v18 = vadd.f32 %v2354_v28, %v5729_v1  ;;  %v2075_v30 = vadd.f32 %v5647_v6, %v2015_v8  ;;  %v2857_v40 = vld [vmem:[%s4216_s23 + $0x38] sm:$0xff] }
 0x1da   : > { %704 = vst [vmem:[#allocation2 + $0x141] sm:$0xff] %v672_v10  ;;  %v5866_v14 = vsel %vm774_vm2, %v6656_v35, %v2641_v26  ;;  %6658 = vst [vmem:[#allocation39_spill] sm:$0xff] %v5869_v45  ;;  %v677_v57 = vmin.f32 %v645_v48, 6.0  ;;  %v675_v38 = vmin.f32 %v643_v22, 6.0  ;;  %v6661_v61 = vrot.slane %v5736_v11, 2  ;;  %v2855_v26 = vld [vmem:[%s4216_s23 + $0x28] sm:$0xff] }
 0x1db   : > { %6657 = vst [vmem:[#allocation30_spill] sm:$0xff] %v5866_v14  ;;  %v5874_v27 = vsel %vm839_vm3, %v6659_v39, %v2701_v54  ;;  %v2856_v10 = vld [vmem:[%s4216_s23 + $0x30] sm:$0xff]  ;;  %v5886_v7 = vsel %vm839_vm3, %v2701_v54, %v2703_v36  ;;  %v6663_v1 = vld [vmem:[#allocation36_spill] sm:$0xff]  ;;  %v2858_v48 = vld [vmem:[%s4216_s23 + $0x40] sm:$0xff]  ;;  %v6665_v11 = vrot.slane %v5752_v5, 2  ;;  %v2884_v45 = vpack.c.bf16 %v2855_v26, %v2854_v4 }
 0x1dc   : > { %6660 = vst [vmem:[#allocation35_spill] sm:$0xff] %v5874_v27  ;;  %v2414_v25 = vsel %vm839_vm3, %v6661_v61, %v2413_v24  ;;  %6662 = vst [vmem:[#allocation63_spill] sm:$0xff] %v5886_v7  ;;  %v646_v28 = vmax.f32 %v6663_v1, 0.0  ;;  %v6664_v8 = vld [vmem:[#allocation16_spill] sm:$0xff]  ;;  %v6667_v35 = vld [vmem:[#allocation7_spill] sm:$0xff]  ;;  %v2885_v5 = vpack.c.bf16 %v2857_v40, %v2856_v10  ;;  %v5909_v14 = vadd.f32 %v2416_v15, %v2375_v56 }
 0x1dd   : > { %v5888_v12 = vadd.f32 %v2414_v25, %v2374_v18  ;;  %v644_v6 = vmax.f32 %v6664_v8, 0.0  ;;  %709 = vst [vmem:[#allocation2 + $0x181] sm:$0xff] %v677_v57  ;;  %707 = vst [vmem:[#allocation2 + $0x169] sm:$0xff] %v675_v38  ;;  %v5896_v24 = vsel %vm839_vm3, %v6665_v11, %v2557_v46  ;;  %v6666_v22 = vld [vmem:[#allocation12_spill] sm:$0xff]  ;;  %v6668_v61 = vld [vmem:[#allocation13_spill] sm:$0xff]  ;;  %3892 = vmatprep.mubr.msk.bf16.mxu1 %vm401_vm1, %v2884_v45  ;;  %v6680_v2 = vrot.slane %v5779_v13, 2 }
 0x1de   : > { %v1125_v39 = vadd.f32 %v6667_v35, %v6666_v22  ;;  %v6669_v54 = vld [vmem:[#allocation8_spill] sm:$0xff]  ;;  %v6670_v18 = vld [vmem:[#allocation26_spill] sm:$0xff]  ;;  %v6671_v25 = vld [vmem:[#allocation27_spill] sm:$0xff]  ;;  %v678_v57 = vmin.f32 %v646_v28, 6.0  ;;  %3893 = vmatmul.mubr.msk.bf16.gmra.mxu1 %vm401_vm1, %v2885_v5  ;;  %v6679_v5 = vrot.slane %v5776_v44, 1 }
 0x1df   : > { %v1126_v36 = vadd.f32 %v6669_v54, %v6668_v61  ;;  %v3707_v7 = vpack.c.bf16 %v6671_v25, %v6670_v18  ;;  %v2859_v1 = vld [vmem:[%s4216_s23 + $0x48] sm:$0xff]  ;;  %v5906_v27 = vld [vmem:[%s4216_s23 + $0x50] sm:$0xff]  ;;  %v2861_v8 = vld [vmem:[%s4216_s23 + $0x58] sm:$0xff]  ;;  %v676_v38 = vmin.f32 %v644_v6, 6.0 }
 0x1e0   : > { %v6672_v46 = vld [vmem:[#allocation9_spill] sm:$0xff]  ;;  %v6673_v22 = vld [vmem:[#allocation10_spill] sm:$0xff]  ;;  %v6674_v61 = vld [vmem:[#allocation23_spill] sm:$0xff]  ;;  %710 = vst [vmem:[#allocation2 + $0x189] sm:$0xff] %v678_v57  ;;  %v2887_v28 = vpack.c.bf16 %v2861_v8, %v5906_v27 }
 0x1e1   : > { %v5912_v11 = vadd.f32 %v6672_v46, %v1125_v39  ;;  %v5915_v35 = vadd.f32 %v6673_v22, %v1126_v36  ;;  %3779 = vst [vmem:[#allocation3 + $0x8] sm:$0xff] %v3707_v7   ;;  %v6675_v54 = vld [vmem:[#allocation19_spill] sm:$0xff]  ;;  %v2087_v25 = vld [vmem:[#allocation2 + $0x140] sm:$0xff]  ;;  %v2088_v49 = vld [vmem:[#allocation2 + $0x148] sm:$0x3]  ;;  %v2886_v7 = vpack.c.bf16 %v2859_v1, %v2858_v48 }
 0x1e2   : > { %v5919_v18 = vadd.f32 %v6675_v54, %v6674_v61  ;;  %v2295_v53 = vld [vmem:[#allocation2 + $0x148] sm:$0x3]  ;;  %708 = vst [vmem:[#allocation2 + $0x171] sm:$0xff] %v676_v38  ;;  %v6676_v15 = vld [vmem:[#allocation24_spill] sm:$0xff]  ;;  %v5929_v26 = vld [vmem:[%s6430_s4] ss:$0 sm:$0xff]  ;;  %v2096_v6 = vmul.f32 %v2087_v25, %v4332_v58  ;;  %v2115_v45 = vmul.f32 %v2087_v25, %v4326_v51  ;;  %v2116_v39 = vmul.f32 %v2088_v49, %v4326_v51 }
 0x1e3   : > { %v6677_v56 = vld [vmem:[#allocation20_spill] sm:$0xff]  ;;  %v6678_v10 = vld [vmem:[#allocation49_spill] sm:$0xff]  ;;  %v2175_v36 = vmul.f32 %v5843_v9, %v2087_v25  ;;  %v2176_v57 = vmul.f32 %v5843_v9, %v2088_v49  ;;  %v2305_v38 = vmul.f32 %v2087_v25, %v4290_v0  ;;  %v2322_v46 = vmul.f32 %v2087_v25, %v4275_v55  ;;  %3896 = vmatprep.mubr.msk.bf16.mxu1 %vm401_vm1, %v2886_v7  ;;  %v2441_v44 = vld [vmem:[#allocation2 + $0x148] sm:$0x3] }
 0x1e4   : > { %v5924_v4 = vadd.f32 %v6677_v56, %v6676_v15  ;;  %v5933_v40 = vadd.f32 %v5929_v26, %v6678_v10  ;;  %v2323_v48 = vmul.f32 %v2295_v53, %v4275_v55  ;;  %v2104_v27 = vadd.f32 %v2096_v6, %v2075_v30 }
 0x1e5   : > { %v2145_v1 = vrot.slane %v2115_v45, 1  ;;  %v2147_v8 = vrot.slane %v2116_v39, 1  ;;  %v2205_v22 = vrot.slane %v2175_v36, 2  ;;  %v2207_v61 = vrot.slane %v2176_v57, 2 }
 0x1e6   : > { %v2348_v54 = vrot.slane %v2322_v46, 1  ;;  %v2350_v15 = vrot.slane %v2323_v48, 1  ;;  %v2382_v56 = vmul.f32 %v2087_v25, %v4280_v59  ;;  %v2383_v30 = vmul.f32 %v2295_v53, %v4280_v59  ;;  %3897 = vmatmul.mubr.msk.bf16.gmra.mxu1 %vm401_vm1, %v2887_v28 }
 0x1e7   : > { %v2146_v49 = vsel %vm774_vm2, %v6679_v5, %v2145_v1  ;;  %v2148_v10 = vsel %vm774_vm2, %v2145_v1, %v2147_v8  ;;  %v2206_v60 = vsel %vm839_vm3, %v6680_v2, %v2205_v22  ;;  %v2208_v45 = vsel %vm839_vm3, %v2205_v22, %v2207_v61 }
 0x1e8   : > { %v2163_v7 = vadd.f32 %v2146_v49, %v5810_v47  ;;  %v2164_v6 = vadd.f32 %v2148_v10, %v2104_v27  ;;  %v6681_v39 = vrot.slane %v5785_v17, 1  ;;  %v2351_v57 = vsel %vm774_vm2, %v2348_v54, %v2350_v15  ;;  %v6682_v47 = vld [vmem:[#allocation50_spill] sm:$0xff] }
 0x1e9   : > { %v2408_v48 = vrot.slane %v2382_v56, 2  ;;  %v2410_v13 = vrot.slane %v2383_v30, 2  ;;  %v2373_v2 = vadd.f32 %v2351_v57, %v2305_v38  ;;  %v2452_v53 = vmul.f32 %v2087_v25, %v4304_v21 }
 0x1ea   : > { %v2349_v36 = vsel %vm774_vm2, %v6681_v39, %v2348_v54  ;;  %v5962_v1 = vadd.f32 %v2206_v60, %v2163_v7  ;;  %v5967_v27 = vadd.f32 %v5929_v26, %v6682_v47  ;;  %v6683_v17 = vrot.slane %v5794_v32, 2  ;;  %v2448_v54 = vld [vmem:[#allocation2 + $0x180] sm:$0xff] }
 0x1eb   : > { %v2372_v46 = vadd.f32 %v2349_v36, %v5789_v52  ;;  %v2411_v22 = vsel %vm839_vm3, %v2408_v48, %v2410_v13  ;;  %v2468_v61 = vmul.f32 %v2087_v25, %v4310_v31  ;;  %v2469_v52 = vmul.f32 %v2441_v44, %v4310_v31 }
 0x1ec   : > { %v2409_v8 = vsel %vm839_vm3, %v6683_v17, %v2408_v48  ;;  %v5976_v60 = vadd.f32 %v2208_v45, %v2164_v6  ;;  %v2433_v38 = vadd.f32 %v2411_v22, %v2373_v2  ;;  %v2460_v15 = vadd.f32 %v2452_v53, %v5859_v3 }
 0x1ed   : > { %v2528_v56 = vmul.f32 %v2087_v25, %v4323_v50  ;;  %v2432_v5 = vadd.f32 %v2409_v8, %v2372_v46  ;;  %v2492_v32 = vrot.slane %v2468_v61, 1  ;;  %v2494_v49 = vrot.slane %v2469_v52, 1 }
 0x1ee   : > { %v2529_v10 = vmul.f32 %v2441_v44, %v4323_v50  ;;  %v5982_v7 = vmul.f32 %v2448_v54, %v4304_v21  ;;  %v2476_v39 = vmul.f32 %v2448_v54, %v4310_v31  ;;  %v5986_v28 = vmul.f32 %v2448_v54, %v4323_v50  ;;  %v2299_v44 = vld [vmem:[#allocation2 + $0x168] sm:$0xff] }
 0x1ef   : > { %v2552_v30 = vrot.slane %v2528_v56, 2  ;;  %v5989_v6 = vadd.f32 %v5827_v16, %v2433_v38  ;;  %v6684_v3 = vrot.slane %v5805_v19, 1  ;;  %v2495_v45 = vsel %vm774_vm2, %v2492_v32, %v2494_v49  ;;  %v2449_v49 = vld [vmem:[#allocation2 + $0x188] sm:$0xff] }
 0x1f0   : > { %v2554_v36 = vrot.slane %v2529_v10, 2  ;;  %v2520_v46 = vadd.f32 %v2495_v45, %v2460_v15  ;;  %v6685_v48 = vrot.slane %v5808_v41, 2  ;;  %v6000_v2 = vmul.f32 %v2448_v54, %v4332_v58  ;;  %v2301_v45 = vld [vmem:[#allocation2 + $0x178] sm:$0x3] }
 0x1f1   : > { %v2493_v25 = vsel %vm774_vm2, %v6684_v3, %v2492_v32  ;;  %v2506_v53 = vrot.slane %v2476_v39, 1  ;;  %v2622_v19 = vmul.f32 %v2448_v54, %v4326_v51  ;;  %v6005_v47 = vmul.f32 %v5843_v9, %v2448_v54 }
 0x1f2   : > { %v2519_v57 = vadd.f32 %v2493_v25, %v5815_v34  ;;  %v2553_v13 = vsel %vm839_vm3, %v6685_v48, %v2552_v30  ;;  %v2555_v16 = vsel %vm839_vm3, %v2552_v30, %v2554_v36  ;;  %v2566_v34 = vrot.slane %v5986_v28, 2 }
 0x1f3   : > { %v2580_v8 = vadd.f32 %v2555_v16, %v2520_v46  ;;  %v6009_v22 = vmul.f32 %v2299_v44, %v4275_v55  ;;  %v2650_v41 = vrot.slane %v2622_v19, 1  ;;  %v6012_v61 = vmul.f32 %v2299_v44, %v4290_v0  ;;  %v2596_v46 = vld [vmem:[#allocation2 + $0x190] sm:$0x3] }
 0x1f4   : > { %v2579_v17 = vadd.f32 %v2553_v13, %v2519_v57  ;;  %v6015_v52 = vmul.f32 %v2299_v44, %v4280_v59  ;;  %v2455_v38 = vmul.f32 %v2299_v44, %v4304_v21  ;;  %v2710_v56 = vrot.slane %v6005_v47, 2 }
 0x1f5   : > { %v6022_v54 = vadd.f32 %v5837_v63, %v2580_v8  ;;  %v2461_v32 = vadd.f32 %v5749_v37, %v2432_v5  ;;  %v2357_v10 = vrot.slane %v6009_v22, 1  ;;  %v6029_v39 = vmul.f32 %v2299_v44, %v4310_v31 }
 0x1f6   : > { %v6019_v15 = vadd.f32 %v5763_v33, %v2579_v17  ;;  %v6032_v28 = vmul.f32 %v2299_v44, %v4323_v50  ;;  %v2450_v33 = vld [vmem:[#allocation2 + $0x190] sm:$0x3]  ;;  %v6035_v3 = vadd.f32 %v2455_v38, %v5888_v12  ;;  %v6039_v25 = vmul.f32 %v2299_v44, %v4326_v51 }
 0x1f7   : > { %6686 = vst [vmem:[#allocation36_spill] sm:$0xff] %v6022_v54  ;;  %v2521_v63 = vadd.f32 %v5834_v29, %v2461_v32  ;;  %v6042_v37 = vmul.f32 %v5843_v9, %v2299_v44  ;;  %v2501_v5 = vrot.slane %v6029_v39, 1  ;;  %v2602_v36 = vmul.f32 %v2299_v44, %v4332_v58 }
 0x1f8   : > { %v2477_v57 = vmul.f32 %v2449_v49, %v4310_v31  ;;  %v6051_v29 = vmul.f32 %v2449_v49, %v4304_v21  ;;  %v2478_v13 = vmul.f32 %v2450_v33, %v4310_v31  ;;  %v2537_v47 = vmul.f32 %v2449_v49, %v4323_v50 }
 0x1f9   : > { %v2581_v12 = vadd.f32 %v5896_v24, %v2521_v63  ;;  %v2538_v17 = vmul.f32 %v2450_v33, %v4323_v50  ;;  %v6058_v8 = vmul.f32 %v2449_v49, %v4332_v58  ;;  %v2623_v24 = vmul.f32 %v2449_v49, %v4326_v51 }
 0x1fa   : > { %v2507_v19 = vrot.slane %v2477_v57, 1  ;;  %v2509_v44 = vrot.slane %v2478_v13, 1  ;;  %v2624_v22 = vmul.f32 %v2596_v46, %v4326_v51  ;;  %v2567_v32 = vrot.slane %v2537_v47, 2  ;;  %v6067_v57 = vld [vmem:[#allocation2 + $0x170] sm:$0xff] }
 0x1fb   : > { %v6062_v38 = vadd.f32 %v2602_v36, %v2581_v12  ;;  %v2569_v39 = vrot.slane %v2538_v17, 2  ;;  %v6065_v63 = vmul.f32 %v5843_v9, %v2449_v49  ;;  %v2651_v33 = vrot.slane %v2623_v24, 1 }
 0x1fc   : > { %v2508_v16 = vsel %vm774_vm2, %v2506_v53, %v2507_v19  ;;  %v2653_v13 = vrot.slane %v2624_v22, 1  ;;  %v2684_v48 = vmul.f32 %v5843_v9, %v2596_v46  ;;  %v2510_v30 = vsel %vm774_vm2, %v2507_v19, %v2509_v44  ;;  %v2447_v19 = vld [vmem:[#allocation2 + $0x178] sm:$0x3] }
 0x1fd   : > { %v2568_v54 = vsel %vm839_vm3, %v2566_v34, %v2567_v32  ;;  %v6074_v36 = vsel %vm839_vm3, %v2567_v32, %v2569_v39  ;;  %v2711_v12 = vrot.slane %v6065_v63, 2  ;;  %v6078_v49 = vsel %vm774_vm2, %v2650_v41, %v2651_v33 }
 0x1fe   : > { %v6081_v47 = vsel %vm774_vm2, %v2651_v33, %v2653_v13  ;;  %v2309_v53 = vmul.f32 %v6067_v57, %v4290_v0  ;;  %v2328_v46 = vmul.f32 %v6067_v57, %v4275_v55  ;;  %v2713_v17 = vrot.slane %v2684_v48, 2 }
 0x1ff   : > { %v2329_v34 = vmul.f32 %v2301_v45, %v4275_v55  ;;  %v2388_v44 = vmul.f32 %v6067_v57, %v4280_v59  ;;  %v2389_v24 = vmul.f32 %v2301_v45, %v4280_v59  ;;  %v6092_v41 = vsel %vm839_vm3, %v2710_v56, %v2711_v12 }
 0x200   : > { %v2358_v22 = vrot.slane %v2328_v46, 1  ;;  %v2456_v32 = vmul.f32 %v6067_v57, %v4304_v21  ;;  %v2474_v0 = vmul.f32 %v6067_v57, %v4310_v31  ;;  %v2475_v55 = vmul.f32 %v2447_v19, %v4310_v31 }
 0x201   : > { %v2360_v39 = vrot.slane %v2329_v34, 1  ;;  %v2418_v63 = vrot.slane %v2388_v44, 2  ;;  %v2420_v48 = vrot.slane %v2389_v24, 2  ;;  %v2522_v56 = vadd.f32 %v5847_v42, %v5989_v6 }
 0x202   : > { %v2359_v33 = vsel %vm774_vm2, %v2357_v10, %v2358_v22  ;;  %v2464_v13 = vadd.f32 %v2456_v32, %v5909_v14  ;;  %v2502_v59 = vrot.slane %v2474_v0, 1  ;;  %v6687_v46 = vrot.slane %v6015_v52, 2 }
 0x203   : > { %v2361_v45 = vsel %vm774_vm2, %v2358_v22, %v2360_v39  ;;  %v2376_v21 = vadd.f32 %v2359_v33, %v6012_v61  ;;  %v2421_v44 = vsel %vm839_vm3, %v2418_v63, %v2420_v48  ;;  %v2504_v10 = vrot.slane %v2475_v55, 1  ;;  %v2593_v22 = vld [vmem:[#allocation2 + $0x178] sm:$0x3] }
 0x204   : > { %v2419_v34 = vsel %vm839_vm3, %v6687_v46, %v2418_v63  ;;  %v2377_v24 = vadd.f32 %v2361_v45, %v2309_v53  ;;  %v2503_v31 = vsel %vm774_vm2, %v2501_v5, %v2502_v59  ;;  %v2534_v14 = vmul.f32 %v6067_v57, %v4323_v50 }
 0x205   : > { %v2436_v32 = vadd.f32 %v2419_v34, %v2376_v21  ;;  %v2523_v42 = vadd.f32 %v2503_v31, %v6035_v3  ;;  %v2535_v6 = vmul.f32 %v2447_v19, %v4323_v50  ;;  %v2582_v61 = vadd.f32 %v5853_v43, %v2522_v56 }
 0x206   : > { %v2437_v52 = vadd.f32 %v2421_v44, %v2377_v24  ;;  %v2505_v0 = vsel %vm774_vm2, %v2502_v59, %v2504_v10  ;;  %v2562_v39 = vrot.slane %v2534_v14, 2  ;;  %v2603_v53 = vmul.f32 %v6067_v57, %v4332_v58 }
 0x207   : > { %v2465_v5 = vadd.f32 %v5982_v7, %v2436_v32  ;;  %v2524_v63 = vadd.f32 %v2505_v0, %v2464_v13  ;;  %v2564_v48 = vrot.slane %v2535_v6, 2  ;;  %v2620_v55 = vmul.f32 %v6067_v57, %v4326_v51  ;;  %v6690_v32 = vld [vmem:[#allocation21_spill] sm:$0xff] }
 0x208   : > { %v2466_v3 = vadd.f32 %v6051_v29, %v2437_v52  ;;  %v6688_v50 = vrot.slane %v6032_v28, 2  ;;  %v2611_v19 = vadd.f32 %v2603_v53, %v2582_v61  ;;  %v2621_v33 = vmul.f32 %v2593_v22, %v4326_v51 }
 0x209   : > { %v2525_v59 = vadd.f32 %v2508_v16, %v2465_v5  ;;  %v2565_v56 = vsel %vm839_vm3, %v2562_v39, %v2564_v48  ;;  %v2646_v21 = vrot.slane %v2620_v55, 1  ;;  %v6128_v7 = vsel %vm839_vm3, %v2711_v12, %v2713_v17  ;;  %v6693_v48 = vld [vmem:[#allocation52_spill] sm:$0xff]  ;;  %v6694_v55 = vld [vmem:[#allocation45_spill] sm:$0xff] }
 0x20a   : > { %v2563_v43 = vsel %vm839_vm3, %v6688_v50, %v2562_v39  ;;  %v2584_v13 = vadd.f32 %v2565_v56, %v2524_v63  ;;  %v2648_v46 = vrot.slane %v2621_v33, 1  ;;  %v2680_v29 = vmul.f32 %v5843_v9, %v6067_v57  ;;  %v6696_v50 = vld [vmem:[#allocation46_spill] sm:$0xff] }
 0x20b   : > { %v2583_v45 = vadd.f32 %v2563_v43, %v2523_v42  ;;  %v6132_v34 = vadd.f32 %v2510_v30, %v2466_v3  ;;  %v6134_v28 = vadd.f32 %v2568_v54, %v2525_v59  ;;  %v6689_v44 = vrot.slane %v6039_v25, 1  ;;  %v6691_v42 = vld [vmem:[#allocation22_spill] sm:$0xff] }
 0x20c   : > { %v2681_v24 = vmul.f32 %v5843_v9, %v2593_v22  ;;  %v6144_v12 = vadd.f32 %v6058_v8, %v2584_v13  ;;  %v2649_v17 = vsel %vm774_vm2, %v2646_v21, %v2648_v46  ;;  %v2706_v10 = vrot.slane %v2680_v29, 2  ;;  %v2863_v33 = vld [vmem:[%s4216_s23 + $0x68] sm:$0xff]  ;;  %v2864_v13 = vld [vmem:[%s4216_s23 + $0x70] sm:$0xff]  ;;  %v2865_v46 = vld [vmem:[%s4216_s23 + $0x78] sm:$0xff] }
 0x20d   : > { %v2647_v16 = vsel %vm774_vm2, %v6689_v44, %v2646_v21  ;;  %v6141_v31 = vadd.f32 %v6000_v2, %v2583_v45  ;;  %v2671_v30 = vadd.f32 %v2649_v17, %v2611_v19  ;;  %v1203_v25 = vadd.f32 %v5929_v26, %v5912_v11  ;;  %v2862_v19 = vld [vmem:[%s4216_s23 + $0x60] sm:$0xff]  ;;  %v6698_v17 = vld [vmem:[#allocation48_spill] sm:$0xff] }
 0x20e   : > { %v2670_v57 = vadd.f32 %v2647_v16, %v6062_v38  ;;  %v2708_v54 = vrot.slane %v2681_v24, 2  ;;  %v1204_v14 = vadd.f32 %v5929_v26, %v5915_v35  ;;  %v1193_v2 = vadd.f32 %v6690_v32, %v5919_v18  ;;  %v6697_v16 = vld [vmem:[#allocation47_spill] sm:$0xff]  ;;  %v6699_v32 = vld [vmem:[#allocation42_spill] sm:$0xff] }
 0x20f   : > { %v1194_v8 = vadd.f32 %v6691_v42, %v5924_v4  ;;  %v1217_v6 = vmax.f32 %v5933_v40, 0.0  ;;  %v6692_v61 = vrot.slane %v6042_v37, 2  ;;  %v1211_v11 = vmax.f32 %v1203_v25, 0.0  ;;  %v2866_v42 = vld [vmem:[%s4216_s23 + $0x80] sm:$0xff] }
 0x210   : > { %v2709_v22 = vsel %vm839_vm3, %v2706_v10, %v2708_v54  ;;  %v1218_v52 = vmax.f32 %v5967_v27, 0.0  ;;  %v1212_v18 = vmax.f32 %v1204_v14, 0.0  ;;  %v1207_v4 = vadd.f32 %v5929_v26, %v1193_v2  ;;  %v6695_v27 = vld [vmem:[#allocation53_spill] sm:$0xff] }
 0x211   : > { %v2707_v38 = vsel %vm839_vm3, %v6692_v61, %v2706_v10  ;;  %v6164_v0 = vadd.f32 %v2709_v22, %v2671_v30  ;;  %v1219_v40 = vmin.f32 %v1211_v11, 6.0  ;;  %v1208_v37 = vadd.f32 %v5929_v26, %v1194_v8  ;;  %v2867_v8 = vld [vmem:[%s4216_s23 + $0x88] sm:$0xff]  ;;  %v6700_v22 = vld [vmem:[#allocation44_spill] sm:$0xff] }
 0x212   : > { %v6162_v35 = vadd.f32 %v2707_v38, %v2670_v57  ;;  %v1225_v39 = vmin.f32 %v1217_v6, 6.0  ;;  %v1226_v53 = vmin.f32 %v1218_v52, 6.0  ;;  %v1220_v5 = vmin.f32 %v1212_v18, 6.0  ;;  %v6701_v11 = vld [vmem:[#allocation40_spill] sm:$0xff] }
 0x213   : > { %v1215_v63 = vmax.f32 %v1207_v4, 0.0  ;;  %v1646_v3 = vadd.f32 %v6694_v55, %v6693_v48  ;;  %v1647_v43 = vadd.f32 %v6696_v50, %v6695_v27  ;;  %v1216_v59 = vmax.f32 %v1208_v37, 0.0  ;;  %v6706_v55 = vld [vmem:[#allocation11_spill] sm:$0xff] }
 0x214   : > { %v3717_v56 = vpack.c.bf16 %v1226_v53, %v1225_v39  ;;  %v1716_v45 = vadd.f32 %v5929_v26, %v5618_v23  ;;  %v1717_v21 = vadd.f32 %v5929_v26, %v5620_v62  ;;  %v3702_v29 = vpack.c.bf16 %v1220_v5, %v1219_v40  ;;  %v6702_v40 = vld [vmem:[#allocation41_spill] sm:$0xff]  ;;  %v6703_v39 = vld [vmem:[#allocation43_spill] sm:$0xff] }
 0x215   : > { %v1223_v44 = vmin.f32 %v1215_v63, 6.0  ;;  %v1706_v24 = vadd.f32 %v6697_v16, %v1646_v3  ;;  %v1707_v57 = vadd.f32 %v6698_v17, %v1647_v43  ;;  %v1224_v30 = vmin.f32 %v1216_v59, 6.0  ;;  %v6705_v63 = vld [vmem:[#allocation58_spill] sm:$0xff]  ;;  %v6707_v3 = vld [vmem:[#allocation25_spill] sm:$0xff]  ;;  %v2868_v43 = vld [vmem:[%s4216_s23 + $0x90] sm:$0xff] }
 0x216   : > { %3781 = vst [vmem:[#allocation3 + $0x18] sm:$0xff] %v3717_v56   ;;  %v1724_v10 = vmax.f32 %v1716_v45, 0.0  ;;  %v1725_v54 = vmax.f32 %v1717_v21, 0.0  ;;  %v2888_v25 = vpack.c.bf16 %v2863_v33, %v2862_v19  ;;  %3703 = vst [vmem:[#allocation3] sm:$0xff] %v3702_v29   ;;  %v2889_v14 = vpack.c.bf16 %v2865_v46, %v2864_v13  ;;  %v2869_v19 = vld [vmem:[%s4216_s23 + $0x98] sm:$0xff]  ;;  %v6708_v45 = vld [vmem:[#allocation38_spill] sm:$0xff] }
 0x217   : > { %v1714_v23 = vadd.f32 %v5929_v26, %v1706_v24  ;;  %v1715_v62 = vadd.f32 %v5929_v26, %v1707_v57  ;;  %v1650_v2 = vadd.f32 %v6699_v32, %v5598_v20  ;;  %v3712_v6 = vpack.c.bf16 %v1224_v30, %v1223_v44  ;;  %v6704_v20 = vld [vmem:[#allocation28_spill] sm:$0xff]  ;;  %v6709_v46 = vld [vmem:[#allocation37_spill] sm:$0xff]  ;;  %v6710_v44 = vld [vmem:[#allocation34_spill] sm:$0xff] }
 0x218   : > { %v1732_v61 = vmin.f32 %v1724_v10, 6.0  ;;  %v1733_v38 = vmin.f32 %v1725_v54, 6.0  ;;  %3900 = vmatprep.mubr.msk.bf16.mxu1 %vm401_vm1, %v2888_v25  ;;  %v1651_v52 = vadd.f32 %v6701_v11, %v6700_v22  ;;  %v1592_v53 = vadd.f32 %v6704_v20, %v6703_v39  ;;  %v6711_v16 = vld [vmem:[#allocation18_spill] sm:$0xff]  ;;  %v6712_v17 = vld [vmem:[#allocation59_spill] sm:$0xff]  ;;  %v2870_v10 = vld [vmem:[%s4216_s23 + $0xa0] sm:$0xff] }
 0x219   : > { %v1722_v18 = vmax.f32 %v1714_v23, 0.0  ;;  %v1723_v4 = vmax.f32 %v1715_v62, 0.0  ;;  %3901 = vmatmul.mubr.msk.bf16.gmra.mxu1 %vm401_vm1, %v2889_v14  ;;  %v1710_v37 = vadd.f32 %v6702_v40, %v1650_v2  ;;  %3780 = vst [vmem:[#allocation3 + $0x10] sm:$0xff] %v3712_v6   ;;  %v1593_v27 = vadd.f32 %v6707_v3, %v6706_v55  ;;  %v6713_v57 = vld [vmem:[#allocation51_spill] sm:$0xff]  ;;  %v2871_v54 = vld [vmem:[%s4216_s23 + $0xa8] sm:$0xff]  ;;  %v4024_v25 = vld [vmem:[#allocation3 + $0x8] sm:$0xff]  }
 0x21a   : > { %v3727_v5 = vpack.c.bf16 %v1733_v38, %v1732_v61  ;;  %v1711_v48 = vadd.f32 %v6705_v63, %v1651_v52  ;;  %v2890_v50 = vpack.c.bf16 %v2867_v8, %v2866_v42  ;;  %v1652_v21 = vadd.f32 %v6708_v45, %v1592_v53  ;;  %v6714_v14 = vld [vmem:[#allocation15_spill] sm:$0xff]  ;;  %v6715_v6 = vld [vmem:[#allocation17_spill] sm:$0xff]  ;;  %v6716_v38 = vld [vmem:[#allocation54_spill] sm:$0xff] }
 0x21b   : > { %v1730_v33 = vmin.f32 %v1722_v18, 6.0  ;;  %v1731_v59 = vmin.f32 %v1723_v4, 6.0  ;;  %v1718_v56 = vadd.f32 %v5929_v26, %v1710_v37  ;;  %v1653_v29 = vadd.f32 %v6709_v46, %v1593_v27  ;;  %v6717_v11 = vld [vmem:[#allocation55_spill] sm:$0xff]  ;;  %v6718_v40 = vld [vmem:[#allocation61_spill] sm:$0xff]  ;;  %v6719_v39 = vld [vmem:[#allocation62_spill] sm:$0xff] }
 0x21c   : > { %3783 = vst [vmem:[#allocation3 + $0x28] sm:$0xff] %v3727_v5   ;;  %v1719_v13 = vadd.f32 %v5929_v26, %v1711_v48  ;;  %3904 = vmatprep.mubr.msk.bf16.mxu1 %vm401_vm1, %v2890_v50  ;;  %v2097_v24 = vadd.f32 %v6711_v16, %v6710_v44  ;;  %v2098_v30 = vadd.f32 %v6713_v57, %v6712_v17  ;;  %v6720_v63 = vld [vmem:[#allocation56_spill] sm:$0xff]  ;;  %v6721_v55 = vld [vmem:[#allocation57_spill] sm:$0xff]  ;;  %v2872_v27 = vld [vmem:[%s4216_s23 + $0xb0] sm:$0xff] }
 0x21d   : > { %v3722_v23 = vpack.c.bf16 %v1731_v59, %v1730_v33  ;;  %v1726_v62 = vmax.f32 %v1718_v56, 0.0  ;;  %v1712_v32 = vadd.f32 %v6714_v14, %v1652_v21  ;;  %v2891_v2 = vpack.c.bf16 %v2869_v19, %v2868_v43  ;;  %v4022_v42 = vld [vmem:[#allocation3] sm:$0xff]   ;;  %v2873_v50 = vld [vmem:[%s4216_s23 + $0xb8] sm:$0xff]  ;;  %v6722_v59 = vld [vmem:[#allocation33_spill] sm:$0xff] }
 0x21e   : > { %v1727_v8 = vmax.f32 %v1719_v13, 0.0  ;;  %v1713_v61 = vadd.f32 %v6715_v6, %v1653_v29  ;;  %v2157_v22 = vadd.f32 %v6716_v38, %v2097_v24  ;;  %v2158_v52 = vadd.f32 %v6717_v11, %v2098_v30  ;;  %3936 = vmatprep.mubr.bf16.mxu0 %v4022_v42  ;;  %v6723_v56 = vld [vmem:[#allocation14_spill] sm:$0xff]  ;;  %v6724_v21 = vld [vmem:[#allocation60_spill] sm:$0xff]  ;;  %v6725_v13 = vld [vmem:[#allocation31_spill] sm:$0xff] }
 0x21f   : > { %3782 = vst [vmem:[#allocation3 + $0x20] sm:$0xff] %v3722_v23   ;;  %v1734_v18 = vmin.f32 %v1726_v62, 6.0  ;;  %v1720_v4 = vadd.f32 %v5929_v26, %v1712_v32  ;;  %v2227_v37 = vadd.f32 %v5929_v26, %v6718_v40  ;;  %v2228_v20 = vadd.f32 %v5929_v26, %v6719_v39  ;;  %3937 = vmatmul.mubr.bf16.vlgmr.msra.gmra.mxu0 %v4024_v25  ;;  %v2874_v17 = vld [vmem:[%s4216_s23 + $0xc0] sm:$0xff]  ;;  %v2875_v62 = vld [vmem:[%s4216_s23 + $0xc8] sm:$0xff] }
 0x220   : > { %v1735_v53 = vmin.f32 %v1727_v8, 6.0  ;;  %v1721_v5 = vadd.f32 %v5929_v26, %v1713_v61  ;;  %v2217_v48 = vadd.f32 %v6720_v63, %v2157_v22  ;;  %v2218_v3 = vadd.f32 %v6721_v55, %v2158_v52  ;;  %v4025_v43 = vld [vmem:[#allocation3 + $0x10] sm:$0xff]   ;;  %v4026_v8 = vld [vmem:[#allocation3 + $0x18] sm:$0xff]  }
 0x221   : > { %v1728_v19 = vmax.f32 %v1720_v4, 0.0  ;;  %3905 = vmatmul.mubr.msk.bf16.gmra.mxu1 %vm401_vm1, %v2891_v2  ;;  %v2892_v33 = vpack.c.bf16 %v2871_v54, %v2870_v10  ;;  %v2161_v45 = vadd.f32 %v6723_v56, %v6722_v59  ;;  %v2162_v46 = vadd.f32 %v6725_v13, %v6724_v21  ;;  %3940 = vmatprep.mubr.bf16.mxu0 %v4025_v43  ;;  %v6726_v30 = vld [vmem:[#allocation29_spill] sm:$0xff]  ;;  %v6727_v10 = vld [vmem:[#allocation32_spill] sm:$0xff]  ;;  %v6728_v55 = vld [vmem:[#allocation30_spill] sm:$0xff] }
 0x222   : > { %v3732_v29 = vpack.c.bf16 %v1735_v53, %v1734_v18  ;;  %v1729_v44 = vmax.f32 %v1721_v5, 0.0  ;;  %v2225_v16 = vadd.f32 %v5929_v26, %v2217_v48  ;;  %v2226_v24 = vadd.f32 %v5929_v26, %v2218_v3  ;;  %v6730_v43 = vld [vmem:[#allocation39_spill] sm:$0xff]  ;;  %v2877_v59 = vld [vmem:[%s4216_s23 + $0xd8] sm:$0xff] }
 0x223   : > { %v1736_v57 = vmin.f32 %v1728_v19, 6.0  ;;  %3908 = vmatprep.mubr.msk.bf16.mxu1 %vm401_vm1, %v2892_v33  ;;  %v2221_v25 = vadd.f32 %v6726_v30, %v2161_v45  ;;  %v2222_v54 = vadd.f32 %v6727_v10, %v2162_v46  ;;  %v2893_v23 = vpack.c.bf16 %v2873_v50, %v2872_v27  ;;  %v2876_v33 = vld [vmem:[%s4216_s23 + $0xd0] sm:$0xff]  ;;  %v2878_v46 = vld [vmem:[%s4216_s23 + $0xe0] sm:$0xff] }
 0x224   : > { %3784 = vst [vmem:[#allocation3 + $0x30] sm:$0xff] %v3732_v29   ;;  %v1737_v14 = vmin.f32 %v1729_v44, 6.0  ;;  %v2233_v32 = vmax.f32 %v2225_v16, 0.0  ;;  %v2234_v2 = vmax.f32 %v2226_v24, 0.0  ;;  %v2235_v42 = vmax.f32 %v2227_v37, 0.0  ;;  %v6731_v13 = vld [vmem:[#allocation35_spill] sm:$0xff] }
 0x225   : > { %v2236_v6 = vmax.f32 %v2228_v20, 0.0  ;;  %v2229_v61 = vadd.f32 %v5929_v26, %v2221_v25  ;;  %v2230_v38 = vadd.f32 %v5929_v26, %v2222_v54  ;;  %v2231_v22 = vadd.f32 %v5929_v26, %v5962_v1  ;;  %v6732_v44 = vld [vmem:[#allocation63_spill] sm:$0xff] }
 0x226   : > { %v4027_v11 = vld [vmem:[#allocation3 + $0x20] sm:$0xff]   ;;  %v3737_v52 = vpack.c.bf16 %v1737_v14, %v1736_v57  ;;  %v2241_v18 = vmin.f32 %v2233_v32, 6.0  ;;  %v2232_v4 = vadd.f32 %v5929_v26, %v5976_v60  ;;  %v2894_v40 = vpack.c.bf16 %v2875_v62, %v2874_v17  ;;  %v6729_v60 = vld [vmem:[#allocation36_spill] sm:$0xff]  ;;  %v2879_v57 = vld [vmem:[%s4216_s23 + $0xe8] sm:$0xff] }
 0x227   : > { %v2242_v39 = vmin.f32 %v2234_v2, 6.0  ;;  %v2243_v37 = vmin.f32 %v2235_v42, 6.0  ;;  %v2244_v53 = vmin.f32 %v2236_v6, 6.0  ;;  %v2237_v20 = vmax.f32 %v2229_v61, 0.0  ;;  %3941 = vmatmul.mubr.bf16.gmra.mxu0 %v4026_v8  ;;  %v4028_v62 = vld [vmem:[#allocation3 + $0x28] sm:$0xff]   ;;  %v4043_v8 = vld [vmem:[#allocation2] sm:$0xff] }
 0x228   : > { %3785 = vst [vmem:[#allocation3 + $0x38] sm:$0xff] %v3737_v52   ;;  %v2238_v5 = vmax.f32 %v2230_v38, 0.0  ;;  %v2239_v63 = vmax.f32 %v2231_v22, 0.0  ;;  %v2240_v48 = vmax.f32 %v2232_v4, 0.0  ;;  %v2668_v1 = vadd.f32 %v6728_v55, %v6019_v15  ;;  %3944 = vmatprep.mubr.bf16.mxu0 %v4027_v11 }
 0x229   : > { %v3742_v3 = vpack.c.bf16 %v2242_v39, %v2241_v18  ;;  %v3747_v27 = vpack.c.bf16 %v2244_v53, %v2243_v37  ;;  %v2245_v50 = vmin.f32 %v2237_v20, 6.0  ;;  %3909 = vmatmul.mubr.msk.bf16.gmra.mxu1 %vm401_vm1, %v2893_v23  ;;  %v2669_v19 = vadd.f32 %v6730_v43, %v6729_v60  ;;  %v2599_v23 = vld [vmem:[#allocation2 + $0x1a8] sm:$0x3] }
 0x22a   : > { %v2246_v56 = vmin.f32 %v2238_v5, 6.0  ;;  %v2247_v45 = vmin.f32 %v2239_v63, 6.0  ;;  %v2248_v21 = vmin.f32 %v2240_v48, 6.0  ;;  %3912 = vmatprep.mubr.msk.bf16.mxu1 %vm401_vm1, %v2894_v40  ;;  %v2728_v15 = vadd.f32 %v6731_v13, %v2668_v1  ;;  %v2881_v40 = vld [vmem:[%s4216_s23 + $0xf8] sm:$0xff] }
 0x22b   : > { %v2586_v29 = vadd.f32 %v6074_v36, %v6132_v34  ;;  %3786 = vst [vmem:[#allocation3 + $0x40] sm:$0xff] %v3742_v3   ;;  %3787 = vst [vmem:[#allocation3 + $0x48] sm:$0xff] %v3747_v27   ;;  %v2729_v16 = vadd.f32 %v6732_v44, %v2669_v19  ;;  %v2738_v24 = vadd.f32 %v5929_v26, %v6162_v35  ;;  %v4029_v2 = vld [vmem:[#allocation3 + $0x30] sm:$0xff]  }
 0x22c   : > { %v2739_v17 = vadd.f32 %v5929_v26, %v6164_v0  ;;  %v3752_v30 = vpack.c.bf16 %v2246_v56, %v2245_v50  ;;  %v3757_v25 = vpack.c.bf16 %v2248_v21, %v2247_v45  ;;  %v2736_v10 = vadd.f32 %v5929_v26, %v2728_v15 }
 0x22d   : > { %v2895_v54 = vpack.c.bf16 %v2877_v59, %v2876_v33  ;;  %v2737_v36 = vadd.f32 %v5929_v26, %v2729_v16  ;;  %v2746_v34 = vmax.f32 %v2738_v24, 0.0  ;;  %v2672_v32 = vadd.f32 %v6078_v49, %v6141_v31 }
 0x22e   : > { %v2747_v14 = vmax.f32 %v2739_v17, 0.0  ;;  %3788 = vst [vmem:[#allocation3 + $0x50] sm:$0xff] %v3752_v30   ;;  %3789 = vst [vmem:[#allocation3 + $0x58] sm:$0xff] %v3757_v25   ;;  %v2744_v35 = vmax.f32 %v2736_v10, 0.0  ;;  %v2896_v0 = vpack.c.bf16 %v2879_v57, %v2878_v46  ;;  %v2673_v42 = vadd.f32 %v6081_v47, %v6144_v12 }
 0x22f   : > { %v2606_v6 = vmul.f32 %v4043_v8, %v4332_v58  ;;  %v2745_v61 = vmax.f32 %v2737_v36, 0.0  ;;  %v2732_v38 = vadd.f32 %v6092_v41, %v2672_v32  ;;  %v2625_v22 = vmul.f32 %v4043_v8, %v4326_v51  ;;  %3945 = vmatmul.mubr.bf16.gmra.mxu0 %v4028_v62  ;;  %v2880_v58 = vld [vmem:[%s4216_s23 + $0xf0] sm:$0xff]  ;;  %s296_s23 = sand.u32 1, %s4096_s28  }
 0x230   : > { %v2627_v49 = vmul.f32 %v2599_v23, %v4326_v51  ;;  %v2752_v31 = vmin.f32 %v2744_v35, 6.0  ;;  %v2754_v11 = vmin.f32 %v2746_v34, 6.0  ;;  %v2755_v52 = vmin.f32 %v2747_v14, 6.0  ;;  %3948 = vmatprep.mubr.bf16.mxu0 %v4029_v2  ;;  %s3565_s21 = sshll.u32 %s296_s23, 8  ;;  %s6386_s9 = scalar_lea.sflag [#allocation5], %s296_s23 }
 0x231   : > { %v2733_v18 = vadd.f32 %v6128_v7, %v2673_v42  ;;  %v2753_v4 = vmin.f32 %v2745_v61, 6.0  ;;  %3913 = vmatmul.mubr.msk.bf16.gmra.mxu1 %vm401_vm1, %v2895_v54  ;;  %v2740_v47 = vadd.f32 %v5929_v26, %v2732_v38  ;;  %v2614_v12 = vadd.f32 %v2606_v6, %v6134_v28  ;;  %v4030_v28 = vld [vmem:[#allocation3 + $0x38] sm:$0xff]   ;;  %s6303_s25 = scalar_lea.vmem [#allocation4], %s3565_s21  ;;  %s4050_s21 = scalar_lea.vmem %s4049_s20, 8192 }
 0x232   : > { %v3767_v41 = vpack.c.bf16 %v2755_v52, %v2754_v11  ;;  %3916 = vmatprep.mubr.msk.bf16.mxu1 %vm401_vm1, %v2896_v0  ;;  %v2655_v39 = vrot.slane %v2625_v22, 1  ;;  %v2685_v37 = vmul.f32 %v4043_v8, %v5843_v9  ;;  %v2615_v20 = vadd.f32 %v2606_v6, %v2586_v29  ;;  %v4031_v59 = vld [vmem:[#allocation3 + $0x40] sm:$0xff]   ;;  %v4032_v44 = vld [vmem:[#allocation3 + $0x48] sm:$0xff]   ;;  %s3499_s10 = sshll.u32 %s6303_s25, 4  ;;  %s6379_s10 = int_to_ptr.vmem [resolvable:$true] %s3499_s10 }
 0x233   : > { %v2741_v51 = vadd.f32 %v5929_v26, %v2733_v18  ;;  %v3762_v7 = vpack.c.bf16 %v2753_v4, %v2752_v31  ;;  %v2748_v53 = vmax.f32 %v2740_v47, 0.0  ;;  %v2687_v5 = vmul.f32 %v5843_v9, %v2599_v23  ;;  %s4044_s18 = scalar_lea.vmem %s6379_s10, 4096  ;;  %p4051_p0 = scmp.lt.s32.totalorder %s6379_s10, %s4049_s20 }
 0x234   : > { %3791 = vst [vmem:[#allocation3 + $0x68] sm:$0xff] %v3767_v41   ;;  %v2658_v48 = vrot.slane %v2627_v49, 1  ;;  %v2715_v55 = vrot.slane %v2685_v37, 2  ;;  %v2897_v3 = vpack.c.bf16 %v2881_v40, %v2880_v58  ;;  %v2674_v27 = vadd.f32 %v2655_v39, %v2614_v12  ;;  %v6298_v49 = vld [vmem:[%s6432_s6] ss:$0 sm:$0xff]  ;;  %p4045_p11 = scmp.ne.s32.totalorder %s6379_s10, %s4044_s18  ;;  %p4052_p1 = scmp.lt.s32.totalorder %s4050_s21, %s4044_s18 }
 0x235   : > { %v2749_v63 = vmax.f32 %v2741_v51, 0.0  ;;  %3790 = vst [vmem:[#allocation3 + $0x60] sm:$0xff] %v3762_v7   ;;  %v2756_v1 = vmin.f32 %v2748_v53, 6.0  ;;  %v2718_v19 = vrot.slane %v2687_v5, 2  ;;  %v4033_v16 = vld [vmem:[#allocation3 + $0x50] sm:$0xff]   ;;  %v4034_v57 = vld [vmem:[#allocation3 + $0x58] sm:$0xff]  }
 0x236   : > { %v2659_v60 = vsel %vm774_vm2, %v2655_v39, %v2658_v48  ;;  %v2734_v33 = vadd.f32 %v2715_v55, %v2674_v27  ;;  %p4046_p12 = pnand %p4045_p11, %p4193_p5  ;;  %p4053_p2 = por %p4052_p1, %p4051_p0 }
 0x237   : > { %v2757_v50 = vmin.f32 %v2749_v63, 6.0  ;;  %v2675_v43 = vadd.f32 %v2659_v60, %v2615_v20  ;;  %3949 = vmatmul.mubr.bf16.gmra.mxu0 %v4030_v28  ;;  %v2719_v9 = vsel %vm839_vm3, %v2715_v55, %v2718_v19 }
 0x238   : > { %v2742_v45 = vadd.f32 %v5929_v26, %v2734_v33  ;;  %3952 = vmatprep.mubr.bf16.mxu0 %v4031_v59  ;;  %p4047_p13 = pneg %p4046_p12 }
 0x239   : > { %v3772_v56 = vpack.c.bf16 %v2757_v50, %v2756_v1  ;;  %3917 = vmatmul.mubr.msk.bf16.gmra.mxu1 %vm401_vm1, %v2897_v3  ;;  %v2735_v21 = vadd.f32 %v2719_v9, %v2675_v43 }
 0x23a   : > { %v2750_v13 = vmax.f32 %v2742_v45, 0.0  ;;  %p4054_p3 = pnand %p4053_p2, %p4047_p13 }
 0x23b   : > { %3792 = vst [vmem:[#allocation3 + $0x70] sm:$0xff] %v3772_v56   ;;  %v2743_v15 = vadd.f32 %v5929_v26, %v2735_v21  ;;  %v4036_v25 = vld [vmem:[#allocation3 + $0x68] sm:$0xff]  }
 0x23c   : > { %v2758_v29 = vmin.f32 %v2750_v13, 6.0  ;;  %v4035_v30 = vld [vmem:[#allocation3 + $0x60] sm:$0xff]  }
 0x23d   : > { %v2751_v46 = vmax.f32 %v2743_v15, 0.0 }
 0x23f   : > { %v2759_v24 = vmin.f32 %v2751_v46, 6.0  ;;  %3953 = vmatmul.mubr.bf16.gmra.mxu0 %v4032_v44 }
 0x240   : > { %3956 = vmatprep.mubr.bf16.mxu0 %v4033_v16 }
 0x241   : > { %v3777_v17 = vpack.c.bf16 %v2759_v24, %v2758_v29 }
 0x242   : > { %v4037_v10 = vld [vmem:[#allocation3 + $0x70] sm:$0xff]  }
 0x243   : > { %3793 = vst [vmem:[#allocation3 + $0x78] sm:$0xff] %v3777_v17  }
 0x247   : > { %3957 = vmatmul.mubr.bf16.gmra.mxu0 %v4034_v57 }
 0x248   : > { %3960 = vmatprep.mubr.bf16.mxu0 %v4035_v30 }
 0x24a   : > { %v4038_v54 = vld [vmem:[#allocation3 + $0x78] sm:$0xff]  }
 0x24b   : > { %v3890_v26 = vpop.f32.mrf.mxu1 }
 0x24d   : > { %v2983_v23 = vpop.f32.mrf.mxu1 }
 0x24f   : > { %3961 = vmatmul.mubr.bf16.gmra.mxu0 %v4036_v25  ;;  %v3891_v62 = vpop.f32.mrf.mxu1 }
 0x250   : > { %3964 = vmatprep.mubr.bf16.mxu0 %v4037_v10 }
 0x251   : > { %v2986_v36 = vpop.f32.mrf.mxu1 }
 0x257   : > { %3965 = vmatmul.mubr.bf16.gmra.mxu0 %v4038_v54 }
 0x29e   : > { %v3894_v34 = vpop.f32.mrf.mxu1 }
 0x2a0   : > { %v2999_v14 = vpop.f32.mrf.mxu1 }
 0x2a2   : > { %v3895_v32 = vpop.f32.mrf.mxu1 }
 0x2a4   : > { %v3002_v2 = vpop.f32.mrf.mxu1 }
 0x2a6   : > { %v3898_v35 = vpop.f32.mrf.mxu1 }
 0x2a8   : > { %v3015_v0 = vpop.f32.mrf.mxu1 }
 0x2aa   : > { %v3899_v42 = vpop.f32.mrf.mxu1 }
 0x2ac   : > { %v3018_v8 = vpop.f32.mrf.mxu1 }
 0x2d9   : > { %v3902_v6 = vpop.f32.mrf.mxu1 }
 0x2db   : > { %v6286_v61 = vpop.f32.mrf.mxu1 }
 0x2dd   : > { %v6289_v38 = vpop.f32.mrf.mxu1 }
 0x2df   : > { %v6291_v22 = vpop.f32.mrf.mxu1  ;;  %v3938_v31 = vpop.f32.mrf.mxu0 }
 0x2e0   : > { %v3297_v11 = vadd.f32 %v3938_v31, %v3890_v26 }
 0x2e1   : > { %v3288_v52 = vpop.f32.mrf.mxu0  ;;  %v6300_v18 = vpop.f32.mrf.mxu1 }
 0x2e2   : > { %v3423_v4 = vadd.f32 %v6298_v49, %v3297_v11  ;;  %v3289_v47 = vadd.f32 %v3288_v52, %v2983_v23 }
 0x2e3   : > { %v3939_v58 = vpop.f32.mrf.mxu0  ;;  %v6307_v40 = vpop.f32.mrf.mxu1 }
 0x2e4   : > { %3455 = vst [vmem:[%s6303_s25 + $0x10] sm:$0xff] %v3423_v4  ;;  %v3421_v12 = vadd.f32 %v6298_v49, %v3289_v47  ;;  %v3300_v41 = vadd.f32 %v3939_v58, %v3891_v62 }
 0x2e5   : > { %v3291_v51 = vpop.f32.mrf.mxu0  ;;  %v3907_v63 = vpop.f32.mrf.mxu1 }
 0x2e6   : > { %3453 = vst [vmem:[%s6303_s25] sm:$0xff] %v3421_v12  ;;  %v3424_v39 = vadd.f32 %v6298_v49, %v3300_v41  ;;  %v3292_v37 = vadd.f32 %v3291_v51, %v2986_v36 }
 0x2e7   : > { %v3942_v7 = vpop.f32.mrf.mxu0  ;;  %v3050_v50 = vpop.f32.mrf.mxu1 }
 0x2e8   : > { %3456 = vst [vmem:[%s6303_s25 + $0x18] sm:$0xff] %v3424_v39  ;;  %v3422_v53 = vadd.f32 %v6298_v49, %v3292_v37  ;;  %v3313_v20 = vadd.f32 %v3942_v7, %v3894_v34 }
 0x2e9   : > { %v3304_v5 = vpop.f32.mrf.mxu0  ;;  %v3910_v9 = vpop.f32.mrf.mxu1 }
 0x2ea   : > { %3454 = vst [vmem:[%s6303_s25 + $0x8] sm:$0xff] %v3422_v53  ;;  %v3427_v48 = vadd.f32 %v6298_v49, %v3313_v20  ;;  %v3305_v55 = vadd.f32 %v3304_v5, %v2999_v14 }
 0x2eb   : > { %v3943_v28 = vpop.f32.mrf.mxu0  ;;  %v3063_v44 = vpop.f32.mrf.mxu1 }
 0x2ec   : > { %3459 = vst [vmem:[%s6303_s25 + $0x30] sm:$0xff] %v3427_v48  ;;  %v3425_v1 = vadd.f32 %v6298_v49, %v3305_v55  ;;  %v3316_v3 = vadd.f32 %v3943_v28, %v3895_v32 }
 0x2ed   : > { %v3307_v27 = vpop.f32.mrf.mxu0  ;;  %v3911_v10 = vpop.f32.mrf.mxu1 }
 0x2ee   : > { %3457 = vst [vmem:[%s6303_s25 + $0x20] sm:$0xff] %v3425_v1  ;;  %v3428_v60 = vadd.f32 %v6298_v49, %v3316_v3  ;;  %v3308_v43 = vadd.f32 %v3307_v27, %v3002_v2 }
 0x2ef   : > { %v3946_v19 = vpop.f32.mrf.mxu0  ;;  %v3066_v14 = vpop.f32.mrf.mxu1 }
 0x2f0   : > { %3460 = vst [vmem:[%s6303_s25 + $0x38] sm:$0xff] %v3428_v60  ;;  %v3426_v33 = vadd.f32 %v6298_v49, %v3308_v43  ;;  %v3329_v59 = vadd.f32 %v3946_v19, %v3898_v35 }
 0x2f1   : > { %v3320_v56 = vpop.f32.mrf.mxu0 }
 0x2f2   : > { %3458 = vst [vmem:[%s6303_s25 + $0x28] sm:$0xff] %v3426_v33  ;;  %v3431_v45 = vadd.f32 %v6298_v49, %v3329_v59  ;;  %v3321_v21 = vadd.f32 %v3320_v56, %v3015_v0 }
 0x2f3   : > { %v3947_v13 = vpop.f32.mrf.mxu0 }
 0x2f4   : > { %3463 = vst [vmem:[%s6303_s25 + $0x50] sm:$0xff] %v3431_v45  ;;  %v3429_v15 = vadd.f32 %v6298_v49, %v3321_v21  ;;  %v3332_v46 = vadd.f32 %v3947_v13, %v3899_v42 }
 0x2f5   : > { %v3323_v29 = vpop.f32.mrf.mxu0 }
 0x2f6   : > { %3461 = vst [vmem:[%s6303_s25 + $0x40] sm:$0xff] %v3429_v15  ;;  %v3432_v16 = vadd.f32 %v6298_v49, %v3332_v46  ;;  %v3324_v24 = vadd.f32 %v3323_v29, %v3018_v8 }
 0x2f7   : > { %v3950_v17 = vpop.f32.mrf.mxu0 }
 0x2f8   : > { %3464 = vst [vmem:[%s6303_s25 + $0x58] sm:$0xff] %v3432_v16  ;;  %v3430_v57 = vadd.f32 %v6298_v49, %v3324_v24  ;;  %v3345_v30 = vadd.f32 %v3950_v17, %v3902_v6  ;;  %v3914_v6 = vpop.f32.mrf.mxu1 }
 0x2f9   : > { %v3336_v25 = vpop.f32.mrf.mxu0 }
 0x2fa   : > { %3462 = vst [vmem:[%s6303_s25 + $0x48] sm:$0xff] %v3430_v57  ;;  %v3435_v54 = vadd.f32 %v6298_v49, %v3345_v30  ;;  %v3337_v26 = vadd.f32 %v3336_v25, %v6286_v61  ;;  %v3079_v4 = vpop.f32.mrf.mxu1 }
 0x2fb   : > { %v3951_v23 = vpop.f32.mrf.mxu0 }
 0x2fc   : > { %3467 = vst [vmem:[%s6303_s25 + $0x70] sm:$0xff] %v3435_v54  ;;  %v3433_v62 = vadd.f32 %v6298_v49, %v3337_v26  ;;  %v3348_v36 = vadd.f32 %v3951_v23, %v6289_v38 }
 0x2fd   : > { %v3339_v34 = vpop.f32.mrf.mxu0 }
 0x2fe   : > { %3465 = vst [vmem:[%s6303_s25 + $0x60] sm:$0xff] %v3433_v62  ;;  %v3436_v32 = vadd.f32 %v6298_v49, %v3348_v36  ;;  %v3340_v2 = vadd.f32 %v3339_v34, %v6291_v22 }
 0x2ff   : > { %v3954_v35 = vpop.f32.mrf.mxu0 }
 0x300   : > { %3468 = vst [vmem:[%s6303_s25 + $0x78] sm:$0xff] %v3436_v32  ;;  %v3434_v0 = vadd.f32 %v6298_v49, %v3340_v2  ;;  %v3361_v42 = vadd.f32 %v3954_v35, %v6300_v18 }
 0x301   : > { %v3352_v8 = vpop.f32.mrf.mxu0 }
 0x302   : > { %3466 = vst [vmem:[%s6303_s25 + $0x68] sm:$0xff] %v3434_v0  ;;  %v3439_v61 = vadd.f32 %v6298_v49, %v3361_v42  ;;  %v3353_v38 = vadd.f32 %v3352_v8, %v6307_v40  ;;  %v3915_v40 = vpop.f32.mrf.mxu1 }
 0x303   : > { %v3955_v31 = vpop.f32.mrf.mxu0 }
 0x304   : > { %3471 = vst [vmem:[%s6303_s25 + $0x90] sm:$0xff] %v3439_v61  ;;  %v3437_v22 = vadd.f32 %v6298_v49, %v3353_v38  ;;  %v3364_v11 = vadd.f32 %v3955_v31, %v3907_v63  ;;  %v3082_v63 = vpop.f32.mrf.mxu1 }
 0x305   : > { %v3355_v52 = vpop.f32.mrf.mxu0 }
 0x306   : > { %3469 = vst [vmem:[%s6303_s25 + $0x80] sm:$0xff] %v3437_v22  ;;  %v3440_v18 = vadd.f32 %v6298_v49, %v3364_v11  ;;  %v3356_v47 = vadd.f32 %v3355_v52, %v3050_v50  ;;  %v3918_v27 = vpop.f32.mrf.mxu1 }
 0x307   : > { %v3958_v58 = vpop.f32.mrf.mxu0 }
 0x308   : > { %3472 = vst [vmem:[%s6303_s25 + $0x98] sm:$0xff] %v3440_v18  ;;  %v3438_v12 = vadd.f32 %v6298_v49, %v3356_v47  ;;  %v3377_v41 = vadd.f32 %v3958_v58, %v3910_v9  ;;  %v3095_v56 = vpop.f32.mrf.mxu1 }
 0x309   : > { %v3368_v51 = vpop.f32.mrf.mxu0 }
 0x30a   : > { %3470 = vst [vmem:[%s6303_s25 + $0x88] sm:$0xff] %v3438_v12  ;;  %v3443_v39 = vadd.f32 %v6298_v49, %v3377_v41  ;;  %v3369_v37 = vadd.f32 %v3368_v51, %v3063_v44  ;;  %v3919_v29 = vpop.f32.mrf.mxu1 }
 0x30b   : > { %v3959_v7 = vpop.f32.mrf.mxu0 }
 0x30c   : > { %3475 = vst [vmem:[%s6303_s25 + $0xb0] sm:$0xff] %v3443_v39  ;;  %v3441_v53 = vadd.f32 %v6298_v49, %v3369_v37  ;;  %v3380_v20 = vadd.f32 %v3959_v7, %v3911_v10  ;;  %v3098_v25 = vpop.f32.mrf.mxu1 }
 0x30d   : > { %v3371_v5 = vpop.f32.mrf.mxu0 }
 0x30e   : > { %3473 = vst [vmem:[%s6303_s25 + $0xa0] sm:$0xff] %v3441_v53  ;;  %v3444_v48 = vadd.f32 %v6298_v49, %v3380_v20  ;;  %v3372_v55 = vadd.f32 %v3371_v5, %v3066_v14 }
 0x30f   : > { %v3962_v28 = vpop.f32.mrf.mxu0 }
 0x310   : > { %3476 = vst [vmem:[%s6303_s25 + $0xb8] sm:$0xff] %v3444_v48  ;;  %v3442_v1 = vadd.f32 %v6298_v49, %v3372_v55  ;;  %v3393_v3 = vadd.f32 %v3962_v28, %v3914_v6 }
 0x311   : > { %v3384_v50 = vpop.f32.mrf.mxu0 }
 0x312   : > { %3474 = vst [vmem:[%s6303_s25 + $0xa8] sm:$0xff] %v3442_v1  ;;  %v3447_v60 = vadd.f32 %v6298_v49, %v3393_v3  ;;  %v3385_v43 = vadd.f32 %v3384_v50, %v3079_v4 }
 0x313   : > { %v3963_v19 = vpop.f32.mrf.mxu0 }
 0x314   : > { %3479 = vst [vmem:[%s6303_s25 + $0xd0] sm:$0xff] %v3447_v60  ;;  %v3445_v33 = vadd.f32 %v6298_v49, %v3385_v43  ;;  %v3396_v59 = vadd.f32 %v3963_v19, %v3915_v40 }
 0x315   : > { %v3387_v9 = vpop.f32.mrf.mxu0 }
 0x316   : > { %3477 = vst [vmem:[%s6303_s25 + $0xc0] sm:$0xff] %v3445_v33  ;;  %v3448_v45 = vadd.f32 %v6298_v49, %v3396_v59  ;;  %v3388_v21 = vadd.f32 %v3387_v9, %v3082_v63 }
 0x317   : > { %v3966_v13 = vpop.f32.mrf.mxu0 }
 0x318   : > { %3480 = vst [vmem:[%s6303_s25 + $0xd8] sm:$0xff] %v3448_v45  ;;  %v3446_v15 = vadd.f32 %v6298_v49, %v3388_v21  ;;  %v3409_v46 = vadd.f32 %v3966_v13, %v3918_v27 }
 0x319   : > { %v3400_v44 = vpop.f32.mrf.mxu0 }
 0x31a   : > { %3478 = vst [vmem:[%s6303_s25 + $0xc8] sm:$0xff] %v3446_v15  ;;  %v3451_v16 = vadd.f32 %v6298_v49, %v3409_v46  ;;  %v3401_v24 = vadd.f32 %v3400_v44, %v3095_v56 }
 0x31b   : > { %v3967_v17 = vpop.f32.mrf.mxu0 }
 0x31c   : > { %3483 = vst [vmem:[%s6303_s25 + $0xf0] sm:$0xff] %v3451_v16  ;;  %v3449_v57 = vadd.f32 %v6298_v49, %v3401_v24  ;;  %v3412_v30 = vadd.f32 %v3967_v17, %v3919_v29 }
 0x31d   : > { %v3403_v10 = vpop.f32.mrf.mxu0 }
 0x31e   : > { %3481 = vst [vmem:[%s6303_s25 + $0xe0] sm:$0xff] %v3449_v57  ;;  %v3452_v54 = vadd.f32 %v6298_v49, %v3412_v30  ;;  %v3404_v26 = vadd.f32 %v3403_v10, %v3098_v25 }
 0x320   : > { %3484 = vst [vmem:[%s6303_s25 + $0xf8] sm:$0xff] %v3452_v54  ;;  %v3450_v23 = vadd.f32 %v6298_v49, %v3404_v26 }
 0x322   : > { %3482 = vst [vmem:[%s6303_s25 + $0xe8] sm:$0xff] %v3450_v23 }
 0x323   : > { %4057 = shalt.err (!%p4054_p3)
}
 0x324   : > { %s4058_s23 = scalar_lea.hbm %s6377_s17, 4096  ;;  %s4062_s25 = scalar_lea.hbm %s6434_s8, 8192 }
 0x325   : > { %p4059_p4 = scmp.ne.s32.totalorder %s6377_s17, %s4058_s23  ;;  %p4063_p9 = scmp.lt.s32.totalorder %s6377_s17, %s6434_s8 }
 0x326   : > { %p4064_p10 = scmp.lt.s32.totalorder %s4062_s25, %s4058_s23 }
 0x327   : > { %p4060_p7 = pnand %p4059_p4, %p4193_p5 }
 0x328   : > { %p4065_p11 = por %p4064_p10, %p4063_p9 }
 0x329   : > { %p4061_p8 = pneg %p4060_p7 }
 0x32b   : > { %p4066_p12 = pnand %p4065_p11, %p4061_p8 }
 0x32d   : > { %4069 = shalt.err (!%p4066_p12)
}
 0x32e   : > { %s4108_s13 = smov 128   ;;  %s4109_s18 = smov 8  }
 0x32f   : > { %3973 = dma.vmem_to_hbm [thread:$0]  (%p4193_p5), %s6379_s10, 4096, %s6377_s17, %s6386_s9, %s4108_s13, %s4108_s13, %s4109_s18  }
 0x330 PF: > { %p3979_p13 = scmp.ge.s32.totalorder %s4104_s30, 2  ;;  %s3514_s19 = sand.u32 1, %s4092_s27  }
 0x331   : > { %s3515_s20 = scalar_lea.sflag [#allocation5], %s3514_s19 }
 0x332   : > { %p3976_p0 = pnand %p3979_p13, %p4197_p6 }
 0x334   : > { %p3977_p1 = pneg %p3976_p0 }
 0x336   : > { %4087 = dma.done.wait (%p3977_p1), %s3515_s20, 4096  }
 0x337   : > { %4089 = vsyncadd (%p3977_p1), %s3515_s20, 4294963200  ;;  %p18_p2 = scmp.ge.s32.totalorder %s4180_s11, 4   ;;  %s6733_s27 = smov %s4096_s28 }
 0x338   : > { %s6734_s28 = smov %s4100_s29  ;;  %s6735_s29 = smov %s4191_s14 }
 0x339   : > { %s6736_s30 = smov %s4180_s11  ;;  %20 = sbr.rel (!%p18_p2) target bundleno = 3 (0x3), region = 99 }
 0x33e   :  { %3520 = vsyncpa [#allocation5], 1 }
 0x33f   :  { %3522 = vsyncpa [#allocation5 + $0x1], 1 }

</bundles_post_ra>
